<compile_context>
chip_gen: v5e
topology: v5e:2x2
jax: 0.10.0
libtpu: 0.0.40
codegen_flags: <defaults>
</compile_context>

<pallas_src>
import jax
import jax.numpy as jnp
import numpy as np
from jax import lax
from jax.experimental import pallas as pl
from jax.experimental.pallas import tpu as pltpu

# Flip to jnp.bfloat16 on v6e/v7x for halved weight DMA (f32 accumulation is
# kept either way); f32 default keeps the strict 1e-3 check.
PARAM_DTYPE = jnp.float32


# ----------------------------- fused kernel --------------------------------

def _basic_net_kernel(x_ref, m1_ref, b1_ref, rs1_ref, cs1_ref,
                      m2_ref, b2_ref, rs2_ref, cs2_ref,
                      wfc1_ref, bfc1_ref, wfc2_ref, bfc2_ref,
                      out_ref, p1_scr, p2_scr):
    f32 = jnp.float32
    cd = m1_ref.dtype                      # MXU input dtype (f32 or bf16)

    def mm(a, b):
        return jnp.dot(a.astype(cd), b.astype(cd), preferred_element_type=f32)

    # ---- conv1 + bias + ReLU: (58, 90) -> (56, 168) ------------------------
    # acc1[h, w*6+o] = sum_{dy,dx,c} x[h+dy, (w+dx)*3+c] * w1[o,c,dy,dx]
    acc1 = mm(x_ref[0, 0:56, :], m1_ref[0])
    for dy in (1, 2):
        acc1 = acc1 + mm(x_ref[0, dy:dy + 56, :], m1_ref[dy])
    a1 = jnp.maximum(acc1 + b1_ref[...].astype(f32), 0.0)          # (56, 168)

    # ---- pool1 (2x2 max) as exact gather matmuls: -> (28, 84) --------------
    r1 = jnp.maximum(mm(rs1_ref[0], a1), mm(rs1_ref[1], a1))        # (28, 168)
    p1_scr[...] = jnp.maximum(mm(r1, cs1_ref[0]), mm(r1, cs1_ref[1]))

    # ---- conv2 + bias + ReLU: (28, 84) -> (26, 192) ------------------------
    acc2 = mm(p1_scr[0:26, :], m2_ref[0])
    for dy in (1, 2):
        acc2 = acc2 + mm(p1_scr[dy:dy + 26, :], m2_ref[dy])
    a2 = jnp.maximum(acc2 + b2_ref[...].astype(f32), 0.0)          # (26, 192)

    # ---- pool2: (26, 192) -> (13, 96) ---------------------------------------
    r2 = jnp.maximum(mm(rs2_ref[0], a2), mm(rs2_ref[1], a2))        # (13, 192)
    p2_scr[...] = jnp.maximum(mm(r2, cs2_ref[0]), mm(r2, cs2_ref[1]))

    # ---- fc1 + ReLU --------------------------------------------------------
    # wfc1_ref rows are pre-permuted so block i, row j*16+o corresponds to
    # torch's NCHW flatten index o*78 + i*6 + j -> no activation transpose.
    h = mm(p2_scr[0:1, :], wfc1_ref[0])
    for i in range(1, 13):
        h = h + mm(p2_scr[i:i + 1, :], wfc1_ref[i])
    h = jnp.maximum(h + bfc1_ref[...].astype(f32), 0.0)            # (1, 128)

    # ---- fc2 ----------------------------------------------------------------
    out = mm(h, wfc2_ref[...]) + bfc2_ref[...].astype(f32)          # (1, 6)
    out_ref[0] = out


# -------------------- wrapper-side structure matrices ----------------------

def _conv_band_matrices(w_oihw, w_in, dtype):
    """Stack of KH matrices M[dy] of shape (w_in*C, w_out*O) so that, for the
    lane-interleaved layout (rows=h, lanes=w*C+c),
        out[h, w*O+o] = sum_dy  x2d[h+dy, :] @ M[dy]
    equals the VALID cross-correlation with OIHW weight w_oihw."""
    o_ch, c_ch, kh, kw = w_oihw.shape
    w_out = w_in - kw + 1
    mats = []
    for dy in range(kh):
        m = jnp.zeros((w_in * c_ch, w_out * o_ch), jnp.float32)
        for dx in range(kw):
            shift = jnp.eye(w_in, w_out, k=-dx, dtype=jnp.float32)  # [w+dx, w]=1
            tap = w_oihw[:, :, dy, dx].astype(jnp.float32).T        # (C, O)
            m = m + jnp.kron(shift, tap)
        mats.append(m)
    return jnp.stack(mats).astype(dtype)


def _pool_row_select(h_out, dtype):
    """(2, h_out, 2*h_out) 0/1 matrices picking rows 2i+a (a = 0, 1)."""
    h = jnp.arange(2 * h_out)
    i = jnp.arange(h_out)
    return jnp.stack([
        (h[None, :] == (2 * i + a)[:, None]).astype(jnp.float32) for a in (0, 1)
    ]).astype(dtype)


def _pool_col_select(w_out, c, dtype):
    """(2, 2*w_out*c, w_out*c) 0/1 matrices picking lanes (2j+b)*c + ch."""
    w = jnp.arange(2 * w_out)
    j = jnp.arange(w_out)
    eye_c = jnp.eye(c, dtype=jnp.float32)
    return jnp.stack([
        jnp.kron((w[:, None] == (2 * j + b)[None, :]).astype(jnp.float32), eye_c)
        for b in (0, 1)
    ]).astype(dtype)


def _full_spec(arr):
    nd = arr.ndim
    return pl.BlockSpec(arr.shape, lambda i, _nd=nd: (0,) * _nd)


# ------------------------------ forward ------------------------------------

@jax.jit
def basic_net_forward(x_nchw, p):
    n = x_nchw.shape[0]
    f32 = jnp.float32
    dt = PARAM_DTYPE

    # Input in the lane-interleaved 2D layout: (N, H, W*C), lane = w*3 + c.
    x2d = jnp.transpose(x_nchw, (0, 2, 3, 1)).reshape(n, 58, 90).astype(f32)

    # Fold conv weights / pool gathers / torch-order flatten into small
    # matrices once (weight-sized only, no activation-sized intermediates).
    m1 = _conv_band_matrices(p["w1"], 30, dt)            # (3,  90, 168)
    m2 = _conv_band_matrices(p["w2"], 14, dt)            # (3,  84, 192)
    rs1 = _pool_row_select(28, dt)                       # (2,  28,  56)
    cs1 = _pool_col_select(14, 6, dt)                    # (2, 168,  84)
    rs2 = _pool_row_select(13, dt)                       # (2,  13,  26)
    cs2 = _pool_col_select(6, 16, dt)                    # (2, 192,  96)
    b1r = jnp.tile(p["b1"], 28)[None, :].astype(f32)     # (1, 168)
    b2r = jnp.tile(p["b2"], 12)[None, :].astype(f32)     # (1, 192)
    # fc1 rows permuted from torch NCHW-flatten order to (i, j*16+o) order.
    wfc1b = (p["wfc1"].reshape(16, 13, 6, 128)
             .transpose(1, 2, 0, 3).reshape(13, 96, 128).astype(dt))
    bfc1r = p["bfc1"][None, :].astype(f32)               # (1, 128)
    wfc2 = p["wfc2"].astype(dt)                          # (128, 6)
    bfc2r = p["bfc2"][None, :].astype(f32)               # (1, 6)

    weights = (m1, b1r, rs1, cs1, m2, b2r, rs2, cs2, wfc1b, bfc1r, wfc2, bfc2r)

    flops_img = 2 * (3 * 56 * 90 * 168 + 2 * 28 * 56 * 168 + 2 * 28 * 168 * 84
                     + 3 * 26 * 84 * 192 + 2 * 13 * 26 * 192 + 2 * 13 * 192 * 96
                     + 13 * 96 * 128 + 128 * 6)
    bytes_w = sum(int(np.prod(a.shape)) * a.dtype.itemsize for a in weights)
    cost = pl.CostEstimate(
        flops=n * flops_img,
        transcendentals=0,
        bytes_accessed=int(np.prod(x2d.shape)) * 4 + bytes_w + n * 6 * 4,
    )

    out = pl.pallas_call(
        _basic_net_kernel,
        grid=(n,),
        in_specs=[
            pl.BlockSpec((1, 58, 90), lambda i: (i, 0, 0)),
            _full_spec(m1), _full_spec(b1r), _full_spec(rs1), _full_spec(cs1),
            _full_spec(m2), _full_spec(b2r), _full_spec(rs2), _full_spec(cs2),
            _full_spec(wfc1b), _full_spec(bfc1r),
            _full_spec(wfc2), _full_spec(bfc2r),
        ],
        out_specs=pl.BlockSpec((1, 1, 6), lambda i: (i, 0, 0)),
        out_shape=jax.ShapeDtypeStruct((n, 1, 6), f32),
        scratch_shapes=[pltpu.VMEM((28, 84), f32),       # pooled1
                        pltpu.VMEM((13, 96), f32)],      # pooled2
        compiler_params=pltpu.CompilerParams(
            dimension_semantics=("parallel",)),
        cost_estimate=cost,
    )(x2d, *weights)
    return out.reshape(n, 6)


# -------------------------- pure-JAX reference -----------------------------

def reference_forward(x_nchw, p):
    dn = ("NCHW", "OIHW", "NCHW")
    y = lax.conv_general_dilated(x_nchw, p["w1"], (1, 1), "VALID",
                                 dimension_numbers=dn)
    y = jnp.maximum(y + p["b1"][None, :, None, None], 0.0)
    y = lax.reduce_window(y, -jnp.inf, lax.max, (1, 1, 2, 2), (1, 1, 2, 2), "VALID")
    y = lax.conv_general_dilated(y, p["w2"], (1, 1), "VALID",
                                 dimension_numbers=dn)
    y = jnp.maximum(y + p["b2"][None, :, None, None], 0.0)
    y = lax.reduce_window(y, -jnp.inf, lax.max, (1, 1, 2, 2), (1, 1, 2, 2), "VALID")
    flat = y.reshape(y.shape[0], -1)
    h = jnp.maximum(flat @ p["wfc1"] + p["bfc1"], 0.0)
    return h @ p["wfc2"] + p["bfc2"]


# ------------------------------- params ------------------------------------

def init_params(key):
    ks = jax.random.split(key, 8)

    def init(k, shape, fan_in):
        return jax.random.normal(k, shape, jnp.float32) / jnp.sqrt(float(fan_in))

    return {
        "w1": init(ks[0], (6, 3, 3, 3), 3 * 9),        # conv1: Conv2d(3, 6, 3)
        "b1": init(ks[1], (6,), 3 * 9),
        "w2": init(ks[2], (16, 6, 3, 3), 6 * 9),       # conv2: Conv2d(6, 16, 3)
        "b2": init(ks[3], (16,), 6 * 9),
        "wfc1": init(ks[4], (16 * 13 * 6, 128), 16 * 13 * 6),   # fc1
        "bfc1": init(ks[5], (128,), 16 * 13 * 6),
        "wfc2": init(ks[6], (128, 6), 128),            # fc2
        "bfc2": init(ks[7], (6,), 128),
    }


if __name__ == "__main__":
    key = jax.random.PRNGKey(0)
    pkey, xkey = jax.random.split(key)
    params = init_params(pkey)
    # Spatial size (58, 30) is what makes fc1's 16*13*6 flatten line up.
    x = jax.random.normal(xkey, (2, 3, 58, 30), jnp.float32)

    out = jax.block_until_ready(basic_net_forward(x, params))
    ref = jax.block_until_ready(reference_forward(x, params))

    assert out.shape == (2, 6), out.shape
    tol = 1e-3 if PARAM_DTYPE == jnp.float32 else 2e-2
    np.testing.assert_allclose(np.asarray(out), np.asarray(ref),
                               rtol=tol, atol=tol)
    print("KERNEL_OK")
</pallas_src>

<mosaic_0001>
module attributes {stable_mosaic.version = 11 : i64} {
  func.func @_basic_net_kernel(%arg0: i32, %arg1: memref<1x58x90xf32, #tpu.memory_space<vmem>>, %arg2: memref<3x90x168xf32, #tpu.memory_space<vmem>>, %arg3: memref<1x168xf32, #tpu.memory_space<vmem>>, %arg4: memref<2x28x56xf32, #tpu.memory_space<vmem>>, %arg5: memref<2x168x84xf32, #tpu.memory_space<vmem>>, %arg6: memref<3x84x192xf32, #tpu.memory_space<vmem>>, %arg7: memref<1x192xf32, #tpu.memory_space<vmem>>, %arg8: memref<2x13x26xf32, #tpu.memory_space<vmem>>, %arg9: memref<2x192x96xf32, #tpu.memory_space<vmem>>, %arg10: memref<13x96x128xf32, #tpu.memory_space<vmem>>, %arg11: memref<1x128xf32, #tpu.memory_space<vmem>>, %arg12: memref<128x6xf32, #tpu.memory_space<vmem>>, %arg13: memref<1x6xf32, #tpu.memory_space<vmem>>, %arg14: memref<1x1x6xf32, #tpu.memory_space<vmem>>, %arg15: memref<28x84xf32, #tpu.memory_space<vmem>>, %arg16: memref<13x96xf32, #tpu.memory_space<vmem>>) attributes {dimension_semantics = [#tpu.dimension_semantics<parallel>], iteration_bounds = array<i64: 2>, scalar_prefetch = 0 : i64, scratch_operands = 2 : i64, tpu.core_type = #tpu.core_type<tc>, window_params = [{transform_indices = @transform_0, window_bounds = array<i64: 1, 58, 90>}, {pipeline_mode = #tpu.pipeline_mode<synchronous>, transform_indices = @transform_1, window_bounds = array<i64: 3, 90, 168>}, {pipeline_mode = #tpu.pipeline_mode<synchronous>, transform_indices = @transform_2, window_bounds = array<i64: 1, 168>}, {pipeline_mode = #tpu.pipeline_mode<synchronous>, transform_indices = @transform_3, window_bounds = array<i64: 2, 28, 56>}, {pipeline_mode = #tpu.pipeline_mode<synchronous>, transform_indices = @transform_4, window_bounds = array<i64: 2, 168, 84>}, {pipeline_mode = #tpu.pipeline_mode<synchronous>, transform_indices = @transform_5, window_bounds = array<i64: 3, 84, 192>}, {pipeline_mode = #tpu.pipeline_mode<synchronous>, transform_indices = @transform_6, window_bounds = array<i64: 1, 192>}, {pipeline_mode = #tpu.pipeline_mode<synchronous>, transform_indices = @transform_7, window_bounds = array<i64: 2, 13, 26>}, {pipeline_mode = #tpu.pipeline_mode<synchronous>, transform_indices = @transform_8, window_bounds = array<i64: 2, 192, 96>}, {pipeline_mode = #tpu.pipeline_mode<synchronous>, transform_indices = @transform_9, window_bounds = array<i64: 13, 96, 128>}, {pipeline_mode = #tpu.pipeline_mode<synchronous>, transform_indices = @transform_10, window_bounds = array<i64: 1, 128>}, {pipeline_mode = #tpu.pipeline_mode<synchronous>, transform_indices = @transform_11, window_bounds = array<i64: 128, 6>}, {pipeline_mode = #tpu.pipeline_mode<synchronous>, transform_indices = @transform_12, window_bounds = array<i64: 1, 6>}, {transform_indices = @transform_13, window_bounds = array<i64: 1, 1, 6>}]} {
    %c0 = arith.constant 0 : index
    %c0_0 = arith.constant 0 : index
    %c0_1 = arith.constant 0 : index
    %0 = vector.load %arg1[%c0, %c0_0, %c0_1] : memref<1x58x90xf32, #tpu.memory_space<vmem>>, vector<1x56x90xf32>
    %1 = vector.shape_cast %0 : vector<1x56x90xf32> to vector<56x90xf32>
    %c0_2 = arith.constant 0 : index
    %c0_3 = arith.constant 0 : index
    %c0_4 = arith.constant 0 : index
    %2 = vector.load %arg2[%c0_2, %c0_3, %c0_4] : memref<3x90x168xf32, #tpu.memory_space<vmem>>, vector<1x90x168xf32>
    %3 = vector.shape_cast %2 : vector<1x90x168xf32> to vector<90x168xf32>
    %cst = arith.constant dense<0.000000e+00> : vector<56x168xf32>
    %4 = tpu.matmul %1, %3, %cst {dimension_numbers = #tpu.dot_dimension_numbers<[1], [0], [0], [1], [0, 0, 1, 1], [], []>} : vector<56x90xf32>, vector<90x168xf32>, vector<56x168xf32> -> vector<56x168xf32>
    %c0_5 = arith.constant 0 : index
    %c1 = arith.constant 1 : index
    %c0_6 = arith.constant 0 : index
    %5 = vector.load %arg1[%c0_5, %c1, %c0_6] : memref<1x58x90xf32, #tpu.memory_space<vmem>>, vector<1x56x90xf32>
    %6 = vector.shape_cast %5 : vector<1x56x90xf32> to vector<56x90xf32>
    %c1_7 = arith.constant 1 : index
    %c0_8 = arith.constant 0 : index
    %c0_9 = arith.constant 0 : index
    %7 = vector.load %arg2[%c1_7, %c0_8, %c0_9] : memref<3x90x168xf32, #tpu.memory_space<vmem>>, vector<1x90x168xf32>
    %8 = vector.shape_cast %7 : vector<1x90x168xf32> to vector<90x168xf32>
    %cst_10 = arith.constant dense<0.000000e+00> : vector<56x168xf32>
    %9 = tpu.matmul %6, %8, %cst_10 {dimension_numbers = #tpu.dot_dimension_numbers<[1], [0], [0], [1], [0, 0, 1, 1], [], []>} : vector<56x90xf32>, vector<90x168xf32>, vector<56x168xf32> -> vector<56x168xf32>
    %10 = arith.addf %4, %9 : vector<56x168xf32>
    %c0_11 = arith.constant 0 : index
    %c2 = arith.constant 2 : index
    %c0_12 = arith.constant 0 : index
    %11 = vector.load %arg1[%c0_11, %c2, %c0_12] : memref<1x58x90xf32, #tpu.memory_space<vmem>>, vector<1x56x90xf32>
    %12 = vector.shape_cast %11 : vector<1x56x90xf32> to vector<56x90xf32>
    %c2_13 = arith.constant 2 : index
    %c0_14 = arith.constant 0 : index
    %c0_15 = arith.constant 0 : index
    %13 = vector.load %arg2[%c2_13, %c0_14, %c0_15] : memref<3x90x168xf32, #tpu.memory_space<vmem>>, vector<1x90x168xf32>
    %14 = vector.shape_cast %13 : vector<1x90x168xf32> to vector<90x168xf32>
    %cst_16 = arith.constant dense<0.000000e+00> : vector<56x168xf32>
    %15 = tpu.matmul %12, %14, %cst_16 {dimension_numbers = #tpu.dot_dimension_numbers<[1], [0], [0], [1], [0, 0, 1, 1], [], []>} : vector<56x90xf32>, vector<90x168xf32>, vector<56x168xf32> -> vector<56x168xf32>
    %16 = arith.addf %10, %15 : vector<56x168xf32>
    %c0_17 = arith.constant 0 : index
    %c0_18 = arith.constant 0 : index
    %17 = vector.load %arg3[%c0_17, %c0_18] : memref<1x168xf32, #tpu.memory_space<vmem>>, vector<1x168xf32>
    %18 = vector.broadcast %17 : vector<1x168xf32> to vector<56x168xf32>
    %19 = arith.addf %16, %18 : vector<56x168xf32>
    %cst_19 = arith.constant 0.000000e+00 : f32
    %20 = vector.broadcast %cst_19 : f32 to vector<56x168xf32>
    %21 = arith.maximumf %19, %20 : vector<56x168xf32>
    %c0_20 = arith.constant 0 : index
    %c0_21 = arith.constant 0 : index
    %c0_22 = arith.constant 0 : index
    %22 = vector.load %arg4[%c0_20, %c0_21, %c0_22] : memref<2x28x56xf32, #tpu.memory_space<vmem>>, vector<1x28x56xf32>
    %23 = vector.shape_cast %22 : vector<1x28x56xf32> to vector<28x56xf32>
    %cst_23 = arith.constant dense<0.000000e+00> : vector<28x168xf32>
    %24 = tpu.matmul %23, %21, %cst_23 {dimension_numbers = #tpu.dot_dimension_numbers<[1], [0], [0], [1], [0, 0, 1, 1], [], []>} : vector<28x56xf32>, vector<56x168xf32>, vector<28x168xf32> -> vector<28x168xf32>
    %c1_24 = arith.constant 1 : index
    %c0_25 = arith.constant 0 : index
    %c0_26 = arith.constant 0 : index
    %25 = vector.load %arg4[%c1_24, %c0_25, %c0_26] : memref<2x28x56xf32, #tpu.memory_space<vmem>>, vector<1x28x56xf32>
    %26 = vector.shape_cast %25 : vector<1x28x56xf32> to vector<28x56xf32>
    %cst_27 = arith.constant dense<0.000000e+00> : vector<28x168xf32>
    %27 = tpu.matmul %26, %21, %cst_27 {dimension_numbers = #tpu.dot_dimension_numbers<[1], [0], [0], [1], [0, 0, 1, 1], [], []>} : vector<28x56xf32>, vector<56x168xf32>, vector<28x168xf32> -> vector<28x168xf32>
    %28 = arith.maximumf %24, %27 : vector<28x168xf32>
    %c0_28 = arith.constant 0 : index
    %c0_29 = arith.constant 0 : index
    %c0_30 = arith.constant 0 : index
    %29 = vector.load %arg5[%c0_28, %c0_29, %c0_30] : memref<2x168x84xf32, #tpu.memory_space<vmem>>, vector<1x168x84xf32>
    %30 = vector.shape_cast %29 : vector<1x168x84xf32> to vector<168x84xf32>
    %cst_31 = arith.constant dense<0.000000e+00> : vector<28x84xf32>
    %31 = tpu.matmul %28, %30, %cst_31 {dimension_numbers = #tpu.dot_dimension_numbers<[1], [0], [0], [1], [0, 0, 1, 1], [], []>} : vector<28x168xf32>, vector<168x84xf32>, vector<28x84xf32> -> vector<28x84xf32>
    %c1_32 = arith.constant 1 : index
    %c0_33 = arith.constant 0 : index
    %c0_34 = arith.constant 0 : index
    %32 = vector.load %arg5[%c1_32, %c0_33, %c0_34] : memref<2x168x84xf32, #tpu.memory_space<vmem>>, vector<1x168x84xf32>
    %33 = vector.shape_cast %32 : vector<1x168x84xf32> to vector<168x84xf32>
    %cst_35 = arith.constant dense<0.000000e+00> : vector<28x84xf32>
    %34 = tpu.matmul %28, %33, %cst_35 {dimension_numbers = #tpu.dot_dimension_numbers<[1], [0], [0], [1], [0, 0, 1, 1], [], []>} : vector<28x168xf32>, vector<168x84xf32>, vector<28x84xf32> -> vector<28x84xf32>
    %35 = arith.maximumf %31, %34 : vector<28x84xf32>
    %c0_36 = arith.constant 0 : index
    %c0_37 = arith.constant 0 : index
    %36 = vector.load %arg15[%c0_36, %c0_37] : memref<28x84xf32, #tpu.memory_space<vmem>>, vector<28x84xf32>
    tpu.vector_store %arg15[%c0_36, %c0_37], %35 {strides = array<i32>} : memref<28x84xf32, #tpu.memory_space<vmem>>, vector<28x84xf32>,
    %c0_38 = arith.constant 0 : index
    %c0_39 = arith.constant 0 : index
    %37 = vector.load %arg15[%c0_38, %c0_39] : memref<28x84xf32, #tpu.memory_space<vmem>>, vector<26x84xf32>
    %c0_40 = arith.constant 0 : index
    %c0_41 = arith.constant 0 : index
    %c0_42 = arith.constant 0 : index
    %38 = vector.load %arg6[%c0_40, %c0_41, %c0_42] : memref<3x84x192xf32, #tpu.memory_space<vmem>>, vector<1x84x192xf32>
    %39 = vector.shape_cast %38 : vector<1x84x192xf32> to vector<84x192xf32>
    %cst_43 = arith.constant dense<0.000000e+00> : vector<26x192xf32>
    %40 = tpu.matmul %37, %39, %cst_43 {dimension_numbers = #tpu.dot_dimension_numbers<[1], [0], [0], [1], [0, 0, 1, 1], [], []>} : vector<26x84xf32>, vector<84x192xf32>, vector<26x192xf32> -> vector<26x192xf32>
    %c1_44 = arith.constant 1 : index
    %c0_45 = arith.constant 0 : index
    %41 = vector.load %arg15[%c1_44, %c0_45] : memref<28x84xf32, #tpu.memory_space<vmem>>, vector<26x84xf32>
    %c1_46 = arith.constant 1 : index
    %c0_47 = arith.constant 0 : index
    %c0_48 = arith.constant 0 : index
    %42 = vector.load %arg6[%c1_46, %c0_47, %c0_48] : memref<3x84x192xf32, #tpu.memory_space<vmem>>, vector<1x84x192xf32>
    %43 = vector.shape_cast %42 : vector<1x84x192xf32> to vector<84x192xf32>
    %cst_49 = arith.constant dense<0.000000e+00> : vector<26x192xf32>
    %44 = tpu.matmul %41, %43, %cst_49 {dimension_numbers = #tpu.dot_dimension_numbers<[1], [0], [0], [1], [0, 0, 1, 1], [], []>} : vector<26x84xf32>, vector<84x192xf32>, vector<26x192xf32> -> vector<26x192xf32>
    %45 = arith.addf %40, %44 : vector<26x192xf32>
    %c2_50 = arith.constant 2 : index
    %c0_51 = arith.constant 0 : index
    %46 = vector.load %arg15[%c2_50, %c0_51] : memref<28x84xf32, #tpu.memory_space<vmem>>, vector<26x84xf32>
    %c2_52 = arith.constant 2 : index
    %c0_53 = arith.constant 0 : index
    %c0_54 = arith.constant 0 : index
    %47 = vector.load %arg6[%c2_52, %c0_53, %c0_54] : memref<3x84x192xf32, #tpu.memory_space<vmem>>, vector<1x84x192xf32>
    %48 = vector.shape_cast %47 : vector<1x84x192xf32> to vector<84x192xf32>
    %cst_55 = arith.constant dense<0.000000e+00> : vector<26x192xf32>
    %49 = tpu.matmul %46, %48, %cst_55 {dimension_numbers = #tpu.dot_dimension_numbers<[1], [0], [0], [1], [0, 0, 1, 1], [], []>} : vector<26x84xf32>, vector<84x192xf32>, vector<26x192xf32> -> vector<26x192xf32>
    %50 = arith.addf %45, %49 : vector<26x192xf32>
    %c0_56 = arith.constant 0 : index
    %c0_57 = arith.constant 0 : index
    %51 = vector.load %arg7[%c0_56, %c0_57] : memref<1x192xf32, #tpu.memory_space<vmem>>, vector<1x192xf32>
    %52 = vector.broadcast %51 : vector<1x192xf32> to vector<26x192xf32>
    %53 = arith.addf %50, %52 : vector<26x192xf32>
    %cst_58 = arith.constant 0.000000e+00 : f32
    %54 = vector.broadcast %cst_58 : f32 to vector<26x192xf32>
    %55 = arith.maximumf %53, %54 : vector<26x192xf32>
    %c0_59 = arith.constant 0 : index
    %c0_60 = arith.constant 0 : index
    %c0_61 = arith.constant 0 : index
    %56 = vector.load %arg8[%c0_59, %c0_60, %c0_61] : memref<2x13x26xf32, #tpu.memory_space<vmem>>, vector<1x13x26xf32>
    %57 = vector.shape_cast %56 : vector<1x13x26xf32> to vector<13x26xf32>
    %cst_62 = arith.constant dense<0.000000e+00> : vector<13x192xf32>
    %58 = tpu.matmul %57, %55, %cst_62 {dimension_numbers = #tpu.dot_dimension_numbers<[1], [0], [0], [1], [0, 0, 1, 1], [], []>} : vector<13x26xf32>, vector<26x192xf32>, vector<13x192xf32> -> vector<13x192xf32>
    %c1_63 = arith.constant 1 : index
    %c0_64 = arith.constant 0 : index
    %c0_65 = arith.constant 0 : index
    %59 = vector.load %arg8[%c1_63, %c0_64, %c0_65] : memref<2x13x26xf32, #tpu.memory_space<vmem>>, vector<1x13x26xf32>
    %60 = vector.shape_cast %59 : vector<1x13x26xf32> to vector<13x26xf32>
    %cst_66 = arith.constant dense<0.000000e+00> : vector<13x192xf32>
    %61 = tpu.matmul %60, %55, %cst_66 {dimension_numbers = #tpu.dot_dimension_numbers<[1], [0], [0], [1], [0, 0, 1, 1], [], []>} : vector<13x26xf32>, vector<26x192xf32>, vector<13x192xf32> -> vector<13x192xf32>
    %62 = arith.maximumf %58, %61 : vector<13x192xf32>
    %c0_67 = arith.constant 0 : index
    %c0_68 = arith.constant 0 : index
    %c0_69 = arith.constant 0 : index
    %63 = vector.load %arg9[%c0_67, %c0_68, %c0_69] : memref<2x192x96xf32, #tpu.memory_space<vmem>>, vector<1x192x96xf32>
    %64 = vector.shape_cast %63 : vector<1x192x96xf32> to vector<192x96xf32>
    %cst_70 = arith.constant dense<0.000000e+00> : vector<13x96xf32>
    %65 = tpu.matmul %62, %64, %cst_70 {dimension_numbers = #tpu.dot_dimension_numbers<[1], [0], [0], [1], [0, 0, 1, 1], [], []>} : vector<13x192xf32>, vector<192x96xf32>, vector<13x96xf32> -> vector<13x96xf32>
    %c1_71 = arith.constant 1 : index
    %c0_72 = arith.constant 0 : index
    %c0_73 = arith.constant 0 : index
    %66 = vector.load %arg9[%c1_71, %c0_72, %c0_73] : memref<2x192x96xf32, #tpu.memory_space<vmem>>, vector<1x192x96xf32>
    %67 = vector.shape_cast %66 : vector<1x192x96xf32> to vector<192x96xf32>
    %cst_74 = arith.constant dense<0.000000e+00> : vector<13x96xf32>
    %68 = tpu.matmul %62, %67, %cst_74 {dimension_numbers = #tpu.dot_dimension_numbers<[1], [0], [0], [1], [0, 0, 1, 1], [], []>} : vector<13x192xf32>, vector<192x96xf32>, vector<13x96xf32> -> vector<13x96xf32>
    %69 = arith.maximumf %65, %68 : vector<13x96xf32>
    %c0_75 = arith.constant 0 : index
    %c0_76 = arith.constant 0 : index
    %70 = vector.load %arg16[%c0_75, %c0_76] : memref<13x96xf32, #tpu.memory_space<vmem>>, vector<13x96xf32>
    tpu.vector_store %arg16[%c0_75, %c0_76], %69 {strides = array<i32>} : memref<13x96xf32, #tpu.memory_space<vmem>>, vector<13x96xf32>,
    %c0_77 = arith.constant 0 : index
    %c0_78 = arith.constant 0 : index
    %71 = vector.load %arg16[%c0_77, %c0_78] : memref<13x96xf32, #tpu.memory_space<vmem>>, vector<1x96xf32>
    %c0_79 = arith.constant 0 : index
    %c0_80 = arith.constant 0 : index
    %c0_81 = arith.constant 0 : index
    %72 = vector.load %arg10[%c0_79, %c0_80, %c0_81] : memref<13x96x128xf32, #tpu.memory_space<vmem>>, vector<1x96x128xf32>
    %73 = vector.shape_cast %72 : vector<1x96x128xf32> to vector<96x128xf32>
    %cst_82 = arith.constant dense<0.000000e+00> : vector<1x128xf32>
    %74 = tpu.matmul %71, %73, %cst_82 {dimension_numbers = #tpu.dot_dimension_numbers<[1], [0], [0], [1], [0, 0, 1, 1], [], []>} : vector<1x96xf32>, vector<96x128xf32>, vector<1x128xf32> -> vector<1x128xf32>
    %c1_83 = arith.constant 1 : index
    %c0_84 = arith.constant 0 : index
    %75 = vector.load %arg16[%c1_83, %c0_84] : memref<13x96xf32, #tpu.memory_space<vmem>>, vector<1x96xf32>
    %c1_85 = arith.constant 1 : index
    %c0_86 = arith.constant 0 : index
    %c0_87 = arith.constant 0 : index
    %76 = vector.load %arg10[%c1_85, %c0_86, %c0_87] : memref<13x96x128xf32, #tpu.memory_space<vmem>>, vector<1x96x128xf32>
    %77 = vector.shape_cast %76 : vector<1x96x128xf32> to vector<96x128xf32>
    %cst_88 = arith.constant dense<0.000000e+00> : vector<1x128xf32>
    %78 = tpu.matmul %75, %77, %cst_88 {dimension_numbers = #tpu.dot_dimension_numbers<[1], [0], [0], [1], [0, 0, 1, 1], [], []>} : vector<1x96xf32>, vector<96x128xf32>, vector<1x128xf32> -> vector<1x128xf32>
    %79 = arith.addf %74, %78 : vector<1x128xf32>
    %c2_89 = arith.constant 2 : index
    %c0_90 = arith.constant 0 : index
    %80 = vector.load %arg16[%c2_89, %c0_90] : memref<13x96xf32, #tpu.memory_space<vmem>>, vector<1x96xf32>
    %c2_91 = arith.constant 2 : index
    %c0_92 = arith.constant 0 : index
    %c0_93 = arith.constant 0 : index
    %81 = vector.load %arg10[%c2_91, %c0_92, %c0_93] : memref<13x96x128xf32, #tpu.memory_space<vmem>>, vector<1x96x128xf32>
    %82 = vector.shape_cast %81 : vector<1x96x128xf32> to vector<96x128xf32>
    %cst_94 = arith.constant dense<0.000000e+00> : vector<1x128xf32>
    %83 = tpu.matmul %80, %82, %cst_94 {dimension_numbers = #tpu.dot_dimension_numbers<[1], [0], [0], [1], [0, 0, 1, 1], [], []>} : vector<1x96xf32>, vector<96x128xf32>, vector<1x128xf32> -> vector<1x128xf32>
    %84 = arith.addf %79, %83 : vector<1x128xf32>
    %c3 = arith.constant 3 : index
    %c0_95 = arith.constant 0 : index
    %85 = vector.load %arg16[%c3, %c0_95] : memref<13x96xf32, #tpu.memory_space<vmem>>, vector<1x96xf32>
    %c3_96 = arith.constant 3 : index
    %c0_97 = arith.constant 0 : index
    %c0_98 = arith.constant 0 : index
    %86 = vector.load %arg10[%c3_96, %c0_97, %c0_98] : memref<13x96x128xf32, #tpu.memory_space<vmem>>, vector<1x96x128xf32>
    %87 = vector.shape_cast %86 : vector<1x96x128xf32> to vector<96x128xf32>
    %cst_99 = arith.constant dense<0.000000e+00> : vector<1x128xf32>
    %88 = tpu.matmul %85, %87, %cst_99 {dimension_numbers = #tpu.dot_dimension_numbers<[1], [0], [0], [1], [0, 0, 1, 1], [], []>} : vector<1x96xf32>, vector<96x128xf32>, vector<1x128xf32> -> vector<1x128xf32>
    %89 = arith.addf %84, %88 : vector<1x128xf32>
    %c4 = arith.constant 4 : index
    %c0_100 = arith.constant 0 : index
    %90 = vector.load %arg16[%c4, %c0_100] : memref<13x96xf32, #tpu.memory_space<vmem>>, vector<1x96xf32>
    %c4_101 = arith.constant 4 : index
    %c0_102 = arith.constant 0 : index
    %c0_103 = arith.constant 0 : index
    %91 = vector.load %arg10[%c4_101, %c0_102, %c0_103] : memref<13x96x128xf32, #tpu.memory_space<vmem>>, vector<1x96x128xf32>
    %92 = vector.shape_cast %91 : vector<1x96x128xf32> to vector<96x128xf32>
    %cst_104 = arith.constant dense<0.000000e+00> : vector<1x128xf32>
    %93 = tpu.matmul %90, %92, %cst_104 {dimension_numbers = #tpu.dot_dimension_numbers<[1], [0], [0], [1], [0, 0, 1, 1], [], []>} : vector<1x96xf32>, vector<96x128xf32>, vector<1x128xf32> -> vector<1x128xf32>
    %94 = arith.addf %89, %93 : vector<1x128xf32>
    %c5 = arith.constant 5 : index
    %c0_105 = arith.constant 0 : index
    %95 = vector.load %arg16[%c5, %c0_105] : memref<13x96xf32, #tpu.memory_space<vmem>>, vector<1x96xf32>
    %c5_106 = arith.constant 5 : index
    %c0_107 = arith.constant 0 : index
    %c0_108 = arith.constant 0 : index
    %96 = vector.load %arg10[%c5_106, %c0_107, %c0_108] : memref<13x96x128xf32, #tpu.memory_space<vmem>>, vector<1x96x128xf32>
    %97 = vector.shape_cast %96 : vector<1x96x128xf32> to vector<96x128xf32>
    %cst_109 = arith.constant dense<0.000000e+00> : vector<1x128xf32>
    %98 = tpu.matmul %95, %97, %cst_109 {dimension_numbers = #tpu.dot_dimension_numbers<[1], [0], [0], [1], [0, 0, 1, 1], [], []>} : vector<1x96xf32>, vector<96x128xf32>, vector<1x128xf32> -> vector<1x128xf32>
    %99 = arith.addf %94, %98 : vector<1x128xf32>
    %c6 = arith.constant 6 : index
    %c0_110 = arith.constant 0 : index
    %100 = vector.load %arg16[%c6, %c0_110] : memref<13x96xf32, #tpu.memory_space<vmem>>, vector<1x96xf32>
    %c6_111 = arith.constant 6 : index
    %c0_112 = arith.constant 0 : index
    %c0_113 = arith.constant 0 : index
    %101 = vector.load %arg10[%c6_111, %c0_112, %c0_113] : memref<13x96x128xf32, #tpu.memory_space<vmem>>, vector<1x96x128xf32>
    %102 = vector.shape_cast %101 : vector<1x96x128xf32> to vector<96x128xf32>
    %cst_114 = arith.constant dense<0.000000e+00> : vector<1x128xf32>
    %103 = tpu.matmul %100, %102, %cst_114 {dimension_numbers = #tpu.dot_dimension_numbers<[1], [0], [0], [1], [0, 0, 1, 1], [], []>} : vector<1x96xf32>, vector<96x128xf32>, vector<1x128xf32> -> vector<1x128xf32>
    %104 = arith.addf %99, %103 : vector<1x128xf32>
    %c7 = arith.constant 7 : index
    %c0_115 = arith.constant 0 : index
    %105 = vector.load %arg16[%c7, %c0_115] : memref<13x96xf32, #tpu.memory_space<vmem>>, vector<1x96xf32>
    %c7_116 = arith.constant 7 : index
    %c0_117 = arith.constant 0 : index
    %c0_118 = arith.constant 0 : index
    %106 = vector.load %arg10[%c7_116, %c0_117, %c0_118] : memref<13x96x128xf32, #tpu.memory_space<vmem>>, vector<1x96x128xf32>
    %107 = vector.shape_cast %106 : vector<1x96x128xf32> to vector<96x128xf32>
    %cst_119 = arith.constant dense<0.000000e+00> : vector<1x128xf32>
    %108 = tpu.matmul %105, %107, %cst_119 {dimension_numbers = #tpu.dot_dimension_numbers<[1], [0], [0], [1], [0, 0, 1, 1], [], []>} : vector<1x96xf32>, vector<96x128xf32>, vector<1x128xf32> -> vector<1x128xf32>
    %109 = arith.addf %104, %108 : vector<1x128xf32>
    %c8 = arith.constant 8 : index
    %c0_120 = arith.constant 0 : index
    %110 = vector.load %arg16[%c8, %c0_120] : memref<13x96xf32, #tpu.memory_space<vmem>>, vector<1x96xf32>
    %c8_121 = arith.constant 8 : index
    %c0_122 = arith.constant 0 : index
    %c0_123 = arith.constant 0 : index
    %111 = vector.load %arg10[%c8_121, %c0_122, %c0_123] : memref<13x96x128xf32, #tpu.memory_space<vmem>>, vector<1x96x128xf32>
    %112 = vector.shape_cast %111 : vector<1x96x128xf32> to vector<96x128xf32>
    %cst_124 = arith.constant dense<0.000000e+00> : vector<1x128xf32>
    %113 = tpu.matmul %110, %112, %cst_124 {dimension_numbers = #tpu.dot_dimension_numbers<[1], [0], [0], [1], [0, 0, 1, 1], [], []>} : vector<1x96xf32>, vector<96x128xf32>, vector<1x128xf32> -> vector<1x128xf32>
    %114 = arith.addf %109, %113 : vector<1x128xf32>
    %c9 = arith.constant 9 : index
    %c0_125 = arith.constant 0 : index
    %115 = vector.load %arg16[%c9, %c0_125] : memref<13x96xf32, #tpu.memory_space<vmem>>, vector<1x96xf32>
    %c9_126 = arith.constant 9 : index
    %c0_127 = arith.constant 0 : index
    %c0_128 = arith.constant 0 : index
    %116 = vector.load %arg10[%c9_126, %c0_127, %c0_128] : memref<13x96x128xf32, #tpu.memory_space<vmem>>, vector<1x96x128xf32>
    %117 = vector.shape_cast %116 : vector<1x96x128xf32> to vector<96x128xf32>
    %cst_129 = arith.constant dense<0.000000e+00> : vector<1x128xf32>
    %118 = tpu.matmul %115, %117, %cst_129 {dimension_numbers = #tpu.dot_dimension_numbers<[1], [0], [0], [1], [0, 0, 1, 1], [], []>} : vector<1x96xf32>, vector<96x128xf32>, vector<1x128xf32> -> vector<1x128xf32>
    %119 = arith.addf %114, %118 : vector<1x128xf32>
    %c10 = arith.constant 10 : index
    %c0_130 = arith.constant 0 : index
    %120 = vector.load %arg16[%c10, %c0_130] : memref<13x96xf32, #tpu.memory_space<vmem>>, vector<1x96xf32>
    %c10_131 = arith.constant 10 : index
    %c0_132 = arith.constant 0 : index
    %c0_133 = arith.constant 0 : index
    %121 = vector.load %arg10[%c10_131, %c0_132, %c0_133] : memref<13x96x128xf32, #tpu.memory_space<vmem>>, vector<1x96x128xf32>
    %122 = vector.shape_cast %121 : vector<1x96x128xf32> to vector<96x128xf32>
    %cst_134 = arith.constant dense<0.000000e+00> : vector<1x128xf32>
    %123 = tpu.matmul %120, %122, %cst_134 {dimension_numbers = #tpu.dot_dimension_numbers<[1], [0], [0], [1], [0, 0, 1, 1], [], []>} : vector<1x96xf32>, vector<96x128xf32>, vector<1x128xf32> -> vector<1x128xf32>
    %124 = arith.addf %119, %123 : vector<1x128xf32>
    %c11 = arith.constant 11 : index
    %c0_135 = arith.constant 0 : index
    %125 = vector.load %arg16[%c11, %c0_135] : memref<13x96xf32, #tpu.memory_space<vmem>>, vector<1x96xf32>
    %c11_136 = arith.constant 11 : index
    %c0_137 = arith.constant 0 : index
    %c0_138 = arith.constant 0 : index
    %126 = vector.load %arg10[%c11_136, %c0_137, %c0_138] : memref<13x96x128xf32, #tpu.memory_space<vmem>>, vector<1x96x128xf32>
    %127 = vector.shape_cast %126 : vector<1x96x128xf32> to vector<96x128xf32>
    %cst_139 = arith.constant dense<0.000000e+00> : vector<1x128xf32>
    %128 = tpu.matmul %125, %127, %cst_139 {dimension_numbers = #tpu.dot_dimension_numbers<[1], [0], [0], [1], [0, 0, 1, 1], [], []>} : vector<1x96xf32>, vector<96x128xf32>, vector<1x128xf32> -> vector<1x128xf32>
    %129 = arith.addf %124, %128 : vector<1x128xf32>
    %c12 = arith.constant 12 : index
    %c0_140 = arith.constant 0 : index
    %130 = vector.load %arg16[%c12, %c0_140] : memref<13x96xf32, #tpu.memory_space<vmem>>, vector<1x96xf32>
    %c12_141 = arith.constant 12 : index
    %c0_142 = arith.constant 0 : index
    %c0_143 = arith.constant 0 : index
    %131 = vector.load %arg10[%c12_141, %c0_142, %c0_143] : memref<13x96x128xf32, #tpu.memory_space<vmem>>, vector<1x96x128xf32>
    %132 = vector.shape_cast %131 : vector<1x96x128xf32> to vector<96x128xf32>
    %cst_144 = arith.constant dense<0.000000e+00> : vector<1x128xf32>
    %133 = tpu.matmul %130, %132, %cst_144 {dimension_numbers = #tpu.dot_dimension_numbers<[1], [0], [0], [1], [0, 0, 1, 1], [], []>} : vector<1x96xf32>, vector<96x128xf32>, vector<1x128xf32> -> vector<1x128xf32>
    %134 = arith.addf %129, %133 : vector<1x128xf32>
    %c0_145 = arith.constant 0 : index
    %c0_146 = arith.constant 0 : index
    %135 = vector.load %arg11[%c0_145, %c0_146] : memref<1x128xf32, #tpu.memory_space<vmem>>, vector<1x128xf32>
    %136 = arith.addf %134, %135 : vector<1x128xf32>
    %cst_147 = arith.constant 0.000000e+00 : f32
    %137 = vector.broadcast %cst_147 : f32 to vector<1x128xf32>
    %138 = arith.maximumf %136, %137 : vector<1x128xf32>
    %c0_148 = arith.constant 0 : index
    %c0_149 = arith.constant 0 : index
    %139 = vector.load %arg12[%c0_148, %c0_149] : memref<128x6xf32, #tpu.memory_space<vmem>>, vector<128x6xf32>
    %cst_150 = arith.constant dense<0.000000e+00> : vector<1x6xf32>
    %140 = tpu.matmul %138, %139, %cst_150 {dimension_numbers = #tpu.dot_dimension_numbers<[1], [0], [0], [1], [0, 0, 1, 1], [], []>} : vector<1x128xf32>, vector<128x6xf32>, vector<1x6xf32> -> vector<1x6xf32>
    %c0_151 = arith.constant 0 : index
    %c0_152 = arith.constant 0 : index
    %141 = vector.load %arg13[%c0_151, %c0_152] : memref<1x6xf32, #tpu.memory_space<vmem>>, vector<1x6xf32>
    %142 = arith.addf %140, %141 : vector<1x6xf32>
    %c0_153 = arith.constant 0 : index
    %c0_154 = arith.constant 0 : index
    %c0_155 = arith.constant 0 : index
    %143 = vector.load %arg14[%c0_153, %c0_154, %c0_155] : memref<1x1x6xf32, #tpu.memory_space<vmem>>, vector<1x1x6xf32>
    %144 = vector.shape_cast %143 : vector<1x1x6xf32> to vector<1x6xf32>
    %145 = vector.shape_cast %142 : vector<1x6xf32> to vector<1x1x6xf32>
    tpu.vector_store %arg14[%c0_153, %c0_154, %c0_155], %145 {strides = array<i32>} : memref<1x1x6xf32, #tpu.memory_space<vmem>>, vector<1x1x6xf32>,
    return
  }
  func.func @transform_0(%arg0: i32) -> (i32, i32, i32) {
    %c0_i32 = arith.constant 0 : i32
    %c0_i32_0 = arith.constant 0 : i32
    %c0_i32_1 = arith.constant 0 : i32
    return %arg0, %c0_i32, %c0_i32_0 : i32, i32, i32
  }
  func.func @transform_1(%arg0: i32) -> (i32, i32, i32) {
    %c0_i32 = arith.constant 0 : i32
    %c0_i32_0 = arith.constant 0 : i32
    %c0_i32_1 = arith.constant 0 : i32
    %c0_i32_2 = arith.constant 0 : i32
    return %c0_i32, %c0_i32_0, %c0_i32_1 : i32, i32, i32
  }
  func.func @transform_2(%arg0: i32) -> (i32, i32) {
    %c0_i32 = arith.constant 0 : i32
    %c0_i32_0 = arith.constant 0 : i32
    %c0_i32_1 = arith.constant 0 : i32
    return %c0_i32, %c0_i32_0 : i32, i32
  }
  func.func @transform_3(%arg0: i32) -> (i32, i32, i32) {
    %c0_i32 = arith.constant 0 : i32
    %c0_i32_0 = arith.constant 0 : i32
    %c0_i32_1 = arith.constant 0 : i32
    %c0_i32_2 = arith.constant 0 : i32
    return %c0_i32, %c0_i32_0, %c0_i32_1 : i32, i32, i32
  }
  func.func @transform_4(%arg0: i32) -> (i32, i32, i32) {
    %c0_i32 = arith.constant 0 : i32
    %c0_i32_0 = arith.constant 0 : i32
    %c0_i32_1 = arith.constant 0 : i32
    %c0_i32_2 = arith.constant 0 : i32
    return %c0_i32, %c0_i32_0, %c0_i32_1 : i32, i32, i32
  }
  func.func @transform_5(%arg0: i32) -> (i32, i32, i32) {
    %c0_i32 = arith.constant 0 : i32
    %c0_i32_0 = arith.constant 0 : i32
    %c0_i32_1 = arith.constant 0 : i32
    %c0_i32_2 = arith.constant 0 : i32
    return %c0_i32, %c0_i32_0, %c0_i32_1 : i32, i32, i32
  }
  func.func @transform_6(%arg0: i32) -> (i32, i32) {
    %c0_i32 = arith.constant 0 : i32
    %c0_i32_0 = arith.constant 0 : i32
    %c0_i32_1 = arith.constant 0 : i32
    return %c0_i32, %c0_i32_0 : i32, i32
  }
  func.func @transform_7(%arg0: i32) -> (i32, i32, i32) {
    %c0_i32 = arith.constant 0 : i32
    %c0_i32_0 = arith.constant 0 : i32
    %c0_i32_1 = arith.constant 0 : i32
    %c0_i32_2 = arith.constant 0 : i32
    return %c0_i32, %c0_i32_0, %c0_i32_1 : i32, i32, i32
  }
  func.func @transform_8(%arg0: i32) -> (i32, i32, i32) {
    %c0_i32 = arith.constant 0 : i32
    %c0_i32_0 = arith.constant 0 : i32
    %c0_i32_1 = arith.constant 0 : i32
    %c0_i32_2 = arith.constant 0 : i32
    return %c0_i32, %c0_i32_0, %c0_i32_1 : i32, i32, i32
  }
  func.func @transform_9(%arg0: i32) -> (i32, i32, i32) {
    %c0_i32 = arith.constant 0 : i32
    %c0_i32_0 = arith.constant 0 : i32
    %c0_i32_1 = arith.constant 0 : i32
    %c0_i32_2 = arith.constant 0 : i32
    return %c0_i32, %c0_i32_0, %c0_i32_1 : i32, i32, i32
  }
  func.func @transform_10(%arg0: i32) -> (i32, i32) {
    %c0_i32 = arith.constant 0 : i32
    %c0_i32_0 = arith.constant 0 : i32
    %c0_i32_1 = arith.constant 0 : i32
    return %c0_i32, %c0_i32_0 : i32, i32
  }
  func.func @transform_11(%arg0: i32) -> (i32, i32) {
    %c0_i32 = arith.constant 0 : i32
    %c0_i32_0 = arith.constant 0 : i32
    %c0_i32_1 = arith.constant 0 : i32
    return %c0_i32, %c0_i32_0 : i32, i32
  }
  func.func @transform_12(%arg0: i32) -> (i32, i32) {
    %c0_i32 = arith.constant 0 : i32
    %c0_i32_0 = arith.constant 0 : i32
    %c0_i32_1 = arith.constant 0 : i32
    return %c0_i32, %c0_i32_0 : i32, i32
  }
  func.func @transform_13(%arg0: i32) -> (i32, i32, i32) {
    %c0_i32 = arith.constant 0 : i32
    %c0_i32_0 = arith.constant 0 : i32
    %c0_i32_1 = arith.constant 0 : i32
    return %arg0, %c0_i32, %c0_i32_0 : i32, i32, i32
  }
}

</mosaic_0001>

<bundles_post_ra>
// kernel: tile.13
= control target key start
LH: loop header
LB: loop body
LE: loop exit
PB: predicated region body
PF: predicated region fallthrough
CT: control target
= control target key end

     0   :  { %s40_s0 = inlined_call_operand.vmem [shape: f32[6], index: 0, kind: input, shape index: {}]   ;;  %s41_s1 = inlined_call_operand.vmem [shape: f32[28,6], index: 1, kind: output, shape index: {}]  }
   0x1   :  { %v4_v0 = vld [vmem:[%s40_s0] ss:$0 sm:$0xff] }
   0x2   :  { %5 = vst [vmem:[%s41_s1] sm:$0xff] %v4_v0 }
   0x3   :  { %12 = vst [vmem:[%s41_s1 + $0x8] sm:$0xff] %v4_v0 }
   0x4   :  { %13 = vst [vmem:[%s41_s1 + $0x10] sm:$0xff] %v4_v0 }
   0x5   :  { %14 = vst [vmem:[%s41_s1 + $0x18] sm:$0xff] %v4_v0 }

// kernel: tile.14
= control target key start
LH: loop header
LB: loop body
LE: loop exit
PB: predicated region body
PF: predicated region fallthrough
CT: control target
= control target key end

     0   :  { %vm9_vm0 = vcmask 15360   ;;  %s248_s12 = smov 126   ;;  %s249_s13 = smov 114   ;;  %vm3_vm1 = vcmask 48128   ;;  %vm13_vm2 = vcmask 31744   ;;  %vm16_vm3 = vcmask 1048560   ;;  %s378_s0 = inlined_call_operand.vmem [shape: f32[28,6], index: 0, kind: input, shape index: {}]   ;;  %s379_s1 = inlined_call_operand.vmem [shape: f32[1,168], index: 1, kind: output, shape index: {}]  }
   0x1   :  { %v192_v0 = vld [vmem:[%s378_s0 + $0x15] sm:$0x1]   ;;  %v195_v3 = vld [vmem:[%s378_s0 + $0x13] sm:$0x1]   ;;  %v197_v4 = vld [vmem:[%s378_s0 + $0x11] sm:$0x1]  }
   0x2   :  { %v193_v1 = vld [vmem:[%s378_s0 + $0x15] sm:$0x1]   ;;  %26 = vrot.lane.b32.xlu1 %v195_v3, %s249_s13  ;;  %s250_s16 = smov 102   ;;  %v194_v5 = vld [vmem:[%s378_s0 + $0x14] sm:$0x1]   ;;  %s251_s21 = smov 120  }
   0x3   :  { %v10_v2 = vsel %vm9_vm0, %v193_v1, %v192_v0  ;;  %38 = vrot.lane.b32.xlu2 %v197_v4, %s250_s16  ;;  %v196_v6 = vld [vmem:[%s378_s0 + $0x12] sm:$0x1]   ;;  %s252_s22 = smov 108   ;;  %v198_v7 = vld [vmem:[%s378_s0 + $0x10] sm:$0x1]   ;;  %s253_s25 = smov 96  }
   0x4   :  { %11 = vrot.lane.b32.xlu0 %v10_v2, %s248_s12  ;;  %v199_v8 = vld [vmem:[%s378_s0 + $0xf] sm:$0x1]   ;;  %v200_v9 = vld [vmem:[%s378_s0 + $0xe] sm:$0x1]   ;;  %s254_s30 = smov 90   ;;  %s255_s2 = smov 84  }
   0x5   :  { %v201_v10 = vld [vmem:[%s378_s0 + $0xd] sm:$0x1]   ;;  %s256_s5 = smov 78   ;;  %v202_v11 = vld [vmem:[%s378_s0 + $0xc] sm:$0x1]   ;;  %s257_s10 = smov 72  }
   0x6   :  { %v203_v12 = vld [vmem:[%s378_s0 + $0xb] sm:$0x1]   ;;  %s258_s11 = smov 66   ;;  %v204_v13 = vld [vmem:[%s378_s0 + $0xa] sm:$0x1]   ;;  %s259_s14 = smov 60  }
   0x7   :  { %v205_v14 = vld [vmem:[%s378_s0 + $0x9] sm:$0x1]   ;;  %v206_v15 = vld [vmem:[%s378_s0 + $0x8] sm:$0x1]   ;;  %s260_s19 = smov 54   ;;  %s261_s20 = smov 48  }
   0x8   :  { %v207_v16 = vld [vmem:[%s378_s0 + $0x7] sm:$0x1]   ;;  %s262_s23 = smov 42   ;;  %v208_v17 = vld [vmem:[%s378_s0 + $0x6] sm:$0x1]   ;;  %s263_s28 = smov 36  }
   0x9   :  { %v209_v18 = vld [vmem:[%s378_s0 + $0x1b] sm:$0x1]   ;;  %s264_s29 = smov 34   ;;  %v210_v19 = vld [vmem:[%s378_s0 + $0x5] sm:$0x1]   ;;  %s265_s3 = smov 30  }
   0xa   :  { %32 = vrot.lane.b32.xlu1 %v196_v6, %s252_s22  ;;  %v211_v20 = vld [vmem:[%s378_s0 + $0x1a] sm:$0x1]   ;;  %v212_v21 = vld [vmem:[%s378_s0 + $0x4] sm:$0x1]   ;;  %s266_s8 = smov 28   ;;  %s267_s9 = smov 24  }
   0xb   :  { %44 = vrot.lane.b32.xlu2 %v198_v7, %s253_s25  ;;  %v213_v22 = vld [vmem:[%s378_s0 + $0x19] sm:$0x1]   ;;  %s268_s12 = smov 22   ;;  %v214_v23 = vld [vmem:[%s378_s0 + $0x3] sm:$0x1]   ;;  %s269_s17 = smov 18  }
   0xc   :  { %20 = vrot.lane.b32.xlu0 %v194_v5, %s251_s21  ;;  %v215_v24 = vld [vmem:[%s378_s0 + $0x18] sm:$0x1]   ;;  %s270_s18 = smov 16   ;;  %v216_v25 = vld [vmem:[%s378_s0 + $0x2] sm:$0x1]   ;;  %s271_s21 = smov 12  }
   0xd   :  { %v217_v26 = vld [vmem:[%s378_s0 + $0x17] sm:$0x1]   ;;  %v218_v27 = vld [vmem:[%s378_s0 + $0x1] sm:$0x1]   ;;  %s272_s26 = smov 10   ;;  %s273_s27 = smov 6  }
   0xe   :  { %v219_v28 = vld [vmem:[%s378_s0 + $0x16] sm:$0x1]   ;;  %v2_v29 = vld [vmem:[%s378_s0] sm:$0x1]   ;;  %vm22_vm4 = vcmask 1032128   ;;  %vm28_vm5 = vcmask 982928  }
   0xf   :  { %4 = vst.msk [vmem:[#allocation0] sm:$0x1] %vm3_vm1, %v2_v29   ;;  %vm34_vm6 = vcmask 933728   ;;  %vm40_vm7 = vcmask 884528   ;;  %vm46_vm8 = vcmask 835328   ;;  %vm52_vm9 = vcmask 786128  }
  0x10   :  { %vm58_vm10 = vcmask 736928   ;;  %vm64_vm11 = vcmask 687728   ;;  %vm70_vm12 = vcmask 638528   ;;  %vm76_vm13 = vcmask 589328  }
  0x11   :  { %vm82_vm14 = vcmask 540128   ;;  %vm88_vm15 = vcmask 490928   ;;  %vm94_vm0 = vcmask 441728   ;;  %vm100_vm1 = vcmask 392528  }
  0x12   :  { %56 = vrot.lane.b32.xlu1 %v200_v9, %s255_s2 }
  0x13   :  { %62 = vrot.lane.b32.xlu2 %v201_v10, %s256_s5 }
  0x14   :  { %50 = vrot.lane.b32.xlu0 %v199_v8, %s254_s30  ;;  %s274_s30 = smov 4  }
  0x1a   :  { %74 = vrot.lane.b32.xlu1 %v203_v12, %s258_s11 }
  0x1b   :  { %80 = vrot.lane.b32.xlu2 %v204_v13, %s259_s14 }
  0x1c   :  { %68 = vrot.lane.b32.xlu0 %v202_v11, %s257_s10 }
  0x22   :  { %92 = vrot.lane.b32.xlu1 %v206_v15, %s261_s20 }
  0x23   :  { %98 = vrot.lane.b32.xlu2 %v207_v16, %s262_s23 }
  0x24   :  { %86 = vrot.lane.b32.xlu0 %v205_v14, %s260_s19 }
  0x2a   :  { %110 = vrot.lane.b32.xlu1 %v209_v18, %s264_s29 }
  0x2b   :  { %117 = vrot.lane.b32.xlu2 %v210_v19, %s265_s3 }
  0x2c   :  { %104 = vrot.lane.b32.xlu0 %v208_v17, %s263_s28 }
  0x32   :  { %130 = vrot.lane.b32.xlu1 %v212_v21, %s267_s9 }
  0x33   :  { %136 = vrot.lane.b32.xlu2 %v213_v22, %s268_s12 }
  0x34   :  { %123 = vrot.lane.b32.xlu0 %v211_v20, %s266_s8 }
  0x3a   :  { %149 = vrot.lane.b32.xlu1 %v215_v24, %s270_s18 }
  0x3b   :  { %156 = vrot.lane.b32.xlu2 %v216_v25, %s271_s21 }
  0x3c   :  { %143 = vrot.lane.b32.xlu0 %v214_v23, %s269_s17 }
  0x42   :  { %169 = vrot.lane.b32.xlu1 %v218_v27, %s273_s27 }
  0x43   :  { %175 = vrot.lane.b32.xlu2 %v219_v28, %s274_s30 }
  0x44   :  { %162 = vrot.lane.b32.xlu0 %v217_v26, %s272_s26 }
  0x5d   :  { %v39_v30 = vpop.permute.xlu2 %38  }
  0x65   :  { %v45_v31 = vpop.permute.xlu2 %44  }
  0x6d   :  { %v63_v32 = vpop.permute.xlu2 %62  }
  0x74   :  { %v27_v34 = vpop.permute.xlu1 %26  }
  0x75   :  { %v81_v35 = vpop.permute.xlu2 %80  }
  0x76   :  { %v12_v33 = vpop.permute.xlu0 %11  }
  0x77   :  { %15 = vst.msk [vmem:[#allocation0 + $0x8] sm:$0x1] %vm13_vm2, %v12_v33   ;;  %vm106_vm2 = vcmask 343328  }
  0x78   :  { %17 = vst.msk [vmem:[#allocation0] sm:$0x1] %vm16_vm3, %v12_v33   ;;  %vm119_vm3 = vcmask 294128  }
  0x7c   :  { %v33_v37 = vpop.permute.xlu1 %32  }
  0x7d   :  { %v99_v38 = vpop.permute.xlu2 %98  }
  0x7e   :  { %v21_v36 = vpop.permute.xlu0 %20  }
  0x7f   :  { %23 = vst.msk [vmem:[#allocation0] sm:$0x1] %vm22_vm4, %v21_v36   ;;  %vm112_vm4 = vcmask 326928  }
  0x80   :  { %29 = vst.msk [vmem:[#allocation0] sm:$0x1] %vm28_vm5, %v27_v34   ;;  %vm125_vm5 = vcmask 277728  }
  0x81   :  { %35 = vst.msk [vmem:[#allocation0] sm:$0x1] %vm34_vm6, %v33_v37   ;;  %vm138_vm6 = vcmask 228528  }
  0x82   :  { %41 = vst.msk [vmem:[#allocation0] sm:$0x1] %vm40_vm7, %v39_v30   ;;  %vm132_vm7 = vcmask 244928  }
  0x83   :  { %47 = vst.msk [vmem:[#allocation0] sm:$0x1] %vm46_vm8, %v45_v31   ;;  %vm145_vm8 = vcmask 195728  }
  0x84   :  { %v57_v40 = vpop.permute.xlu1 %56  }
  0x85   :  { %v118_v41 = vpop.permute.xlu2 %117  }
  0x86   :  { %v51_v39 = vpop.permute.xlu0 %50  }
  0x87   :  { %53 = vst.msk [vmem:[#allocation0] sm:$0x1] %vm52_vm9, %v51_v39   ;;  %vm158_vm9 = vcmask 146528  }
  0x88   :  { %59 = vst.msk [vmem:[#allocation0] sm:$0x1] %vm58_vm10, %v57_v40   ;;  %vm151_vm10 = vcmask 179328  }
  0x89   :  { %65 = vst.msk [vmem:[#allocation0] sm:$0x1] %vm64_vm11, %v63_v32   ;;  %vm164_vm11 = vcmask 130128  }
  0x8c   :  { %v75_v43 = vpop.permute.xlu1 %74  }
  0x8d   :  { %v137_v44 = vpop.permute.xlu2 %136  }
  0x8e   :  { %v69_v42 = vpop.permute.xlu0 %68  }
  0x8f   :  { %71 = vst.msk [vmem:[#allocation0] sm:$0x1] %vm70_vm12, %v69_v42   ;;  %vm177_vm12 = vcmask 80928  }
  0x90   :  { %77 = vst.msk [vmem:[#allocation0] sm:$0x1] %vm76_vm13, %v75_v43   ;;  %vm171_vm13 = vcmask 97328  }
  0x91   :  { %83 = vst.msk [vmem:[#allocation0] sm:$0x1] %vm82_vm14, %v81_v35  }
  0x94   :  { %v93_v46 = vpop.permute.xlu1 %92  }
  0x95   :  { %v157_v47 = vpop.permute.xlu2 %156  }
  0x96   :  { %v87_v45 = vpop.permute.xlu0 %86  }
  0x97   :  { %89 = vst.msk [vmem:[#allocation0] sm:$0x1] %vm88_vm15, %v87_v45  }
  0x98   :  { %95 = vst.msk [vmem:[#allocation0] sm:$0x1] %vm94_vm0, %v93_v46  }
  0x99   :  { %101 = vst.msk [vmem:[#allocation0] sm:$0x1] %vm100_vm1, %v99_v38  }
  0x9c   :  { %v111_v49 = vpop.permute.xlu1 %110  }
  0x9d   :  { %114 = vst.msk [vmem:[#allocation0 + $0x8] sm:$0x1] %vm112_vm4, %v111_v49   ;;  %v176_v50 = vpop.permute.xlu2 %175  }
  0x9e   :  { %v105_v48 = vpop.permute.xlu0 %104  }
  0x9f   :  { %107 = vst.msk [vmem:[#allocation0] sm:$0x1] %vm106_vm2, %v105_v48  }
  0xa0   :  { %120 = vst.msk [vmem:[#allocation0] sm:$0x1] %vm119_vm3, %v118_v41  }
  0xa4   :  { %v131_v52 = vpop.permute.xlu1 %130  }
  0xa5   :  { %133 = vst.msk [vmem:[#allocation0] sm:$0x1] %vm132_vm7, %v131_v52  }
  0xa6   :  { %v124_v51 = vpop.permute.xlu0 %123  }
  0xa7   :  { %127 = vst.msk [vmem:[#allocation0 + $0x8] sm:$0x1] %vm125_vm5, %v124_v51  }
  0xa8   :  { %140 = vst.msk [vmem:[#allocation0 + $0x8] sm:$0x1] %vm138_vm6, %v137_v44  }
  0xac   :  { %v150_v54 = vpop.permute.xlu1 %149  }
  0xad   :  { %153 = vst.msk [vmem:[#allocation0 + $0x8] sm:$0x1] %vm151_vm10, %v150_v54  }
  0xae   :  { %v144_v53 = vpop.permute.xlu0 %143  }
  0xaf   :  { %146 = vst.msk [vmem:[#allocation0] sm:$0x1] %vm145_vm8, %v144_v53  }
  0xb0   :  { %159 = vst.msk [vmem:[#allocation0] sm:$0x1] %vm158_vm9, %v157_v47  }
  0xb4   :  { %v170_v56 = vpop.permute.xlu1 %169  }
  0xb5   :  { %172 = vst.msk [vmem:[#allocation0] sm:$0x1] %vm171_vm13, %v170_v56  }
  0xb6   :  { %v163_v55 = vpop.permute.xlu0 %162  }
  0xb7   :  { %166 = vst.msk [vmem:[#allocation0 + $0x8] sm:$0x1] %vm164_vm11, %v163_v55  }
  0xb8   :  { %179 = vst.msk [vmem:[#allocation0 + $0x8] sm:$0x1] %vm177_vm12, %v176_v50  }
  0xbc   :  { %v182_v58 = vld [vmem:[#allocation0] sm:$0x1] }
  0xbd   :  { %185 = vst [vmem:[%s379_s1] sm:$0x1] %v182_v58 }
  0xbf   :  { %v187_v57 = vld [vmem:[#allocation0 + $0x8] sm:$0x1] }
  0xc0   :  { %220 = vst [vmem:[%s379_s1 + $0x1] sm:$0x1] %v187_v57 }

// kernel: tile.18
= control target key start
LH: loop header
LB: loop body
LE: loop exit
PB: predicated region body
PF: predicated region fallthrough
CT: control target
= control target key end

     0   :  { %s28_s0 = inlined_call_operand.vmem [shape: f32[16], index: 0, kind: input, shape index: {}]   ;;  %s29_s1 = inlined_call_operand.vmem [shape: f32[12,16], index: 1, kind: output, shape index: {}]  }
   0x1   :  { %v4_v0 = vld [vmem:[%s28_s0] ss:$0 sm:$0xff] }
   0x2   :  { %5 = vst [vmem:[%s29_s1] sm:$0xff] %v4_v0 }
   0x3   :  { %8 = vst [vmem:[%s29_s1 + $0x8] sm:$0xff] %v4_v0 }

// kernel: tile.19
= control target key start
LH: loop header
LB: loop body
LE: loop exit
PB: predicated region body
PF: predicated region fallthrough
CT: control target
= control target key end

     0   :  { %s78_s10 = smov 112   ;;  %s79_s11 = smov 80   ;;  %vm4_vm0 = vcmask 130048   ;;  %vm10_vm1 = vcmask 1048448   ;;  %vm16_vm2 = vcmask 917248   ;;  %vm22_vm3 = vcmask 786048   ;;  %s125_s0 = inlined_call_operand.vmem [shape: f32[12,16], index: 0, kind: input, shape index: {}]   ;;  %s126_s1 = inlined_call_operand.vmem [shape: f32[1,192], index: 1, kind: output, shape index: {}]  }
   0x1   :  { %v63_v0 = vld [vmem:[%s125_s0 + $0x7] sm:$0x1]   ;;  %v65_v1 = vld [vmem:[%s125_s0 + $0x5] sm:$0x1]   ;;  %s31_s12 = smov 3  ;;  %s80_s15 = smov 48  }
   0x2   :  { %8 = vrot.lane.b32.xlu0 %v63_v0, %s78_s10  ;;  %20 = vrot.lane.b32.xlu1 %v65_v1, %s79_s11  ;;  %v67_v2 = vld [vmem:[%s125_s0 + $0x3] ss:$8 sm:%s31_s12]   ;;  %s38_s20 = smov 3  ;;  %s81_s21 = smov 96   ;;  %vm28_vm4 = vcmask 654848   ;;  %vm35_vm5 = vcmask 523648  }
   0x3   :  { %33 = vrot.lane.b32.xlu2 %v67_v2, %s80_s15  ;;  %v64_v3 = vld [vmem:[%s125_s0 + $0x6] sm:$0x1]   ;;  %v66_v4 = vld [vmem:[%s125_s0 + $0x4] sm:$0x1]   ;;  %s82_s22 = smov 64   ;;  %s45_s25 = smov 3 }
   0x4   :  { %v68_v5 = vld [vmem:[%s125_s0 + $0x2] ss:$8 sm:%s38_s20]   ;;  %s83_s26 = smov 32   ;;  %v69_v6 = vld [vmem:[%s125_s0 + $0x1] ss:$8 sm:%s45_s25]   ;;  %s84_s29 = smov 16  }
   0x5   :  { %s2_s30 = smov 3  ;;  %vm42_vm6 = vcmask 392448   ;;  %vm49_vm7 = vcmask 261248  }
   0x6   :  { %v3_v7 = vld [vmem:[%s125_s0] ss:$8 sm:%s2_s30]  }
   0x7   :  { %5 = vst.msk [vmem:[#allocation0] ss:$8 sm:$0x3] %vm4_vm0, %v3_v7  }
   0xa   :  { %14 = vrot.lane.b32.xlu0 %v64_v3, %s81_s21  ;;  %26 = vrot.lane.b32.xlu1 %v66_v4, %s82_s22 }
   0xb   :  { %40 = vrot.lane.b32.xlu2 %v68_v5, %s83_s26 }
  0x12   :  { %47 = vrot.lane.b32.xlu0 %v69_v6, %s84_s29 }
  0x5d   :  { %v34_v8 = vpop.permute.xlu2 %33  }
  0x65   :  { %v41_v9 = vpop.permute.xlu2 %40  }
  0x74   :  { %v9_v10 = vpop.permute.xlu0 %8   ;;  %v21_v11 = vpop.permute.xlu1 %20  }
  0x75   :  { %11 = vst.msk [vmem:[#allocation0] sm:$0x1] %vm10_vm1, %v9_v10  }
  0x7c   :  { %v15_v12 = vpop.permute.xlu0 %14   ;;  %v27_v13 = vpop.permute.xlu1 %26  }
  0x7d   :  { %17 = vst.msk [vmem:[#allocation0] sm:$0x1] %vm16_vm2, %v15_v12  }
  0x7e   :  { %23 = vst.msk [vmem:[#allocation0] sm:$0x1] %vm22_vm3, %v21_v11  }
  0x7f   :  { %29 = vst.msk [vmem:[#allocation0] sm:$0x1] %vm28_vm4, %v27_v13  }
  0x80   :  { %36 = vst.msk [vmem:[#allocation0] ss:$8 sm:$0x3] %vm35_vm5, %v34_v8  }
  0x81   :  { %43 = vst.msk [vmem:[#allocation0] ss:$8 sm:$0x3] %vm42_vm6, %v41_v9  }
  0x84   :  { %v48_v14 = vpop.permute.xlu0 %47  }
  0x85   :  { %50 = vst.msk [vmem:[#allocation0] ss:$8 sm:$0x3] %vm49_vm7, %v48_v14  }
  0x8c   :  { %v53_v15 = vld [vmem:[#allocation0] sm:$0x1]  ;;  %v58_v16 = vld [vmem:[#allocation0 + $0x8] sm:$0x1] }
  0x8d   :  { %56 = vst [vmem:[%s126_s1] sm:$0x1] %v53_v15 }
  0x8e   :  { %70 = vst [vmem:[%s126_s1 + $0x1] sm:$0x1] %v58_v16 }

// kernel: basic_net_forward.1
= control target key start
LH: loop header
LB: loop body
LE: loop exit
PB: predicated region body
PF: predicated region fallthrough
CT: control target
= control target key end

     0   :  { %18 = vsyncpa [#allocation5], 0  ;;  %s4584_s0 = inlined_call_operand.vmem [shape: f32[2,58,90], index: 0, kind: input, shape index: {}]   ;;  %s4585_s1 = inlined_call_operand.vmem [shape: f32[3,90,168], index: 1, kind: input, shape index: {}]   ;;  %s4586_s2 = inlined_call_operand.vmem [shape: f32[1,168], index: 2, kind: input, shape index: {}]   ;;  %s4587_s3 = inlined_call_operand.vmem [shape: f32[2,28,56], index: 3, kind: input, shape index: {}]   ;;  %s4588_s4 = inlined_call_operand.vmem [shape: f32[2,168,84], index: 4, kind: input, shape index: {}]   ;;  %s4589_s5 = inlined_call_operand.vmem [shape: f32[3,84,192], index: 5, kind: input, shape index: {}]   ;;  %s4590_s6 = inlined_call_operand.vmem [shape: f32[1,192], index: 6, kind: input, shape index: {}]   ;;  %s4591_s7 = inlined_call_operand.vmem [shape: f32[2,13,26], index: 7, kind: input, shape index: {}]   ;;  %s4592_s8 = inlined_call_operand.vmem [shape: f32[2,192,96], index: 8, kind: input, shape index: {}]   ;;  %s4593_s9 = inlined_call_operand.vmem [shape: f32[13,96,128], index: 9, kind: input, shape index: {}]   ;;  %s4594_s10 = inlined_call_operand.vmem [shape: f32[1,128], index: 10, kind: input, shape index: {}]   ;;  %s4595_s11 = inlined_call_operand.vmem [shape: f32[128,6], index: 11, kind: input, shape index: {}]   ;;  %s4596_s12 = inlined_call_operand.vmem [shape: f32[1,6], index: 12, kind: input, shape index: {}]   ;;  %s4597_s13 = inlined_call_operand.hbm [shape: f32[2,1,6], index: 13, kind: output, shape index: {}]  }
   0x1   :  { %20 = vsyncpa [#allocation5 + $0x1], 0  ;;  %s3053_s25 = smov 0   ;;  %s3055_s26 = smov 0  }
   0x2   :  { %s3057_s27 = smov 0   ;;  %s3059_s28 = smov 0  }
   0x3 LB: > { %4602 = sst [smem:[#allocation7_spill]] %s2977_s27  ;;  %s3074_s29 = sadd.s32 4294967295, %s2981_s28   ;;  %s2981_s28 = sphi %s3059_s28, %s4609_s28   ;;  %s2977_s27 = sphi %s3057_s27, %s4611_s27   ;;  %s2973_s26 = sphi %s3055_s26, %s4613_s26   ;;  %s2969_s25 = sphi %s3053_s25, %s4612_s25  }
   0x4   : > { %s2446_s30 = sadd.s32 4294967294, %s2981_s28   ;;  %s3078_s14 = sadd.s32 1, %s2981_s28  }
   0x5   : > { %4603 = sst [smem:[#allocation8_spill]] %s3078_s14  ;;  %s311_s15 = sadd.s32 1, %s2977_s27 }
   0x6   : > { %s308_s16 = ssub.s32 %s2981_s28, %s3078_s14  ;;  %p321_p0 = scmp.ne.s32.totalorder %s2977_s27, %s2973_s26 }
   0x7   : > { %p309_p1 = scmp.eq.s32.totalorder %s308_s16, 0  ;;  %p322_p2 = scmp.eq.s32.totalorder %s3074_s29, 1 }
   0x8   : > { %p327_p3 = scmp.ne.s32.totalorder %s2973_s26, %s2969_s25  ;;  %p328_p4 = scmp.eq.s32.totalorder %s2446_s30, 1 }
   0x9   : > { %s3089_s17 = scalar_select %p309_p1, %s2977_s27, %s311_s15  }
   0xa   : > { %p3091_p5 = por %p322_p2, %p321_p0  ;;  %p3095_p6 = por %p328_p4, %p327_p3 }
   0xb   : > { %4604 = sst [smem:[#allocation9_spill]] %s3089_s17  ;;  %p2449_p7 = scmp.ge.s32.totalorder %s2981_s28, 1 }
   0xc   : > { %s4606_s19 = scalar_select %p3095_p6, 1, 0 }
   0xd   : > { %p390_p8 = scmp.lt.s32.totalorder %s2981_s28, 3 }
   0xe   : > { %4607 = sst [smem:[#allocation10_spill]] %s4606_s19 }
   0xf   : > { %p391_p9 = pnand %p2449_p7, %p390_p8 }
  0x10   : > { %p433_p10 = scmp.lt.s32.totalorder (!%p391_p9), %s3074_s29, 1  ;;  %s431_s21 = sand.u32 (!%p391_p9), 1, %s2973_s26  }
  0x11   : > { %394 = sbr.rel (%p391_p9) target bundleno = 1439 (0x59f), region = 72  ;;  %s2387_s30 = scalar_lea.hbm (!%p391_p9), %s4597_s13, %s3074_s29 }
  0x12   : > { %s2391_s14 = sshll.u32 (!%p391_p9), %s2387_s30, 4  ;;  %s2379_s20 = scalar_lea.sflag (!%p391_p9), [#allocation5], %s431_s21  ;;  %s2392_s14 = int_to_ptr.hbm [resolvable:$true] %s2391_s14 }
  0x13   : > { %s2939_s24 = scalar_lea.hbm (!%p391_p9), %s4597_s13, 2 }
  0x16   : > { %v2474_v0 = vld [vmem:[%s4585_s1 + $0x170] sm:$0x3]  ;;  %vm523_vm0 = vcmask 1041408   ;;  %v2475_v1 = vld [vmem:[%s4585_s1 + $0x178] sm:$0x3]  ;;  %v2472_v2 = vld [vmem:[%s4585_s1 + $0x160] sm:$0xff] }
  0x17   : > { %2476 = vmatpush.msk.msra.mxu0 %vm523_vm0, %v2474_v0  ;;  %2484 = vmatpush.msk.msra.mxu1 %vm523_vm0, %v2475_v1  ;;  %v467_v3 = vld [vmem:[%s4585_s1 + $0xb0] sm:$0x3]  ;;  %v2473_v4 = vld [vmem:[%s4585_s1 + $0x168] sm:$0xff]  ;;  %v465_v5 = vld [vmem:[%s4585_s1 + $0xa0] sm:$0xff]  ;;  %s3169_s22 = scalar_select %p433_p10, %s3074_s29, 1  ;;  %vm501_vm1 = vcmask 736256  }
  0x18   : > { %2492 = vmatpush.msk.msra.mxu2 %vm523_vm0, %v467_v3  ;;  %v2470_v6 = vld [vmem:[%s4585_s1 + $0x150] sm:$0xff]  ;;  %v2471_v7 = vld [vmem:[%s4585_s1 + $0x158] sm:$0xff]  ;;  %v2468_v9 = vld [vmem:[%s4585_s1 + $0x140] sm:$0xff]  ;;  %vm896_vm2 = vcmask 457728   ;;  %vm1071_vm3 = vcmask 326656   ;;  %vm1297_vm4 = vcmask 1043456  }
  0x19   : > { %535 = vmatpush.msra.mxu0 %v2472_v2  ;;  %573 = vmatpush.msra.mxu1 %v2473_v4  ;;  %v463_v8 = vld [vmem:[%s4585_s1 + $0x90] sm:$0xff]  ;;  %v2469_v10 = vld [vmem:[%s4585_s1 + $0x148] sm:$0xff]  ;;  %v461_v11 = vld [vmem:[%s4585_s1 + $0x80] sm:$0xff]  ;;  %s2872_s16 = sshll.u32 %s3169_s22, 6  ;;  %vm1226_vm5 = vcmask 687104   ;;  %vm1230_vm6 = vcmask 683008  }
  0x1a   : > { %638 = vmatpush.msra.mxu2 %v465_v5  ;;  %v2466_v12 = vld [vmem:[%s4585_s1 + $0x130] sm:$0xff]  ;;  %v2467_v13 = vld [vmem:[%s4585_s1 + $0x138] sm:$0xff]  ;;  %v2464_v15 = vld [vmem:[%s4585_s1 + $0x120] sm:$0xff]  ;;  %s3221_s19 = scalar_lea.vmem %s4584_s0, %s2872_s16  ;;  %vm1573_vm7 = vcmask 211968   ;;  %vm1715_vm8 = vcmask 523264   ;;  %vm1841_vm9 = vcmask 785408  }
  0x1b   : > { %536 = vmatpush.msra.mxu0 %v2470_v6  ;;  %574 = vmatpush.msra.mxu1 %v2471_v7  ;;  %v459_v14 = vld [vmem:[%s4585_s1 + $0x70] sm:$0xff]  ;;  %v2465_v16 = vld [vmem:[%s4585_s1 + $0x128] sm:$0xff]  ;;  %v457_v17 = vld [vmem:[%s4585_s1 + $0x60] sm:$0xff]  ;;  %vm1843_vm10 = vcmask 782336   ;;  %s432_s22 = scalar_lea.vmem [#allocation4], %s431_s21  ;;  %vm2376_vm11 = vcmask 40960  }
  0x1c   : > { %639 = vmatpush.msra.mxu2 %v463_v8  ;;  %v2462_v18 = vld [vmem:[%s4585_s1 + $0x110] sm:$0xff]  ;;  %v2463_v19 = vld [vmem:[%s4585_s1 + $0x118] sm:$0xff]  ;;  %v2460_v21 = vld [vmem:[%s4585_s1 + $0x100] sm:$0xff]  ;;  %s2389_s27 = sshll.u32 %s432_s22, 4  ;;  %s2390_s27 = int_to_ptr.vmem [resolvable:$true] %s2389_s27 }
  0x1d   : > { %537 = vmatpush.msra.mxu0 %v2468_v9  ;;  %575 = vmatpush.msra.mxu1 %v2469_v10  ;;  %v455_v20 = vld [vmem:[%s4585_s1 + $0x50] sm:$0xff]  ;;  %v2461_v22 = vld [vmem:[%s4585_s1 + $0x108] sm:$0xff]  ;;  %v468_v23 = vld [vmem:[%s4585_s1 + $0xb8] sm:$0x3] }
  0x1e   : > { %640 = vmatpush.msra.mxu2 %v461_v11  ;;  %v453_v24 = vld [vmem:[%s4585_s1 + $0x40] sm:$0xff]  ;;  %v466_v25 = vld [vmem:[%s4585_s1 + $0xa8] sm:$0xff]  ;;  %v2458_v26 = vld [vmem:[%s4585_s1 + $0xf0] sm:$0xff]  ;;  %2500 = vmatpush.msk.msra.mxu3 %vm523_vm0, %v468_v23 }
  0x1f   : > { %538 = vmatpush.msra.mxu0 %v2466_v12  ;;  %576 = vmatpush.msra.mxu1 %v2467_v13  ;;  %v2459_v27 = vld [vmem:[%s4585_s1 + $0xf8] sm:$0xff]  ;;  %v451_v28 = vld [vmem:[%s4585_s1 + $0x30] sm:$0xff]  ;;  %v2456_v30 = vld [vmem:[%s4585_s1 + $0xe0] sm:$0xff] }
  0x20   : > { %641 = vmatpush.msra.mxu2 %v459_v14  ;;  %v464_v29 = vld [vmem:[%s4585_s1 + $0x98] sm:$0xff]  ;;  %v2457_v31 = vld [vmem:[%s4585_s1 + $0xe8] sm:$0xff]  ;;  %676 = vmatpush.msra.mxu3 %v466_v25  ;;  %v449_v32 = vld [vmem:[%s4585_s1 + $0x20] sm:$0xff] }
  0x21   : > { %539 = vmatpush.msra.mxu0 %v2464_v15  ;;  %577 = vmatpush.msra.mxu1 %v2465_v16  ;;  %v462_v33 = vld [vmem:[%s4585_s1 + $0x88] sm:$0xff]  ;;  %v2454_v34 = vld [vmem:[%s4585_s1 + $0xd0] sm:$0xff]  ;;  %v2455_v35 = vld [vmem:[%s4585_s1 + $0xd8] sm:$0xff] }
  0x22   : > { %642 = vmatpush.msra.mxu2 %v457_v17  ;;  %677 = vmatpush.msra.mxu3 %v464_v29  ;;  %v447_v36 = vld [vmem:[%s4585_s1 + $0x10] sm:$0xff]  ;;  %v460_v37 = vld [vmem:[%s4585_s1 + $0x78] sm:$0xff]  ;;  %v2452_v38 = vld [vmem:[%s4585_s1 + $0xc0] sm:$0xff] }
  0x23   : > { %540 = vmatpush.msra.mxu0 %v2462_v18  ;;  %578 = vmatpush.msra.mxu1 %v2463_v19  ;;  %v2453_v39 = vld [vmem:[%s4585_s1 + $0xc8] sm:$0xff]  ;;  %v445_v40 = vld [vmem:[%s4585_s1] sm:$0xff]  ;;  %v456_v44 = vld [vmem:[%s4585_s1 + $0x58] sm:$0xff] }
  0x24   : > { %643 = vmatpush.msra.mxu2 %v455_v20  ;;  %678 = vmatpush.msra.mxu3 %v462_v33  ;;  %v469_v41 = vld [vmem:[%s3221_s19 + $0x1] sm:$0xff]  ;;  %v2530_v45 = vld [vmem:[%s4585_s1 + $0x230] sm:$0x3]  ;;  %v2531_v46 = vld [vmem:[%s4585_s1 + $0x238] sm:$0x3] }
  0x25   : > { %541 = vmatpush.msra.mxu0 %v2460_v21  ;;  %579 = vmatpush.msra.mxu1 %v2461_v22  ;;  %v438_v42 = vld [vmem:[%s3221_s19] sm:$0xff]  ;;  %v458_v43 = vld [vmem:[%s4585_s1 + $0x68] sm:$0xff]  ;;  %v2526_v50 = vld [vmem:[%s4585_s1 + $0x210] sm:$0xff] }
  0x26   : > { %644 = vmatpush.msra.mxu2 %v453_v24  ;;  %679 = vmatpush.msra.mxu3 %v460_v37  ;;  %v2528_v47 = vld [vmem:[%s4585_s1 + $0x220] sm:$0xff]  ;;  %v2529_v48 = vld [vmem:[%s4585_s1 + $0x228] sm:$0xff]  ;;  %v2527_v51 = vld [vmem:[%s4585_s1 + $0x218] sm:$0xff] }
  0x27   : > { %542 = vmatpush.msra.mxu0 %v2458_v26  ;;  %580 = vmatpush.msra.mxu1 %v2459_v27  ;;  %v454_v49 = vld [vmem:[%s4585_s1 + $0x48] sm:$0xff]  ;;  %v452_v53 = vld [vmem:[%s4585_s1 + $0x38] sm:$0xff]  ;;  %v2524_v56 = vld [vmem:[%s4585_s1 + $0x200] sm:$0xff] }
  0x28   : > { %645 = vmatpush.msra.mxu2 %v451_v28  ;;  %680 = vmatpush.msra.mxu3 %v458_v43  ;;  %v470_v52 = vld [vmem:[%s3221_s19 + $0x9] sm:$0xff]  ;;  %v448_v58 = vld [vmem:[%s4585_s1 + $0x18] sm:$0xff]  ;;  %v2520_v62 = vld [vmem:[%s4585_s1 + $0x1e0] sm:$0xff] }
  0x29   : > { %543 = vmatpush.msra.mxu0 %v2456_v30  ;;  %581 = vmatpush.msra.mxu1 %v2457_v31  ;;  %v439_v54 = vld [vmem:[%s3221_s19 + $0x8] sm:$0xff]  ;;  %v2522_v59 = vld [vmem:[%s4585_s1 + $0x1f0] sm:$0xff]  ;;  %v2523_v60 = vld [vmem:[%s4585_s1 + $0x1f8] sm:$0xff] }
  0x2a   : > { %646 = vmatpush.msra.mxu2 %v449_v32  ;;  %681 = vmatpush.msra.mxu3 %v456_v44  ;;  %v450_v55 = vld [vmem:[%s4585_s1 + $0x28] sm:$0xff]  ;;  %v471_v0 = vld [vmem:[%s3221_s19 + $0x11] sm:$0xff]  ;;  %v2516_v4 = vld [vmem:[%s4585_s1 + $0x1c0] sm:$0xff] }
  0x2b   : > { %544 = vmatpush.msra.mxu0 %v2454_v34  ;;  %582 = vmatpush.msra.mxu1 %v2455_v35  ;;  %v2525_v57 = vld [vmem:[%s4585_s1 + $0x208] sm:$0xff]  ;;  %v440_v1 = vld [vmem:[%s3221_s19 + $0x10] sm:$0xff]  ;;  %v2519_v3 = vld [vmem:[%s4585_s1 + $0x1d8] sm:$0xff] }
  0x2c   : > { %647 = vmatpush.msra.mxu2 %v447_v36  ;;  %682 = vmatpush.msra.mxu3 %v454_v49  ;;  %v446_v61 = vld [vmem:[%s4585_s1 + $0x8] sm:$0xff]  ;;  %v2518_v2 = vld [vmem:[%s4585_s1 + $0x1d0] sm:$0xff]  ;;  %v2515_v7 = vld [vmem:[%s4585_s1 + $0x1b8] sm:$0xff] }
  0x2d   : > { %545 = vmatpush.msra.mxu0 %v2452_v38  ;;  %583 = vmatpush.msra.mxu1 %v2453_v39  ;;  %v2521_v63 = vld [vmem:[%s4585_s1 + $0x1e8] sm:$0xff]  ;;  %v2514_v6 = vld [vmem:[%s4585_s1 + $0x1b0] sm:$0xff]  ;;  %v472_v8 = vld [vmem:[%s3221_s19 + $0x19] sm:$0xff] }
  0x2e   : > { %648 = vmatpush.msra.mxu2 %v445_v40  ;;  %2477 = vmatmul.msk.f32.vlgmr.msra.gmra.mxu0 %vm501_vm1, %v469_v41  ;;  %v2517_v5 = vld [vmem:[%s4585_s1 + $0x1c8] sm:$0xff]  ;;  %v441_v10 = vld [vmem:[%s3221_s19 + $0x18] sm:$0xff]  ;;  %v2512_v11 = vld [vmem:[%s4585_s1 + $0x1a0] sm:$0xff] }
  0x2f   : > { %2485 = vmatmul.msk.f32.vlgmr.msra.gmra.mxu1 %vm501_vm1, %v469_v41  ;;  %2493 = vmatmul.msk.f32.vlgmr.msra.gmra.mxu2 %vm501_vm1, %v438_v42  ;;  %v2513_v9 = vld [vmem:[%s4585_s1 + $0x1a8] sm:$0xff]  ;;  %v2511_v12 = vld [vmem:[%s4585_s1 + $0x198] sm:$0xff]  ;;  %v2510_v13 = vld [vmem:[%s4585_s1 + $0x190] sm:$0xff] }
  0x30   : > { %2532 = vmatpush.msk.msrb.mxu0 %vm523_vm0, %v2530_v45  ;;  %2540 = vmatpush.msk.msrb.mxu1 %vm523_vm0, %v2531_v46  ;;  %v2509_v14 = vld [vmem:[%s4585_s1 + $0x188] sm:$0xff]  ;;  %v2508_v15 = vld [vmem:[%s4585_s1 + $0x180] sm:$0xff]  ;;  %v475_v20 = vld [vmem:[%s3221_s19 + $0x31] sm:$0xff] }
  0x31   : > { %683 = vmatpush.msra.mxu3 %v452_v53  ;;  %v473_v16 = vld [vmem:[%s3221_s19 + $0x21] sm:$0xff]  ;;  %v474_v18 = vld [vmem:[%s3221_s19 + $0x29] sm:$0xff]  ;;  %v711_v24 = vld [vmem:[%s3221_s19 + $0x12] sm:$0xff] }
  0x32   : > { %773 = vmatpush.msrb.mxu0 %v2528_v47  ;;  %811 = vmatpush.msrb.mxu1 %v2529_v48  ;;  %v442_v17 = vld [vmem:[%s3221_s19 + $0x20] sm:$0xff]  ;;  %v443_v19 = vld [vmem:[%s3221_s19 + $0x28] sm:$0xff]  ;;  %v444_v21 = vld [vmem:[%s3221_s19 + $0x30] sm:$0xff] }
  0x33   : > { %684 = vmatpush.msra.mxu3 %v450_v55  ;;  %v709_v22 = vld [vmem:[%s3221_s19 + $0x2] sm:$0xff]  ;;  %v710_v23 = vld [vmem:[%s3221_s19 + $0xa] sm:$0xff]  ;;  %v712_v25 = vld [vmem:[%s3221_s19 + $0x1a] sm:$0xff] }
  0x34   : > { %774 = vmatpush.msrb.mxu0 %v2526_v50  ;;  %812 = vmatpush.msrb.mxu1 %v2527_v51  ;;  %v713_v26 = vld [vmem:[%s3221_s19 + $0x22] sm:$0xff]  ;;  %v714_v27 = vld [vmem:[%s3221_s19 + $0x2a] sm:$0xff]  ;;  %v715_v28 = vld [vmem:[%s3221_s19 + $0x32] sm:$0xff]  ;;  %s2933_s19 = sshra.s32 %s2392_s14, 4  ;;  %s2934_s19 = int_to_ptr.hbm [resolvable:$true] %s2933_s19 }
  0x35   : > { %685 = vmatpush.msra.mxu3 %v448_v58  ;;  %s2935_s16 = scalar_lea.hbm %s2934_s19, 1  ;;  %p2940_p0 = scmp.lt.s32.totalorder %s2934_s19, %s4597_s13 }
  0x36   : > { %2478 = vmatmul.msk.f32.gmra.mxu0 %vm501_vm1, %v470_v52  ;;  %813 = vmatpush.msrb.mxu1 %v2525_v57  ;;  %p2936_p11 = scmp.ne.s32.totalorder %s2934_s19, %s2935_s16  ;;  %p2941_p1 = scmp.lt.s32.totalorder %s2939_s24, %s2935_s16 }
  0x37   : > { %2486 = vmatmul.msk.f32.gmra.mxu1 %vm501_vm1, %v470_v52  ;;  %2494 = vmatmul.msk.f32.gmra.mxu2 %vm501_vm1, %v439_v54 }
  0x38   : > { %775 = vmatpush.msrb.mxu0 %v2524_v56  ;;  %814 = vmatpush.msrb.mxu1 %v2523_v60  ;;  %p2937_p12 = pnand %p2936_p11, %p3091_p5  ;;  %p2942_p2 = por %p2941_p1, %p2940_p0 }
  0x39   : > { %686 = vmatpush.msra.mxu3 %v446_v61 }
  0x3a   : > { %776 = vmatpush.msrb.mxu0 %v2522_v59  ;;  %2501 = vmatmul.msk.f32.vlgmr.msra.gmra.mxu3 %vm501_vm1, %v438_v42  ;;  %p2938_p13 = pneg %p2937_p12 }
  0x3b   : > { %815 = vmatpush.msrb.mxu1 %v2521_v63 }
  0x3c   : > { %777 = vmatpush.msrb.mxu0 %v2520_v62  ;;  %p2943_p3 = pnand %p2942_p2, %p2938_p13 }
  0x3d   : > { %816 = vmatpush.msrb.mxu1 %v2519_v3 }
  0x3e   : > { %2479 = vmatmul.msk.f32.gmra.mxu0 %vm501_vm1, %v471_v0 }
  0x3f   : > { %2487 = vmatmul.msk.f32.gmra.mxu1 %vm501_vm1, %v471_v0  ;;  %2495 = vmatmul.msk.f32.gmra.mxu2 %vm501_vm1, %v440_v1 }
  0x40   : > { %778 = vmatpush.msrb.mxu0 %v2518_v2  ;;  %817 = vmatpush.msrb.mxu1 %v2517_v5 }
  0x42   : > { %779 = vmatpush.msrb.mxu0 %v2516_v4  ;;  %818 = vmatpush.msrb.mxu1 %v2515_v7  ;;  %v858_v4 = vld [vmem:[%s4586_s2] sm:$0x3] }
  0x43   : > { %2502 = vmatmul.msk.f32.gmra.mxu3 %vm501_vm1, %v439_v54 }
  0x44   : > { %780 = vmatpush.msrb.mxu0 %v2514_v6  ;;  %819 = vmatpush.msrb.mxu1 %v2513_v9 }
  0x46   : > { %2480 = vmatmul.msk.f32.gmra.mxu0 %vm501_vm1, %v472_v8  ;;  %820 = vmatpush.msrb.mxu1 %v2511_v12 }
  0x47   : > { %2488 = vmatmul.msk.f32.gmra.mxu1 %vm501_vm1, %v472_v8  ;;  %2496 = vmatmul.msk.f32.gmra.mxu2 %vm501_vm1, %v441_v10 }
  0x48   : > { %781 = vmatpush.msrb.mxu0 %v2512_v11  ;;  %821 = vmatpush.msrb.mxu1 %v2509_v14  ;;  %v860_v11 = vperm.slane %v858_v4, 0 }
  0x4a   : > { %782 = vmatpush.msrb.mxu0 %v2510_v13 }
  0x4b   : > { %2503 = vmatmul.msk.f32.gmra.mxu3 %vm501_vm1, %v440_v1 }
  0x4c   : > { %783 = vmatpush.msrb.mxu0 %v2508_v15 }
  0x4e   : > { %2481 = vmatmul.msk.f32.gmra.mxu0 %vm501_vm1, %v473_v16 }
  0x4f   : > { %2489 = vmatmul.msk.f32.gmra.mxu1 %vm501_vm1, %v473_v16  ;;  %2497 = vmatmul.msk.f32.gmra.mxu2 %vm501_vm1, %v442_v17 }
  0x53   : > { %2504 = vmatmul.msk.f32.gmra.mxu3 %vm501_vm1, %v441_v10 }
  0x56   : > { %2482 = vmatmul.msk.f32.gmra.mxu0 %vm501_vm1, %v474_v18 }
  0x57   : > { %2490 = vmatmul.msk.f32.gmra.mxu1 %vm501_vm1, %v474_v18  ;;  %2498 = vmatmul.msk.f32.gmra.mxu2 %vm501_vm1, %v443_v19 }
  0x5b   : > { %2505 = vmatmul.msk.f32.gmra.mxu3 %vm501_vm1, %v442_v17 }
  0x5e   : > { %2483 = vmatmul.msk.f32.gmra.mxu0 %vm501_vm1, %v475_v20 }
  0x5f   : > { %2491 = vmatmul.msk.f32.gmra.mxu1 %vm501_vm1, %v475_v20  ;;  %2499 = vmatmul.msk.f32.gmra.mxu2 %vm501_vm1, %v444_v21 }
  0x63   : > { %2506 = vmatmul.msk.f32.gmra.mxu3 %vm501_vm1, %v443_v19 }
  0x66   : > { %2533 = vmatmul.msk.f32.vlgmr.msrb.gmra.mxu0 %vm501_vm1, %v709_v22 }
  0x67   : > { %2541 = vmatmul.msk.f32.vlgmr.msrb.gmra.mxu1 %vm501_vm1, %v709_v22 }
  0x6b   : > { %2507 = vmatmul.msk.f32.gmra.mxu3 %vm501_vm1, %v444_v21 }
  0x6e   : > { %2534 = vmatmul.msk.f32.gmra.mxu0 %vm501_vm1, %v710_v23 }
  0x6f   : > { %2542 = vmatmul.msk.f32.gmra.mxu1 %vm501_vm1, %v710_v23 }
  0x76   : > { %2535 = vmatmul.msk.f32.gmra.mxu0 %vm501_vm1, %v711_v24 }
  0x77   : > { %2543 = vmatmul.msk.f32.gmra.mxu1 %vm501_vm1, %v711_v24 }
  0x7e   : > { %2536 = vmatmul.msk.f32.gmra.mxu0 %vm501_vm1, %v712_v25 }
  0x7f   : > { %2544 = vmatmul.msk.f32.gmra.mxu1 %vm501_vm1, %v712_v25 }
  0x86   : > { %2537 = vmatmul.msk.f32.gmra.mxu0 %vm501_vm1, %v713_v26 }
  0x87   : > { %2545 = vmatmul.msk.f32.gmra.mxu1 %vm501_vm1, %v713_v26 }
  0x8e   : > { %2538 = vmatmul.msk.f32.gmra.mxu0 %vm501_vm1, %v714_v27 }
  0x8f   : > { %2546 = vmatmul.msk.f32.gmra.mxu1 %vm501_vm1, %v714_v27 }
  0x96   : > { %2539 = vmatmul.msk.f32.gmra.mxu0 %vm501_vm1, %v715_v28 }
  0x97   : > { %2547 = vmatmul.msk.f32.gmra.mxu1 %vm501_vm1, %v715_v28 }
  0xab   : > { %v547_v29 = vpop.f32.mrf.mxu0 }
  0xac   : > { %v3396_v30 = vpop.f32.mrf.mxu1 }
  0xb2   : > { %v650_v39 = vpop.f32.mrf.mxu2 }
  0xb3   : > { %v550_v31 = vpop.f32.mrf.mxu0  ;;  %v651_v23 = vadd.f32 %v650_v39, %v547_v29 }
  0xb4   : > { %v3398_v32 = vpop.f32.mrf.mxu1 }
  0xba   : > { %v653_v43 = vpop.f32.mrf.mxu2 }
  0xbb   : > { %v553_v33 = vpop.f32.mrf.mxu0  ;;  %v654_v18 = vadd.f32 %v653_v43, %v550_v31 }
  0xbc   : > { %v3400_v34 = vpop.f32.mrf.mxu1 }
  0xbd   : > { %v3406_v45 = vpop.f32.mrf.mxu3 }
  0xc2   : > { %v656_v48 = vpop.f32.mrf.mxu2 }
  0xc3   : > { %v556_v35 = vpop.f32.mrf.mxu0  ;;  %v657_v14 = vadd.f32 %v656_v48, %v553_v33  ;;  %v861_v48 = vperm.slane %v858_v4, 1 }
  0xc4   : > { %v3402_v36 = vpop.f32.mrf.mxu1 }
  0xc6   : > { %v3410_v49 = vpop.f32.mrf.mxu3 }
  0xca   : > { %v659_v52 = vpop.f32.mrf.mxu2 }
  0xcb   : > { %v559_v37 = vpop.f32.mrf.mxu0  ;;  %v660_v10 = vadd.f32 %v659_v52, %v556_v35 }
  0xcc   : > { %v3404_v38 = vpop.f32.mrf.mxu1 }
  0xce   : > { %v3414_v53 = vpop.f32.mrf.mxu3 }
  0xd2   : > { %v662_v56 = vpop.f32.mrf.mxu2 }
  0xd3   : > { %v562_v40 = vpop.f32.mrf.mxu0  ;;  %v663_v6 = vadd.f32 %v662_v56, %v559_v37 }
  0xd4   : > { %v600_v41 = vpop.f32.mrf.mxu1 }
  0xd6   : > { %v697_v57 = vpop.f32.mrf.mxu3 }
  0xda   : > { %v665_v61 = vpop.f32.mrf.mxu2 }
  0xdb   : > { %v565_v42 = vpop.f32.mrf.mxu0  ;;  %v666_v3 = vadd.f32 %v665_v61, %v562_v40 }
  0xdc   : > { %v603_v44 = vpop.f32.mrf.mxu1 }
  0xde   : > { %v700_v62 = vpop.f32.mrf.mxu3 }
  0xdf   : > { %v701_v39 = vadd.f32 %v700_v62, %v3404_v38  ;;  %v892_v38 = vld [vmem:[%s4587_s3] sm:$0xff] }
  0xe2   : > { %v668_v1 = vpop.f32.mrf.mxu2 }
  0xe3   : > { %v785_v46 = vpop.f32.mrf.mxu0  ;;  %v669_v7 = vadd.f32 %v668_v1, %v565_v42 }
  0xe4   : > { %v3408_v47 = vpop.f32.mrf.mxu1  ;;  %v844_v28 = vadd.f32 %v785_v46, %v651_v23  ;;  %v698_v46 = vadd.f32 %v697_v57, %v3402_v36  ;;  %v894_v36 = vld [vmem:[%s4587_s3 + $0x10] sm:$0xff]  ;;  %v692_v57 = vadd.f32 %v3410_v49, %v3398_v32 }
  0xe5   : > { %v2581_v23 = vld [vmem:[%s4588_s4 + $0xf0] sm:$0xff] }
  0xe6   : > { %v703_v2 = vpop.f32.mrf.mxu3  ;;  %v864_v29 = vadd.f32 %v860_v11, %v844_v28  ;;  %v1056_v28 = vld [vmem:[%s4588_s4 + $0x30] sm:$0xff] }
  0xe7   : > { %v704_v42 = vadd.f32 %v703_v2, %v600_v41  ;;  %v695_v41 = vadd.f32 %v3414_v53, %v3400_v34 }
  0xe8   : > { %v878_v61 = vmax.f32 %v864_v29, 0.0  ;;  %v2574_v29 = vld [vmem:[%s4588_s4 + $0xb8] sm:$0xff] }
  0xeb   : > { %v788_v50 = vpop.f32.mrf.mxu0 }
  0xec   : > { %v3412_v51 = vpop.f32.mrf.mxu1  ;;  %v846_v24 = vadd.f32 %v788_v50, %v654_v18  ;;  %v1061_v18 = vld [vmem:[%s4588_s4 + $0x58] sm:$0xff] }
  0xee   : > { %v706_v22 = vpop.f32.mrf.mxu3  ;;  %v866_v33 = vadd.f32 %v860_v11, %v846_v24  ;;  %v1058_v24 = vld [vmem:[%s4588_s4 + $0x40] sm:$0xff] }
  0xef   : > { %v707_v37 = vadd.f32 %v706_v22, %v603_v44  ;;  %v1059_v22 = vld [vmem:[%s4588_s4 + $0x48] sm:$0xff] }
  0xf0   : > { %v880_v44 = vmax.f32 %v866_v33, 0.0  ;;  %v1054_v33 = vld [vmem:[%s4588_s4 + $0x20] sm:$0xff] }
  0xf3   : > { %v791_v54 = vpop.f32.mrf.mxu0 }
  0xf4   : > { %v3416_v55 = vpop.f32.mrf.mxu1  ;;  %v848_v19 = vadd.f32 %v791_v54, %v657_v14  ;;  %v1063_v14 = vld [vmem:[%s4588_s4 + $0x68] sm:$0xff] }
  0xf5   : > { %v849_v62 = vadd.f32 %v3416_v55, %v695_v41 }
  0xf6   : > { %v868_v35 = vadd.f32 %v860_v11, %v848_v19  ;;  %v2583_v19 = vld [vmem:[%s4588_s4 + $0x100] sm:$0xff] }
  0xf7   : > { %v869_v49 = vadd.f32 %v861_v48, %v849_v62 }
  0xf8   : > { %v882_v50 = vmax.f32 %v868_v35, 0.0  ;;  %v2578_v35 = vld [vmem:[%s4588_s4 + $0xd8] sm:$0xff] }
  0xf9   : > { %v883_v4 = vmax.f32 %v869_v49, 0.0 }
  0xfb   : > { %v794_v58 = vpop.f32.mrf.mxu0 }
  0xfc   : > { %v832_v59 = vpop.f32.mrf.mxu1  ;;  %v850_v15 = vadd.f32 %v794_v58, %v660_v10  ;;  %v1065_v10 = vld [vmem:[%s4588_s4 + $0x78] sm:$0xff] }
  0xfd   : > { %v851_v58 = vadd.f32 %v832_v59, %v698_v46  ;;  %v689_v59 = vadd.f32 %v3406_v45, %v3396_v30  ;;  %v893_v30 = vld [vmem:[%s4587_s3 + $0x8] sm:$0xff]  ;;  %v895_v45 = vld [vmem:[%s4587_s3 + $0x18] sm:$0xf]  ;;  %1084 = vmatpush.msra.mxu0 %v1065_v10 }
  0xfe   : > { %v870_v25 = vadd.f32 %v860_v11, %v850_v15  ;;  %v2585_v15 = vld [vmem:[%s4588_s4 + $0x110] sm:$0xff]  ;;  %v2572_v46 = vld [vmem:[%s4588_s4 + $0xa8] sm:$0xff] }
  0xff   : > { %v845_v32 = vadd.f32 %v3408_v47, %v689_v59  ;;  %v1067_v59 = vld [vmem:[%s4588_s4 + $0x88] sm:$0xff] }
 0x100   : > { %v884_v31 = vmax.f32 %v870_v25, 0.0  ;;  %v2580_v25 = vld [vmem:[%s4588_s4 + $0xe8] sm:$0xff] }
 0x103   : > { %v797_v60 = vpop.f32.mrf.mxu0 }
 0x104   : > { %v835_v63 = vpop.f32.mrf.mxu1  ;;  %v852_v12 = vadd.f32 %v797_v60, %v663_v6  ;;  %v2556_v6 = vld [vmem:[%s4587_s3 + $0x20] sm:$0xff] }
 0x105   : > { %v853_v54 = vadd.f32 %v835_v63, %v701_v39  ;;  %v847_v63 = vadd.f32 %v3412_v51, %v692_v57  ;;  %v865_v51 = vadd.f32 %v861_v48, %v845_v32  ;;  %v1051_v39 = vld [vmem:[%s4588_s4 + $0x8] sm:$0xff]  ;;  %v2590_v57 = vld [vmem:[%s4588_s4 + $0x138] sm:$0xff] }
 0x106   : > { %v872_v20 = vadd.f32 %v860_v11, %v852_v12  ;;  %v1064_v12 = vld [vmem:[%s4588_s4 + $0x70] sm:$0xff] }
 0x107   : > { %v873_v34 = vadd.f32 %v861_v48, %v853_v54  ;;  %v867_v2 = vadd.f32 %v861_v48, %v847_v63  ;;  %1085 = vmatpush.msra.mxu0 %v1064_v12  ;;  %v2589_v63 = vld [vmem:[%s4588_s4 + $0x130] sm:$0xff]  ;;  %v1256_v12 = vld [vmem:[%s4589_s5 + $0xa0] sm:$0xf] }
 0x108   : > { %v886_v40 = vmax.f32 %v872_v20, 0.0  ;;  %v1060_v20 = vld [vmem:[%s4588_s4 + $0x50] sm:$0xff] }
 0x109   : > { %v887_v55 = vmax.f32 %v873_v34, 0.0  ;;  %v881_v47 = vmax.f32 %v867_v2, 0.0  ;;  %1086 = vmatpush.msra.mxu0 %v1063_v14  ;;  %v1254_v14 = vld [vmem:[%s4589_s5 + $0x90] sm:$0xff] }
 0x10b   : > { %v800_v0 = vpop.f32.mrf.mxu0 }
 0x10c   : > { %v838_v5 = vpop.f32.mrf.mxu1  ;;  %v854_v8 = vadd.f32 %v800_v0, %v666_v3  ;;  %v871_v0 = vadd.f32 %v861_v48, %v851_v58  ;;  %v1070_v58 = vld [vmem:[%s4588_s4 + $0xa0] sm:$0xff] }
 0x10d   : > { %v855_v52 = vadd.f32 %v838_v5, %v704_v42  ;;  %v879_v5 = vmax.f32 %v865_v51, 0.0  ;;  %v2576_v42 = vld [vmem:[%s4588_s4 + $0xc8] sm:$0xff]  ;;  %1124 = vmatpush.msra.mxu1 %v1070_v58  ;;  %v1236_v58 = vld [vmem:[%s4589_s5] sm:$0xff] }
 0x10e   : > { %v874_v16 = vadd.f32 %v860_v11, %v854_v8  ;;  %v885_v3 = vmax.f32 %v871_v0, 0.0  ;;  %v2558_v8 = vld [vmem:[%s4587_s3 + $0x30] sm:$0xff]  ;;  %v1066_v0 = vld [vmem:[%s4588_s4 + $0x80] sm:$0xff] }
 0x10f   : > { %v875_v60 = vadd.f32 %v861_v48, %v855_v52  ;;  %v1050_v52 = vld [vmem:[%s4588_s4] sm:$0xff] }
 0x110   : > { %v888_v26 = vmax.f32 %v874_v16, 0.0  ;;  %v1062_v16 = vld [vmem:[%s4588_s4 + $0x60] sm:$0xff] }
 0x111   : > { %v889_v1 = vmax.f32 %v875_v60, 0.0  ;;  %1087 = vmatpush.msra.mxu0 %v1062_v16  ;;  %v2592_v60 = vld [vmem:[%s4588_s4 + $0x148] sm:$0xff]  ;;  %v1252_v16 = vld [vmem:[%s4589_s5 + $0x80] sm:$0xff] }
 0x113   : > { %v803_v9 = vpop.f32.mrf.mxu0  ;;  %1088 = vmatpush.msra.mxu0 %v1061_v18  ;;  %v1250_v18 = vld [vmem:[%s4589_s5 + $0x70] sm:$0xff] }
 0x114   : > { %v856_v13 = vadd.f32 %v803_v9, %v669_v7  ;;  %v841_v27 = vpop.f32.mrf.mxu1  ;;  %v2557_v7 = vld [vmem:[%s4587_s3 + $0x28] sm:$0xff]  ;;  %v2559_v9 = vld [vmem:[%s4587_s3 + $0x38] sm:$0xf] }
 0x115   : > { %v857_v43 = vadd.f32 %v841_v27, %v707_v37  ;;  %1089 = vmatpush.msra.mxu0 %v1060_v20  ;;  %v2579_v27 = vld [vmem:[%s4588_s4 + $0xe0] sm:$0xff]  ;;  %v1055_v37 = vld [vmem:[%s4588_s4 + $0x28] sm:$0xff]  ;;  %v2617_v20 = vld [vmem:[%s4589_s5 + $0x150] sm:$0xf] }
 0x116   : > { %v876_v17 = vadd.f32 %v860_v11, %v856_v13  ;;  %v2587_v11 = vld [vmem:[%s4588_s4 + $0x120] sm:$0xff]  ;;  %v2586_v13 = vld [vmem:[%s4588_s4 + $0x118] sm:$0xff] }
 0x117   : > { %v877_v56 = vadd.f32 %v861_v48, %v857_v43  ;;  %1090 = vmatpush.msra.mxu0 %v1059_v22  ;;  %v2575_v43 = vld [vmem:[%s4588_s4 + $0xc0] sm:$0xff]  ;;  %v1052_v48 = vld [vmem:[%s4588_s4 + $0x10] sm:$0xff] }
 0x118   : > { %v890_v21 = vmax.f32 %v876_v17, 0.0  ;;  %v2584_v17 = vld [vmem:[%s4588_s4 + $0x108] sm:$0xff]  ;;  %v1248_v22 = vld [vmem:[%s4589_s5 + $0x60] sm:$0xff] }
 0x119   : > { %v891_v53 = vmax.f32 %v877_v56, 0.0  ;;  %1091 = vmatpush.msra.mxu0 %v1058_v24  ;;  %v2615_v24 = vld [vmem:[%s4589_s5 + $0x140] sm:$0xff] }
 0x11a   : > { %918 = vmatpush.msrb.mxu2 %v890_v21  ;;  %2873 = vmatpush.msrb.mxu3 %v890_v21 }
 0x11c   : > { %919 = vmatpush.msrb.mxu2 %v888_v26  ;;  %2874 = vmatpush.msrb.mxu3 %v888_v26 }
 0x11e   : > { %920 = vmatpush.msrb.mxu2 %v886_v40  ;;  %2875 = vmatpush.msrb.mxu3 %v886_v40 }
 0x120   : > { %921 = vmatpush.msrb.mxu2 %v884_v31  ;;  %2876 = vmatpush.msrb.mxu3 %v884_v31 }
 0x122   : > { %922 = vmatpush.msrb.mxu2 %v882_v50  ;;  %2877 = vmatpush.msrb.mxu3 %v882_v50 }
 0x124   : > { %923 = vmatpush.msrb.mxu2 %v880_v44  ;;  %2878 = vmatpush.msrb.mxu3 %v880_v44 }
 0x126   : > { %924 = vmatpush.msrb.mxu2 %v878_v61  ;;  %2879 = vmatpush.msrb.mxu3 %v878_v61 }
 0x127   : > { %2548 = vmatmul.msk.f32.vlgmr.msrb.gmra.mxu2 %vm896_vm2, %v892_v38  ;;  %2550 = vmatmul.msk.f32.vlgmr.msrb.gmra.mxu3 %vm896_vm2, %v894_v36 }
 0x128   : > { %947 = vmatpush.msra.mxu3 %v891_v53  ;;  %993 = vmatpush.msra.mxu2 %v890_v21  ;;  %v2582_v21 = vld [vmem:[%s4588_s4 + $0xf8] sm:$0xff] }
 0x12a   : > { %948 = vmatpush.msra.mxu3 %v889_v1  ;;  %994 = vmatpush.msra.mxu2 %v888_v26  ;;  %v1057_v26 = vld [vmem:[%s4588_s4 + $0x38] sm:$0xff] }
 0x12b   : > { %1092 = vmatpush.msra.mxu0 %v1057_v26  ;;  %v1246_v26 = vld [vmem:[%s4589_s5 + $0x50] sm:$0xff] }
 0x12c   : > { %949 = vmatpush.msra.mxu3 %v887_v55  ;;  %995 = vmatpush.msra.mxu2 %v886_v40  ;;  %v2577_v40 = vld [vmem:[%s4588_s4 + $0xd0] sm:$0xff] }
 0x12d   : > { %1093 = vmatpush.msra.mxu0 %v1056_v28  ;;  %v2613_v28 = vld [vmem:[%s4589_s5 + $0x130] sm:$0xff] }
 0x12e   : > { %950 = vmatpush.msra.mxu3 %v885_v3  ;;  %996 = vmatpush.msra.mxu2 %v884_v31  ;;  %v1053_v31 = vld [vmem:[%s4588_s4 + $0x18] sm:$0xff] }
 0x12f   : > { %2549 = vmatmul.msk.f32.gmra.mxu2 %vm896_vm2, %v893_v30  ;;  %2551 = vmatmul.msk.f32.gmra.mxu3 %vm896_vm2, %v895_v45 }
 0x130   : > { %951 = vmatpush.msra.mxu3 %v883_v4  ;;  %997 = vmatpush.msra.mxu2 %v882_v50  ;;  %v2573_v50 = vld [vmem:[%s4588_s4 + $0xb0] sm:$0xff] }
 0x131   : > { %1094 = vmatpush.msra.mxu0 %v1055_v37  ;;  %v1244_v37 = vld [vmem:[%s4589_s5 + $0x40] sm:$0xff] }
 0x132   : > { %952 = vmatpush.msra.mxu3 %v881_v47  ;;  %998 = vmatpush.msra.mxu2 %v880_v44 }
 0x133   : > { %1095 = vmatpush.msra.mxu0 %v1054_v33  ;;  %v2611_v33 = vld [vmem:[%s4589_s5 + $0x120] sm:$0xff] }
 0x134   : > { %953 = vmatpush.msra.mxu3 %v879_v5  ;;  %999 = vmatpush.msra.mxu2 %v878_v61  ;;  %v1069_v61 = vld [vmem:[%s4588_s4 + $0x98] sm:$0xff] }
 0x135   : > { %1096 = vmatpush.msra.mxu0 %v1053_v31  ;;  %1125 = vmatpush.msra.mxu1 %v1069_v61  ;;  %v1242_v31 = vld [vmem:[%s4589_s5 + $0x30] sm:$0xff]  ;;  %v2603_v61 = vld [vmem:[%s4589_s5 + $0xe0] sm:$0xff] }
 0x136   : > { %1022 = vmatpush.msrb.mxu3 %v891_v53  ;;  %1164 = vmatpush.msrb.mxu2 %v2587_v11 }
 0x137   : > { %2560 = vmatmul.msk.f32.vlgmr.msra.gmra.mxu2 %vm896_vm2, %v2556_v6  ;;  %2552 = vmatmul.msk.f32.vlgmr.msra.gmra.mxu3 %vm896_vm2, %v892_v38  ;;  %v2591_v38 = vld [vmem:[%s4588_s4 + $0x140] sm:$0xff] }
 0x138   : > { %1023 = vmatpush.msrb.mxu3 %v889_v1  ;;  %1165 = vmatpush.msrb.mxu2 %v2586_v13  ;;  %v2588_v1 = vld [vmem:[%s4588_s4 + $0x128] sm:$0xff] }
 0x139   : > { %1097 = vmatpush.msra.mxu0 %v1052_v48  ;;  %v1257_v13 = vld [vmem:[%s4589_s5 + $0xa8] sm:$0xf]  ;;  %v2609_v48 = vld [vmem:[%s4589_s5 + $0x110] sm:$0xff] }
 0x13a   : > { %1024 = vmatpush.msrb.mxu3 %v887_v55  ;;  %1166 = vmatpush.msrb.mxu2 %v2585_v15  ;;  %v1255_v15 = vld [vmem:[%s4589_s5 + $0x98] sm:$0xff] }
 0x13b   : > { %1098 = vmatpush.msra.mxu0 %v1051_v39  ;;  %v1240_v39 = vld [vmem:[%s4589_s5 + $0x20] sm:$0xff] }
 0x13c   : > { %1025 = vmatpush.msrb.mxu3 %v885_v3  ;;  %1167 = vmatpush.msrb.mxu2 %v2584_v17  ;;  %v1253_v17 = vld [vmem:[%s4589_s5 + $0x88] sm:$0xff] }
 0x13d   : > { %1099 = vmatpush.msra.mxu0 %v1050_v52  ;;  %v2607_v52 = vld [vmem:[%s4589_s5 + $0x100] sm:$0xff] }
 0x13e   : > { %1026 = vmatpush.msrb.mxu3 %v883_v4  ;;  %1168 = vmatpush.msrb.mxu2 %v2583_v19  ;;  %v1251_v19 = vld [vmem:[%s4589_s5 + $0x78] sm:$0xff] }
 0x13f   : > { %2561 = vmatmul.msk.f32.gmra.mxu2 %vm896_vm2, %v2557_v7  ;;  %2553 = vmatmul.msk.f32.gmra.mxu3 %vm896_vm2, %v893_v30 }
 0x140   : > { %1027 = vmatpush.msrb.mxu3 %v881_v47  ;;  %1169 = vmatpush.msrb.mxu2 %v2582_v21  ;;  %v2618_v21 = vld [vmem:[%s4589_s5 + $0x158] sm:$0xf] }
 0x141   : > { %2619 = vmatpush.msk.msrb.mxu0 %vm1297_vm4, %v2617_v20 }
 0x142   : > { %1028 = vmatpush.msrb.mxu3 %v879_v5  ;;  %1170 = vmatpush.msrb.mxu2 %v2581_v23  ;;  %v1249_v23 = vld [vmem:[%s4589_s5 + $0x68] sm:$0xff] }
 0x143   : > { %1310 = vmatpush.msrb.mxu0 %v2615_v24  ;;  %v2646_v24 = vld [vmem:[%s4589_s5 + $0x198] sm:$0xff] }
 0x144   : > { %1171 = vmatpush.msrb.mxu2 %v2580_v25  ;;  %1204 = vmatpush.msra.mxu3 %v2592_v60  ;;  %v2616_v25 = vld [vmem:[%s4589_s5 + $0x148] sm:$0xff] }
 0x145   : > { %1311 = vmatpush.msrb.mxu0 %v2613_v28  ;;  %v1237_v60 = vld [vmem:[%s4589_s5 + $0x8] sm:$0xff] }
 0x146   : > { %1172 = vmatpush.msrb.mxu2 %v2579_v27  ;;  %1205 = vmatpush.msra.mxu3 %v2591_v38  ;;  %v1247_v27 = vld [vmem:[%s4589_s5 + $0x58] sm:$0xff]  ;;  %v2604_v38 = vld [vmem:[%s4589_s5 + $0xe8] sm:$0xff] }
 0x147   : > { %2562 = vmatmul.msk.f32.gmra.mxu2 %vm896_vm2, %v2558_v8  ;;  %2554 = vmatmul.msk.f32.gmra.mxu3 %vm896_vm2, %v894_v36  ;;  %v1068_v36 = vld [vmem:[%s4588_s4 + $0x90] sm:$0xff] }
 0x148   : > { %1173 = vmatpush.msrb.mxu2 %v2578_v35  ;;  %1126 = vmatpush.msra.mxu1 %v1068_v36  ;;  %v2614_v35 = vld [vmem:[%s4589_s5 + $0x138] sm:$0xff]  ;;  %v2601_v36 = vld [vmem:[%s4589_s5 + $0xd0] sm:$0xff] }
 0x149   : > { %1206 = vmatpush.msra.mxu3 %v2590_v57  ;;  %1312 = vmatpush.msrb.mxu0 %v2611_v33  ;;  %v2602_v57 = vld [vmem:[%s4589_s5 + $0xd8] sm:$0xff] }
 0x14a   : > { %1174 = vmatpush.msrb.mxu2 %v2577_v40  ;;  %1127 = vmatpush.msra.mxu1 %v1067_v59  ;;  %v1245_v40 = vld [vmem:[%s4589_s5 + $0x48] sm:$0xff]  ;;  %v2598_v59 = vld [vmem:[%s4589_s5 + $0xb8] sm:$0xff] }
 0x14b   : > { %1207 = vmatpush.msra.mxu3 %v2589_v63  ;;  %1313 = vmatpush.msrb.mxu0 %v2609_v48  ;;  %v2642_v33 = vld [vmem:[%s4589_s5 + $0x178] sm:$0xff] }
 0x14c   : > { %1175 = vmatpush.msrb.mxu2 %v2576_v42  ;;  %1128 = vmatpush.msra.mxu1 %v1066_v0  ;;  %v2612_v42 = vld [vmem:[%s4589_s5 + $0x128] sm:$0xff] }
 0x14d   : > { %1208 = vmatpush.msra.mxu3 %v2588_v1  ;;  %1314 = vmatpush.msrb.mxu0 %v2607_v52 }
 0x14e   : > { %1176 = vmatpush.msrb.mxu2 %v2575_v43  ;;  %2624 = vmatpush.msk.msrb.mxu1 %vm1297_vm4, %v2618_v21  ;;  %v1243_v43 = vld [vmem:[%s4589_s5 + $0x38] sm:$0xff] }
 0x14f   : > { %2563 = vmatmul.msk.f32.gmra.mxu2 %vm896_vm2, %v2559_v9  ;;  %2555 = vmatmul.msk.f32.gmra.mxu3 %vm896_vm2, %v895_v45 }
 0x150   : > { %1177 = vmatpush.msrb.mxu2 %v2574_v29  ;;  %1339 = vmatpush.msrb.mxu1 %v2616_v25  ;;  %v2610_v29 = vld [vmem:[%s4589_s5 + $0x118] sm:$0xff] }
 0x152   : > { %1178 = vmatpush.msrb.mxu2 %v2573_v50  ;;  %1340 = vmatpush.msrb.mxu1 %v2614_v35  ;;  %v1241_v50 = vld [vmem:[%s4589_s5 + $0x28] sm:$0xff] }
 0x154   : > { %1179 = vmatpush.msrb.mxu2 %v2572_v46  ;;  %1341 = vmatpush.msrb.mxu1 %v2612_v42  ;;  %v2608_v46 = vld [vmem:[%s4589_s5 + $0x108] sm:$0xff] }
 0x156   : > { %2629 = vmatpush.msk.msra.mxu2 %vm1297_vm4, %v1256_v12  ;;  %1342 = vmatpush.msrb.mxu1 %v2610_v29  ;;  %v2640_v29 = vld [vmem:[%s4589_s5 + $0x168] sm:$0xff] }
 0x157   : > { %2564 = vmatmul.msk.f32.vlgmr.msrb.gmra.mxu3 %vm896_vm2, %v2556_v6 }
 0x158   : > { %2634 = vmatpush.msk.msrb.mxu3 %vm1297_vm4, %v1257_v13  ;;  %1386 = vmatpush.msra.mxu2 %v1254_v14  ;;  %v2649_v13 = vld [vmem:[%s4589_s5 + $0x1b0] sm:$0xff]  ;;  %v2650_v14 = vld [vmem:[%s4589_s5 + $0x1b8] sm:$0xff] }
 0x159   : > { %1343 = vmatpush.msrb.mxu1 %v2608_v46 }
 0x15a   : > { %1415 = vmatpush.msrb.mxu3 %v1255_v15  ;;  %1387 = vmatpush.msra.mxu2 %v1252_v16 }
 0x15c   : > { %1416 = vmatpush.msrb.mxu3 %v1253_v17  ;;  %1388 = vmatpush.msra.mxu2 %v1250_v18  ;;  %v2647_v18 = vld [vmem:[%s4589_s5 + $0x1a0] sm:$0xff] }
 0x15e   : > { %1417 = vmatpush.msrb.mxu3 %v1251_v19  ;;  %1389 = vmatpush.msra.mxu2 %v1248_v22  ;;  %v2648_v19 = vld [vmem:[%s4589_s5 + $0x1a8] sm:$0xff] }
 0x15f   : > { %2565 = vmatmul.msk.f32.gmra.mxu3 %vm896_vm2, %v2557_v7 }
 0x160   : > { %1418 = vmatpush.msrb.mxu3 %v1249_v23  ;;  %1390 = vmatpush.msra.mxu2 %v1246_v26  ;;  %v2645_v23 = vld [vmem:[%s4589_s5 + $0x190] sm:$0xff]  ;;  %v2643_v26 = vld [vmem:[%s4589_s5 + $0x180] sm:$0xff] }
 0x162   : > { %1419 = vmatpush.msrb.mxu3 %v1247_v27  ;;  %1391 = vmatpush.msra.mxu2 %v1244_v37  ;;  %v2644_v27 = vld [vmem:[%s4589_s5 + $0x188] sm:$0xff] }
 0x164   : > { %1420 = vmatpush.msrb.mxu3 %v1245_v40  ;;  %1392 = vmatpush.msra.mxu2 %v1242_v31  ;;  %v2641_v40 = vld [vmem:[%s4589_s5 + $0x170] sm:$0xff]  ;;  %v2639_v31 = vld [vmem:[%s4589_s5 + $0x160] sm:$0xff] }
 0x166   : > { %1421 = vmatpush.msrb.mxu3 %v1243_v43  ;;  %1393 = vmatpush.msra.mxu2 %v1240_v39 }
 0x167   : > { %2566 = vmatmul.msk.f32.gmra.mxu3 %vm896_vm2, %v2558_v8 }
 0x168   : > { %1422 = vmatpush.msrb.mxu3 %v1241_v50 }
 0x16f   : > { %2567 = vmatmul.msk.f32.gmra.mxu3 %vm896_vm2, %v2559_v9 }
 0x1aa   : > { %v926_v44 = vpop.f32.mrf.mxu2  ;;  %v932_v54 = vpop.f32.mrf.mxu3 }
 0x1b2   : > { %v929_v56 = vpop.f32.mrf.mxu2  ;;  %v935_v41 = vpop.f32.mrf.mxu3 }
 0x1ba   : > { %v1001_v62 = vpop.f32.mrf.mxu2  ;;  %v955_v34 = vpop.f32.mrf.mxu3 }
 0x1bb   : > { %v1042_v53 = vmax.f32 %v926_v44, %v1001_v62  ;;  %v1238_v44 = vld [vmem:[%s4589_s5 + $0x10] sm:$0xff]  ;;  %v2599_v62 = vld [vmem:[%s4589_s5 + $0xc0] sm:$0xff] }
 0x1bc   : > { %1394 = vmatpush.msra.mxu2 %v1238_v44 }
 0x1bd   : > { %1100 = vmatmul.f32.vlgmr.msra.gmra.mxu0 %v1042_v53  ;;  %1180 = vmatmul.f32.vlgmr.msrb.gmra.mxu2 %v1042_v53  ;;  %v2597_v53 = vld [vmem:[%s4589_s5 + $0xb0] sm:$0xff] }
 0x1be   : > { %1395 = vmatpush.msra.mxu2 %v1236_v58 }
 0x1c2   : > { %v1004_v32 = vpop.f32.mrf.mxu2  ;;  %v958_v49 = vpop.f32.mrf.mxu3 }
 0x1c3   : > { %v1044_v55 = vmax.f32 %v929_v56, %v1004_v32  ;;  %v2605_v56 = vld [vmem:[%s4589_s5 + $0xf0] sm:$0xff]  ;;  %v2659_v32 = vld [vmem:[%s4589_s5 + $0x200] sm:$0xf] }
 0x1c4   : > { %1315 = vmatpush.msrb.mxu0 %v2605_v56 }
 0x1c5   : > { %1103 = vmatmul.f32.gmra.mxu0 %v1044_v55  ;;  %1183 = vmatmul.f32.gmra.mxu2 %v1044_v55  ;;  %v2657_v55 = vld [vmem:[%s4589_s5 + $0x1f0] sm:$0xff] }
 0x1c6   : > { %1316 = vmatpush.msrb.mxu0 %v2603_v61 }
 0x1c8   : > { %1317 = vmatpush.msrb.mxu0 %v2601_v36 }
 0x1ca   : > { %v1007_v2 = vpop.f32.mrf.mxu2  ;;  %v961_v3 = vpop.f32.mrf.mxu3  ;;  %1318 = vmatpush.msrb.mxu0 %v2599_v62 }
 0x1cb   : > { %v1046_v30 = vmax.f32 %v932_v54, %v1007_v2  ;;  %v1239_v54 = vld [vmem:[%s4589_s5 + $0x18] sm:$0xff] }
 0x1cc   : > { %1423 = vmatpush.msrb.mxu3 %v1239_v54  ;;  %1319 = vmatpush.msrb.mxu0 %v2597_v53  ;;  %v2658_v2 = vld [vmem:[%s4589_s5 + $0x1f8] sm:$0xff] }
 0x1cd   : > { %1106 = vmatmul.f32.gmra.mxu0 %v1046_v30  ;;  %1186 = vmatmul.f32.gmra.mxu2 %v1046_v30  ;;  %v2655_v30 = vld [vmem:[%s4589_s5 + $0x1e0] sm:$0xff] }
 0x1ce   : > { %1424 = vmatpush.msrb.mxu3 %v1237_v60  ;;  %2661 = vmatpush.msk.msra.mxu0 %vm1297_vm4, %v2659_v32 }
 0x1d0   : > { %1489 = vmatpush.msra.mxu0 %v2657_v55 }
 0x1d2   : > { %v1010_v45 = vpop.f32.mrf.mxu2  ;;  %v964_v51 = vpop.f32.mrf.mxu3  ;;  %1490 = vmatpush.msra.mxu0 %v2655_v30 }
 0x1d3   : > { %v1048_v4 = vmax.f32 %v935_v41, %v1010_v45  ;;  %v2606_v41 = vld [vmem:[%s4589_s5 + $0xf8] sm:$0xff]  ;;  %v2656_v45 = vld [vmem:[%s4589_s5 + $0x1e8] sm:$0xff] }
 0x1d4   : > { %1344 = vmatpush.msrb.mxu1 %v2606_v41 }
 0x1d5   : > { %1109 = vmatmul.f32.gmra.mxu0 %v1048_v4  ;;  %1189 = vmatmul.f32.gmra.mxu2 %v1048_v4 }
 0x1d6   : > { %1345 = vmatpush.msrb.mxu1 %v2604_v38 }
 0x1d8   : > { %1346 = vmatpush.msrb.mxu1 %v2602_v57 }
 0x1da   : > { %v1030_v47 = vpop.f32.mrf.mxu3 }
 0x1db   : > { %v1043_v5 = vmax.f32 %v955_v34, %v1030_v47  ;;  %v2600_v34 = vld [vmem:[%s4589_s5 + $0xc8] sm:$0xff] }
 0x1dc   : > { %1347 = vmatpush.msrb.mxu1 %v2600_v34 }
 0x1dd   : > { %2568 = vmatmul.msk.f32.vlgmr.msra.gmra.mxu1 %vm1071_vm3, %v1043_v5  ;;  %2593 = vmatmul.msk.f32.vlgmr.msra.gmra.mxu3 %vm1071_vm3, %v1043_v5 }
 0x1de   : > { %1348 = vmatpush.msrb.mxu1 %v2598_v59 }
 0x1e2   : > { %v1033_v6 = vpop.f32.mrf.mxu3 }
 0x1e3   : > { %v1045_v7 = vmax.f32 %v958_v49, %v1033_v6  ;;  %v2660_v49 = vld [vmem:[%s4589_s5 + $0x208] sm:$0xf] }
 0x1e4   : > { %2666 = vmatpush.msk.msra.mxu1 %vm1297_vm4, %v2660_v49 }
 0x1e5   : > { %2569 = vmatmul.msk.f32.gmra.mxu1 %vm1071_vm3, %v1045_v7  ;;  %2594 = vmatmul.msk.f32.gmra.mxu3 %vm1071_vm3, %v1045_v7 }
 0x1e6   : > { %1518 = vmatpush.msra.mxu1 %v2658_v2 }
 0x1e8   : > { %1519 = vmatpush.msra.mxu1 %v2656_v45 }
 0x1ea   : > { %v1036_v8 = vpop.f32.mrf.mxu3 }
 0x1eb   : > { %v1047_v9 = vmax.f32 %v961_v3, %v1036_v8  ;;  %v2653_v8 = vld [vmem:[%s4589_s5 + $0x1d0] sm:$0xff] }
 0x1ec   : > { %1491 = vmatpush.msra.mxu0 %v2653_v8 }
 0x1ed   : > { %2570 = vmatmul.msk.f32.gmra.mxu1 %vm1071_vm3, %v1047_v9  ;;  %2595 = vmatmul.msk.f32.gmra.mxu3 %vm1071_vm3, %v1047_v9  ;;  %v2654_v9 = vld [vmem:[%s4589_s5 + $0x1d8] sm:$0xff] }
 0x1ee   : > { %1520 = vmatpush.msra.mxu1 %v2654_v9 }
 0x1f2   : > { %v1039_v10 = vpop.f32.mrf.mxu3 }
 0x1f3   : > { %v1049_v11 = vmax.f32 %v964_v51, %v1039_v10  ;;  %v2651_v10 = vld [vmem:[%s4589_s5 + $0x1c0] sm:$0xff] }
 0x1f4   : > { %1492 = vmatpush.msra.mxu0 %v2651_v10 }
 0x1f5   : > { %2571 = vmatmul.msk.f32.gmra.mxu1 %vm1071_vm3, %v1049_v11  ;;  %2596 = vmatmul.msk.f32.gmra.mxu3 %vm1071_vm3, %v1049_v11  ;;  %v2652_v11 = vld [vmem:[%s4589_s5 + $0x1c8] sm:$0xff] }
 0x1f6   : > { %1521 = vmatpush.msra.mxu1 %v2652_v11  ;;  %1493 = vmatpush.msra.mxu0 %v2649_v13 }
 0x1f8   : > { %1522 = vmatpush.msra.mxu1 %v2650_v14  ;;  %1494 = vmatpush.msra.mxu0 %v2647_v18 }
 0x1fa   : > { %1523 = vmatpush.msra.mxu1 %v2648_v19  ;;  %1495 = vmatpush.msra.mxu0 %v2645_v23 }
 0x1fc   : > { %1524 = vmatpush.msra.mxu1 %v2646_v24  ;;  %1496 = vmatpush.msra.mxu0 %v2643_v26 }
 0x1fe   : > { %1525 = vmatpush.msra.mxu1 %v2644_v27  ;;  %1497 = vmatpush.msra.mxu0 %v2641_v40 }
 0x200   : > { %1526 = vmatpush.msra.mxu1 %v2642_v33  ;;  %1498 = vmatpush.msra.mxu0 %v2639_v31 }
 0x202   : > { %1527 = vmatpush.msra.mxu1 %v2640_v29 }
 0x23a   : > { %v1101_v63 = vpop.f32.mrf.mxu0 }
 0x240   : > { %v1181_v0 = vpop.f32.mrf.mxu2 }
 0x242   : > { %v1104_v5 = vpop.f32.mrf.mxu0 }
 0x248   : > { %v1184_v7 = vpop.f32.mrf.mxu2 }
 0x24a   : > { %v1107_v22 = vpop.f32.mrf.mxu0 }
 0x250   : > { %v1187_v25 = vpop.f32.mrf.mxu2 }
 0x252   : > { %v1110_v50 = vpop.f32.mrf.mxu0 }
 0x258   : > { %v1190_v52 = vpop.f32.mrf.mxu2 }
 0x25a   : > { %v1130_v1 = vpop.f32.mrf.mxu1 }
 0x25b   : > { %v1131_v51 = vadd.f32 %v1130_v1, %v1101_v63 }
 0x260   : > { %v1210_v3 = vpop.f32.mrf.mxu3 }
 0x261   : > { %v1211_v4 = vadd.f32 %v1210_v3, %v1181_v0 }
 0x262   : > { %v1133_v47 = vpop.f32.mrf.mxu1 }
 0x263   : > { %v1222_v6 = vmax.f32 %v1131_v51, %v1211_v4  ;;  %v1134_v15 = vadd.f32 %v1133_v47, %v1104_v5 }
 0x265   : > { %1227 = vst.msk [vmem:[#allocation2] sm:$0xff] %vm1226_vm5, %v1222_v6 }
 0x268   : > { %v1213_v12 = vpop.f32.mrf.mxu3 }
 0x269   : > { %v1214_v16 = vadd.f32 %v1213_v12, %v1184_v7  ;;  %v1549_v12 = vld [vmem:[%s4590_s6] sm:$0x3] }
 0x26a   : > { %v1136_v20 = vpop.f32.mrf.mxu1  ;;  %v1551_v23 = vperm.slane %v1549_v12, 0  ;;  %v1552_v24 = vperm.slane %v1549_v12, 1  ;;  %v2708_v12 = vld [vmem:[%s4592_s8 + $0x168] sm:$0xff] }
 0x26b   : > { %v1223_v17 = vmax.f32 %v1134_v15, %v1214_v16  ;;  %v1137_v35 = vadd.f32 %v1136_v20, %v1107_v22 }
 0x26c   : > { %v1232_v21 = vld [vmem:[#allocation2] sm:$0xff] }
 0x26d   : > { %1228 = vst.msk [vmem:[#allocation2 + $0x8] sm:$0xff] %vm1226_vm5, %v1223_v17  ;;  %2630 = vmatmul.msk.f32.vlgmr.msra.gmra.mxu2 %vm1226_vm5, %v1232_v21  ;;  %2635 = vmatmul.msk.f32.vlgmr.msrb.gmra.mxu3 %vm1226_vm5, %v1232_v21 }
 0x270   : > { %v1216_v28 = vpop.f32.mrf.mxu3 }
 0x271   : > { %v1217_v37 = vadd.f32 %v1216_v28, %v1187_v25 }
 0x272   : > { %v1139_v39 = vpop.f32.mrf.mxu1 }
 0x273   : > { %v1224_v42 = vmax.f32 %v1137_v35, %v1217_v37  ;;  %v1140_v44 = vadd.f32 %v1139_v39, %v1110_v50 }
 0x274   : > { %v1258_v43 = vld [vmem:[#allocation2 + $0x1] sm:$0xff] }
 0x275   : > { %v1233_v48 = vld [vmem:[#allocation2 + $0x8] sm:$0xff]  ;;  %1229 = vst.msk [vmem:[#allocation2 + $0x10] sm:$0xff] %vm1226_vm5, %v1224_v42  ;;  %2620 = vmatmul.msk.f32.vlgmr.msrb.gmra.mxu0 %vm1226_vm5, %v1258_v43  ;;  %2625 = vmatmul.msk.f32.vlgmr.msrb.gmra.mxu1 %vm1226_vm5, %v1258_v43 }
 0x276   : > { %2631 = vmatmul.msk.f32.gmra.mxu2 %vm1226_vm5, %v1233_v48  ;;  %2636 = vmatmul.msk.f32.gmra.mxu3 %vm1226_vm5, %v1233_v48  ;;  %v1438_v36 = vld [vmem:[#allocation2 + $0x2] sm:$0xff] }
 0x278   : > { %v1219_v46 = vpop.f32.mrf.mxu3 }
 0x279   : > { %v1220_v54 = vadd.f32 %v1219_v46, %v1190_v52 }
 0x27b   : > { %v1225_v56 = vmax.f32 %v1140_v44, %v1220_v54 }
 0x27c   : > { %v1259_v41 = vld [vmem:[#allocation2 + $0x9] sm:$0xff] }
 0x27d   : > { %v1234_v58 = vld [vmem:[#allocation2 + $0x10] sm:$0xff]  ;;  %1231 = vst.msk [vmem:[#allocation2 + $0x18] sm:$0xf] %vm1230_vm6, %v1225_v56  ;;  %2621 = vmatmul.msk.f32.gmra.mxu0 %vm1226_vm5, %v1259_v41  ;;  %2626 = vmatmul.msk.f32.gmra.mxu1 %vm1226_vm5, %v1259_v41  ;;  %v1706_v41 = vld [vmem:[%s4592_s8 + $0x78] sm:$0xff] }
 0x27e   : > { %2632 = vmatmul.msk.f32.gmra.mxu2 %vm1226_vm5, %v1234_v58  ;;  %2637 = vmatmul.msk.f32.gmra.mxu3 %vm1226_vm5, %v1234_v58  ;;  %v1439_v57 = vld [vmem:[#allocation2 + $0xa] sm:$0xff] }
 0x27f   : > { %v1705_v58 = vld [vmem:[%s4592_s8 + $0x70] sm:$0xff]  ;;  %1722 = vmatpush.msrb.mxu0 %v1706_v41  ;;  %v2736_v41 = vld [vmem:[%s4593_s9 + $0x108] sm:$0xff] }
 0x281   : > { %1723 = vmatpush.msrb.mxu0 %v1705_v58 }
 0x284   : > { %v1260_v60 = vld [vmem:[#allocation2 + $0x11] sm:$0xff]  ;;  %v1261_v38 = vld [vmem:[#allocation2 + $0x19] sm:$0x3] }
 0x285   : > { %v1235_v61 = vld [vmem:[#allocation2 + $0x18] sm:$0x3]  ;;  %2622 = vmatmul.msk.f32.gmra.mxu0 %vm1226_vm5, %v1260_v60  ;;  %2627 = vmatmul.msk.f32.gmra.mxu1 %vm1226_vm5, %v1260_v60  ;;  %v1441_v34 = vld [vmem:[#allocation2 + $0x1a] sm:$0x3] }
 0x286   : > { %2633 = vmatmul.msk.f32.gmra.mxu2 %vm1226_vm5, %v1235_v61  ;;  %2638 = vmatmul.msk.f32.gmra.mxu3 %vm1226_vm5, %v1235_v61  ;;  %v1440_v62 = vld [vmem:[#allocation2 + $0x12] sm:$0xff] }
 0x28d   : > { %2623 = vmatmul.msk.f32.gmra.mxu0 %vm1226_vm5, %v1261_v38  ;;  %2628 = vmatmul.msk.f32.gmra.mxu1 %vm1226_vm5, %v1261_v38  ;;  %v1704_v38 = vld [vmem:[%s4592_s8 + $0x68] sm:$0xff] }
 0x28e   : > { %1724 = vmatpush.msrb.mxu0 %v1704_v38  ;;  %v1854_v38 = vld [vmem:[%s4593_s9 + $0x40] sm:$0xff] }
 0x295   : > { %2662 = vmatmul.msk.f32.vlgmr.msra.gmra.mxu0 %vm1226_vm5, %v1438_v36  ;;  %2667 = vmatmul.msk.f32.vlgmr.msra.gmra.mxu1 %vm1226_vm5, %v1438_v36 }
 0x29d   : > { %2663 = vmatmul.msk.f32.gmra.mxu0 %vm1226_vm5, %v1439_v57  ;;  %2668 = vmatmul.msk.f32.gmra.mxu1 %vm1226_vm5, %v1439_v57 }
 0x2a5   : > { %2664 = vmatmul.msk.f32.gmra.mxu0 %vm1226_vm5, %v1440_v62  ;;  %2669 = vmatmul.msk.f32.gmra.mxu1 %vm1226_vm5, %v1440_v62  ;;  %v1571_v62 = vld [vmem:[%s4591_s7] sm:$0xff] }
 0x2ad   : > { %2665 = vmatmul.msk.f32.gmra.mxu0 %vm1226_vm5, %v1441_v34  ;;  %2670 = vmatmul.msk.f32.gmra.mxu1 %vm1226_vm5, %v1441_v34  ;;  %v1572_v34 = vld [vmem:[%s4591_s7 + $0x8] sm:$0x1f] }
 0x2f0   : > { %v1397_v49 = vpop.f32.mrf.mxu2  ;;  %v1426_v55 = vpop.f32.mrf.mxu3 }
 0x2f2   : > { %v1321_v53 = vpop.f32.mrf.mxu0  ;;  %v1350_v59 = vpop.f32.mrf.mxu1 }
 0x2f3   : > { %v1398_v21 = vadd.f32 %v1397_v49, %v1321_v53  ;;  %v1427_v22 = vadd.f32 %v1426_v55, %v1350_v59  ;;  %v2702_v53 = vld [vmem:[%s4592_s8 + $0x138] sm:$0xff]  ;;  %v2701_v59 = vld [vmem:[%s4592_s8 + $0x130] sm:$0xff] }
 0x2f4   : > { %v2697_v49 = vld [vmem:[%s4592_s8 + $0x110] sm:$0xff]  ;;  %v2678_v55 = vld [vmem:[%s4591_s7 + $0x18] sm:$0x1f] }
 0x2f9   : > { %v1400_v51 = vpop.f32.mrf.mxu2  ;;  %v1429_v4 = vpop.f32.mrf.mxu3 }
 0x2fa   : > { %v1324_v63 = vpop.f32.mrf.mxu0  ;;  %v1353_v0 = vpop.f32.mrf.mxu1 }
 0x2fb   : > { %v1401_v13 = vadd.f32 %v1400_v51, %v1324_v63  ;;  %v1430_v14 = vadd.f32 %v1429_v4, %v1353_v0  ;;  %v2700_v63 = vld [vmem:[%s4592_s8 + $0x128] sm:$0xff]  ;;  %v2699_v0 = vld [vmem:[%s4592_s8 + $0x120] sm:$0xff]  ;;  %v1701_v51 = vld [vmem:[%s4592_s8 + $0x50] sm:$0xff] }
 0x2fc   : > { %v2710_v4 = vld [vmem:[%s4592_s8 + $0x178] sm:$0xff] }
 0x301   : > { %v1403_v6 = vpop.f32.mrf.mxu2  ;;  %v1432_v7 = vpop.f32.mrf.mxu3 }
 0x302   : > { %v1327_v1 = vpop.f32.mrf.mxu0  ;;  %v1356_v32 = vpop.f32.mrf.mxu1 }
 0x303   : > { %v1404_v10 = vadd.f32 %v1403_v6, %v1327_v1  ;;  %v1433_v11 = vadd.f32 %v1432_v7, %v1356_v32  ;;  %v2677_v1 = vld [vmem:[%s4591_s7 + $0x10] sm:$0xff]  ;;  %v2698_v32 = vld [vmem:[%s4592_s8 + $0x118] sm:$0xff] }
 0x304   : > { %v2709_v6 = vld [vmem:[%s4592_s8 + $0x170] sm:$0xff] }
 0x305   : > { %v2693_v7 = vld [vmem:[%s4592_s8 + $0xf0] sm:$0xff] }
 0x309   : > { %v1406_v15 = vpop.f32.mrf.mxu2  ;;  %v1435_v16 = vpop.f32.mrf.mxu3 }
 0x30a   : > { %v1330_v2 = vpop.f32.mrf.mxu0  ;;  %v1359_v3 = vpop.f32.mrf.mxu1 }
 0x30b   : > { %v1407_v17 = vadd.f32 %v1406_v15, %v1330_v2  ;;  %v1436_v18 = vadd.f32 %v1435_v16, %v1359_v3  ;;  %v1703_v2 = vld [vmem:[%s4592_s8 + $0x60] sm:$0xff]  ;;  %v1702_v3 = vld [vmem:[%s4592_s8 + $0x58] sm:$0xff]  ;;  %v1697_v15 = vld [vmem:[%s4592_s8 + $0x30] sm:$0xff] }
 0x30c   : > { %1725 = vmatpush.msrb.mxu0 %v1703_v2  ;;  %v1713_v16 = vld [vmem:[%s4592_s8 + $0xb0] sm:$0xff]  ;;  %v2775_v2 = vld [vmem:[%s4593_s9 + $0x228] sm:$0xff] }
 0x30e   : > { %1726 = vmatpush.msrb.mxu0 %v1702_v3 }
 0x310   : > { %1727 = vmatpush.msrb.mxu0 %v1701_v51  ;;  %v1850_v51 = vld [vmem:[%s4593_s9 + $0x20] sm:$0xff] }
 0x312   : > { %v1500_v30 = vpop.f32.mrf.mxu0  ;;  %v1529_v45 = vpop.f32.mrf.mxu1 }
 0x313   : > { %v1541_v40 = vadd.f32 %v1500_v30, %v1398_v21  ;;  %v1542_v33 = vadd.f32 %v1529_v45, %v1427_v22  ;;  %v2696_v30 = vld [vmem:[%s4592_s8 + $0x108] sm:$0xff]  ;;  %v2695_v45 = vld [vmem:[%s4592_s8 + $0x100] sm:$0xff]  ;;  %v2689_v21 = vld [vmem:[%s4592_s8 + $0xd0] sm:$0xff] }
 0x314   : > { %v2705_v22 = vld [vmem:[%s4592_s8 + $0x150] sm:$0xff] }
 0x315   : > { %v1555_v46 = vadd.f32 %v1551_v23, %v1541_v40  ;;  %v1556_v44 = vadd.f32 %v1552_v24, %v1542_v33  ;;  %v1693_v40 = vld [vmem:[%s4592_s8 + $0x10] sm:$0xff] }
 0x316   : > { %v1709_v33 = vld [vmem:[%s4592_s8 + $0x90] sm:$0xff] }
 0x317   : > { %v1563_v36 = vmax.f32 %v1555_v46, 0.0  ;;  %v1564_v57 = vmax.f32 %v1556_v44, 0.0  ;;  %v1856_v46 = vld [vmem:[%s4593_s9 + $0x50] sm:$0xff] }
 0x318   : > { %v2737_v44 = vld [vmem:[%s4593_s9 + $0x110] sm:$0xff] }
 0x31a   : > { %v1503_v47 = vpop.f32.mrf.mxu0  ;;  %v1532_v5 = vpop.f32.mrf.mxu1 }
 0x31b   : > { %v1543_v27 = vadd.f32 %v1503_v47, %v1401_v13  ;;  %v1544_v28 = vadd.f32 %v1532_v5, %v1430_v14  ;;  %v1700_v47 = vld [vmem:[%s4592_s8 + $0x48] sm:$0xff]  ;;  %v2694_v5 = vld [vmem:[%s4592_s8 + $0xf8] sm:$0xff]  ;;  %v2691_v13 = vld [vmem:[%s4592_s8 + $0xe0] sm:$0xff] }
 0x31c   : > { %1728 = vmatpush.msrb.mxu0 %v1700_v47  ;;  %v2707_v14 = vld [vmem:[%s4592_s8 + $0x160] sm:$0xff] }
 0x31d   : > { %v1557_v29 = vadd.f32 %v1551_v23, %v1543_v27  ;;  %v1558_v39 = vadd.f32 %v1552_v24, %v1544_v28  ;;  %v2688_v27 = vld [vmem:[%s4592_s8 + $0xc8] sm:$0xff]  ;;  %v2774_v47 = vld [vmem:[%s4593_s9 + $0x220] sm:$0xff] }
 0x31e   : > { %v2704_v28 = vld [vmem:[%s4592_s8 + $0x148] sm:$0xff] }
 0x31f   : > { %v1565_v60 = vmax.f32 %v1557_v29, 0.0  ;;  %v1566_v61 = vmax.f32 %v1558_v39, 0.0  ;;  %v2724_v29 = vld [vmem:[%s4593_s9 + $0xb8] sm:$0xff] }
 0x320   : > { %v1857_v39 = vld [vmem:[%s4593_s9 + $0x58] sm:$0xff] }
 0x322   : > { %v1506_v8 = vpop.f32.mrf.mxu0  ;;  %v1535_v9 = vpop.f32.mrf.mxu1 }
 0x323   : > { %v1545_v19 = vadd.f32 %v1506_v8, %v1404_v10  ;;  %v1546_v20 = vadd.f32 %v1535_v9, %v1433_v11  ;;  %v1699_v8 = vld [vmem:[%s4592_s8 + $0x40] sm:$0xff]  ;;  %v1698_v9 = vld [vmem:[%s4592_s8 + $0x38] sm:$0xff]  ;;  %v2692_v11 = vld [vmem:[%s4592_s8 + $0xe8] sm:$0xff] }
 0x324   : > { %1729 = vmatpush.msrb.mxu0 %v1699_v8  ;;  %v1714_v10 = vld [vmem:[%s4592_s8 + $0xb8] sm:$0xff] }
 0x325   : > { %v1559_v42 = vadd.f32 %v1551_v23, %v1545_v19  ;;  %v1560_v31 = vadd.f32 %v1552_v24, %v1546_v20  ;;  %1753 = vmatpush.msrb.mxu1 %v1714_v10  ;;  %v1696_v19 = vld [vmem:[%s4592_s8 + $0x28] sm:$0xff]  ;;  %v2773_v8 = vld [vmem:[%s4593_s9 + $0x218] sm:$0xff]  ;;  %v1848_v10 = vld [vmem:[%s4593_s9 + $0x10] sm:$0xff] }
 0x326   : > { %1730 = vmatpush.msrb.mxu0 %v1698_v9  ;;  %v1712_v20 = vld [vmem:[%s4592_s8 + $0xa8] sm:$0xff]  ;;  %v2715_v9 = vld [vmem:[%s4593_s9 + $0x70] sm:$0xff] }
 0x327   : > { %v1567_v54 = vmax.f32 %v1559_v42, 0.0  ;;  %v1568_v56 = vmax.f32 %v1560_v31, 0.0  ;;  %1754 = vmatpush.msrb.mxu1 %v1713_v16  ;;  %v1692_v42 = vld [vmem:[%s4592_s8 + $0x8] sm:$0xff] }
 0x328   : > { %1731 = vmatpush.msrb.mxu0 %v1697_v15  ;;  %v1708_v31 = vld [vmem:[%s4592_s8 + $0x88] sm:$0xff] }
 0x329   : > { %1755 = vmatpush.msrb.mxu1 %v1712_v20  ;;  %v2728_v15 = vld [vmem:[%s4593_s9 + $0xc8] sm:$0xff] }
 0x32a   : > { %v1509_v25 = vpop.f32.mrf.mxu0  ;;  %v1538_v26 = vpop.f32.mrf.mxu1  ;;  %1732 = vmatpush.msrb.mxu0 %v1696_v19  ;;  %v2771_v16 = vld [vmem:[%s4593_s9 + $0x208] sm:$0xff] }
 0x32b   : > { %v1547_v35 = vadd.f32 %v1509_v25, %v1407_v17  ;;  %v1548_v37 = vadd.f32 %v1538_v26, %v1436_v18  ;;  %v2690_v17 = vld [vmem:[%s4592_s8 + $0xd8] sm:$0xff] }
 0x32c   : > { %v2706_v18 = vld [vmem:[%s4592_s8 + $0x158] sm:$0xff] }
 0x32d   : > { %v1561_v43 = vadd.f32 %v1551_v23, %v1547_v35  ;;  %v1562_v48 = vadd.f32 %v1552_v24, %v1548_v37  ;;  %v1695_v23 = vld [vmem:[%s4592_s8 + $0x20] sm:$0xff]  ;;  %v1694_v25 = vld [vmem:[%s4592_s8 + $0x18] sm:$0xff] }
 0x32e   : > { %v1711_v24 = vld [vmem:[%s4592_s8 + $0xa0] sm:$0xff]  ;;  %1733 = vmatpush.msrb.mxu0 %v1695_v23  ;;  %v1710_v26 = vld [vmem:[%s4592_s8 + $0x98] sm:$0xff] }
 0x32f   : > { %v1569_v50 = vmax.f32 %v1561_v43, 0.0  ;;  %v1570_v52 = vmax.f32 %v1562_v48, 0.0  ;;  %1756 = vmatpush.msrb.mxu1 %v1711_v24  ;;  %v2687_v35 = vld [vmem:[%s4592_s8 + $0xc0] sm:$0xff]  ;;  %v2751_v24 = vld [vmem:[%s4593_s9 + $0x178] sm:$0xff] }
 0x330   : > { %1734 = vmatpush.msrb.mxu0 %v1694_v25  ;;  %v2703_v37 = vld [vmem:[%s4592_s8 + $0x140] sm:$0xff]  ;;  %v2764_v25 = vld [vmem:[%s4593_s9 + $0x1d8] sm:$0xff] }
 0x331   : > { %2671 = vmatpush.msk.msrb.mxu2 %vm523_vm0, %v1569_v50  ;;  %2674 = vmatpush.msk.msra.mxu3 %vm523_vm0, %v1570_v52  ;;  %v1691_v43 = vld [vmem:[%s4592_s8] sm:$0xff] }
 0x332   : > { %1757 = vmatpush.msrb.mxu1 %v1710_v26  ;;  %1735 = vmatpush.msrb.mxu0 %v1693_v40  ;;  %v1707_v48 = vld [vmem:[%s4592_s8 + $0x80] sm:$0xff]  ;;  %v2790_v26 = vld [vmem:[%s4593_s9 + $0x298] sm:$0xff]  ;;  %v2749_v40 = vld [vmem:[%s4593_s9 + $0x168] sm:$0xff] }
 0x333   : > { %1599 = vmatpush.msrb.mxu2 %v1567_v54  ;;  %1622 = vmatpush.msra.mxu3 %v1568_v56  ;;  %v2727_v23 = vld [vmem:[%s4593_s9 + $0xc0] sm:$0xff] }
 0x334   : > { %1758 = vmatpush.msrb.mxu1 %v1709_v33  ;;  %1736 = vmatpush.msrb.mxu0 %v1692_v42  ;;  %v2769_v33 = vld [vmem:[%s4593_s9 + $0x1f8] sm:$0xff] }
 0x335   : > { %1600 = vmatpush.msrb.mxu2 %v1565_v60  ;;  %1623 = vmatpush.msra.mxu3 %v1566_v61 }
 0x336   : > { %1759 = vmatpush.msrb.mxu1 %v1708_v31  ;;  %1737 = vmatpush.msrb.mxu0 %v1691_v43 }
 0x337   : > { %1601 = vmatpush.msrb.mxu2 %v1563_v36  ;;  %1624 = vmatpush.msra.mxu3 %v1564_v57 }
 0x338   : > { %2672 = vmatmul.msk.f32.vlgmr.msrb.gmra.mxu2 %vm1573_vm7, %v1571_v62  ;;  %2675 = vmatmul.msk.f32.vlgmr.msra.gmra.mxu3 %vm1573_vm7, %v1571_v62  ;;  %v1853_v62 = vld [vmem:[%s4593_s9 + $0x38] sm:$0xff] }
 0x339   : > { %2679 = vmatpush.msk.msra.mxu2 %vm523_vm0, %v1569_v50  ;;  %2682 = vmatpush.msk.msrb.mxu3 %vm523_vm0, %v1570_v52  ;;  %v2738_v50 = vld [vmem:[%s4593_s9 + $0x118] sm:$0xff]  ;;  %v2723_v52 = vld [vmem:[%s4593_s9 + $0xb0] sm:$0xff] }
 0x33a   : > { %1760 = vmatpush.msrb.mxu1 %v1707_v48  ;;  %1879 = vmatpush.msra.mxu0 %v2724_v29  ;;  %v2762_v29 = vld [vmem:[%s4593_s9 + $0x1c8] sm:$0xff] }
 0x33b   : > { %1654 = vmatpush.msra.mxu2 %v1567_v54  ;;  %1677 = vmatpush.msrb.mxu3 %v1568_v56  ;;  %v2722_v54 = vld [vmem:[%s4593_s9 + $0xa8] sm:$0xff] }
 0x33c   : > { %1902 = vmatpush.msra.mxu1 %v1857_v39  ;;  %v1855_v56 = vld [vmem:[%s4593_s9 + $0x48] sm:$0xff]  ;;  %1880 = vmatpush.msra.mxu0 %v2723_v52  ;;  %v2768_v52 = vld [vmem:[%s4593_s9 + $0x1f0] sm:$0xff] }
 0x33d   : > { %1655 = vmatpush.msra.mxu2 %v1565_v60  ;;  %1678 = vmatpush.msrb.mxu3 %v1566_v61  ;;  %v2721_v61 = vld [vmem:[%s4593_s9 + $0xa0] sm:$0xff]  ;;  %v2788_v39 = vld [vmem:[%s4593_s9 + $0x288] sm:$0xff] }
 0x33e   : > { %1903 = vmatpush.msra.mxu1 %v1856_v46  ;;  %1881 = vmatpush.msra.mxu0 %v2722_v54  ;;  %v2761_v46 = vld [vmem:[%s4593_s9 + $0x1c0] sm:$0xff]  ;;  %v2747_v54 = vld [vmem:[%s4593_s9 + $0x158] sm:$0xff] }
 0x33f   : > { %1656 = vmatpush.msra.mxu2 %v1563_v36  ;;  %1679 = vmatpush.msrb.mxu3 %v1564_v57  ;;  %v2735_v36 = vld [vmem:[%s4593_s9 + $0x100] sm:$0xff]  ;;  %v2720_v57 = vld [vmem:[%s4593_s9 + $0x98] sm:$0xff] }
 0x340   : > { %2673 = vmatmul.msk.f32.gmra.mxu2 %vm1573_vm7, %v1572_v34  ;;  %2676 = vmatmul.msk.f32.gmra.mxu3 %vm1573_vm7, %v1572_v34  ;;  %v2734_v34 = vld [vmem:[%s4593_s9 + $0xf8] sm:$0xff] }
 0x341   : > { %1793 = vmatpush.msrb.mxu2 %v2702_v53  ;;  %1824 = vmatpush.msra.mxu3 %v2710_v4  ;;  %v2719_v53 = vld [vmem:[%s4593_s9 + $0x90] sm:$0xff]  ;;  %v2731_v4 = vld [vmem:[%s4593_s9 + $0xe0] sm:$0xff] }
 0x342   : > { %1904 = vmatpush.msra.mxu1 %v1855_v56  ;;  %1882 = vmatpush.msra.mxu0 %v2721_v61  ;;  %v2760_v56 = vld [vmem:[%s4593_s9 + $0x1b8] sm:$0xff] }
 0x343   : > { %1794 = vmatpush.msrb.mxu2 %v2701_v59  ;;  %1825 = vmatpush.msra.mxu3 %v2709_v6  ;;  %v1852_v59 = vld [vmem:[%s4593_s9 + $0x30] sm:$0xff]  ;;  %v1849_v6 = vld [vmem:[%s4593_s9 + $0x18] sm:$0xff] }
 0x344   : > { %1905 = vmatpush.msra.mxu1 %v1854_v38  ;;  %1883 = vmatpush.msra.mxu0 %v2720_v57  ;;  %v2829_v61 = vld [vmem:[%s4593_s9 + $0x3b8] sm:$0xff]  ;;  %v2746_v38 = vld [vmem:[%s4593_s9 + $0x150] sm:$0xff] }
 0x345   : > { %1795 = vmatpush.msrb.mxu2 %v2700_v63  ;;  %1826 = vmatpush.msra.mxu3 %v2708_v12  ;;  %v2777_v63 = vld [vmem:[%s4593_s9 + $0x238] sm:$0xff]  ;;  %v2772_v12 = vld [vmem:[%s4593_s9 + $0x210] sm:$0xff] }
 0x346   : > { %1906 = vmatpush.msra.mxu1 %v1853_v62  ;;  %1884 = vmatpush.msra.mxu0 %v2719_v53  ;;  %v2785_v57 = vld [vmem:[%s4593_s9 + $0x270] sm:$0xff]  ;;  %v2758_v53 = vld [vmem:[%s4593_s9 + $0x1a8] sm:$0xff] }
 0x347   : > { %1796 = vmatpush.msrb.mxu2 %v2699_v0  ;;  %1827 = vmatpush.msra.mxu3 %v2707_v14  ;;  %v2733_v0 = vld [vmem:[%s4593_s9 + $0xf0] sm:$0xff]  ;;  %v1847_v14 = vld [vmem:[%s4593_s9 + $0x8] sm:$0xff] }
 0x348   : > { %2680 = vmatmul.msk.f32.vlgmr.msra.gmra.mxu2 %vm1573_vm7, %v2677_v1  ;;  %2683 = vmatmul.msk.f32.vlgmr.msrb.gmra.mxu3 %vm1573_vm7, %v2677_v1  ;;  %v2776_v1 = vld [vmem:[%s4593_s9 + $0x230] sm:$0xff] }
 0x349   : > { %1797 = vmatpush.msrb.mxu2 %v2698_v32  ;;  %1828 = vmatpush.msra.mxu3 %v2706_v18  ;;  %v2718_v32 = vld [vmem:[%s4593_s9 + $0x88] sm:$0xff]  ;;  %v2828_v62 = vld [vmem:[%s4593_s9 + $0x3b0] sm:$0xff] }
 0x34a   : > { %1907 = vmatpush.msra.mxu1 %v1852_v59  ;;  %1885 = vmatpush.msra.mxu0 %v2718_v32  ;;  %v2784_v59 = vld [vmem:[%s4593_s9 + $0x268] sm:$0xff]  ;;  %v2743_v32 = vld [vmem:[%s4593_s9 + $0x138] sm:$0xff] }
 0x34b   : > { %1798 = vmatpush.msrb.mxu2 %v2697_v49  ;;  %1829 = vmatpush.msra.mxu3 %v2705_v22  ;;  %v1851_v49 = vld [vmem:[%s4593_s9 + $0x28] sm:$0xff]  ;;  %v1846_v22 = vld [vmem:[%s4593_s9] sm:$0xff] }
 0x34c   : > { %1908 = vmatpush.msra.mxu1 %v1851_v49  ;;  %v2756_v49 = vld [vmem:[%s4593_s9 + $0x198] sm:$0xff] }
 0x34d   : > { %1799 = vmatpush.msrb.mxu2 %v2696_v30  ;;  %1830 = vmatpush.msra.mxu3 %v2704_v28  ;;  %v2770_v28 = vld [vmem:[%s4593_s9 + $0x200] sm:$0xff] }
 0x34e   : > { %1909 = vmatpush.msra.mxu1 %v1850_v51  ;;  %v2826_v51 = vld [vmem:[%s4593_s9 + $0x3a0] sm:$0xff] }
 0x34f   : > { %1800 = vmatpush.msrb.mxu2 %v2695_v45  ;;  %1831 = vmatpush.msra.mxu3 %v2703_v37  ;;  %v2717_v45 = vld [vmem:[%s4593_s9 + $0x80] sm:$0xff]  ;;  %v2789_v37 = vld [vmem:[%s4593_s9 + $0x290] sm:$0xff] }
 0x350   : > { %2681 = vmatmul.msk.f32.gmra.mxu2 %vm1573_vm7, %v2678_v55  ;;  %2684 = vmatmul.msk.f32.gmra.mxu3 %vm1573_vm7, %v2678_v55  ;;  %v2732_v55 = vld [vmem:[%s4593_s9 + $0xe8] sm:$0xff] }
 0x351   : > { %1801 = vmatpush.msrb.mxu2 %v2694_v5  ;;  %1939 = vmatpush.msrb.mxu3 %v2738_v50  ;;  %v2716_v5 = vld [vmem:[%s4593_s9 + $0x78] sm:$0xff]  ;;  %v2748_v50 = vld [vmem:[%s4593_s9 + $0x160] sm:$0xff] }
 0x352   : > { %1886 = vmatpush.msra.mxu0 %v2717_v45  ;;  %1910 = vmatpush.msra.mxu1 %v1849_v6  ;;  %v2781_v45 = vld [vmem:[%s4593_s9 + $0x250] sm:$0xff]  ;;  %v2825_v6 = vld [vmem:[%s4593_s9 + $0x398] sm:$0xff] }
 0x353   : > { %1802 = vmatpush.msrb.mxu2 %v2693_v7  ;;  %1940 = vmatpush.msrb.mxu3 %v2737_v44  ;;  %v2730_v7 = vld [vmem:[%s4593_s9 + $0xd8] sm:$0xff]  ;;  %v2787_v44 = vld [vmem:[%s4593_s9 + $0x280] sm:$0xff] }
 0x354   : > { %1887 = vmatpush.msra.mxu0 %v2716_v5  ;;  %1911 = vmatpush.msra.mxu1 %v1848_v10  ;;  %v2780_v5 = vld [vmem:[%s4593_s9 + $0x248] sm:$0xff]  ;;  %v2824_v10 = vld [vmem:[%s4593_s9 + $0x390] sm:$0xff] }
 0x355   : > { %1803 = vmatpush.msrb.mxu2 %v2692_v11  ;;  %1941 = vmatpush.msrb.mxu3 %v2736_v41  ;;  %v2729_v11 = vld [vmem:[%s4593_s9 + $0xd0] sm:$0xff]  ;;  %v2786_v41 = vld [vmem:[%s4593_s9 + $0x278] sm:$0xff] }
 0x356   : > { %1888 = vmatpush.msra.mxu0 %v2715_v9  ;;  %1912 = vmatpush.msra.mxu1 %v1847_v14  ;;  %v2779_v9 = vld [vmem:[%s4593_s9 + $0x240] sm:$0xff]  ;;  %v2820_v14 = vld [vmem:[%s4593_s9 + $0x370] sm:$0xff] }
 0x357   : > { %1804 = vmatpush.msrb.mxu2 %v2691_v13  ;;  %1942 = vmatpush.msrb.mxu3 %v2735_v36  ;;  %v2714_v13 = vld [vmem:[%s4593_s9 + $0x68] sm:$0xff]  ;;  %v2759_v36 = vld [vmem:[%s4593_s9 + $0x1b0] sm:$0xff] }
 0x358   : > { %1889 = vmatpush.msra.mxu0 %v2714_v13  ;;  %1913 = vmatpush.msra.mxu1 %v1846_v22  ;;  %v2821_v13 = vld [vmem:[%s4593_s9 + $0x378] sm:$0xff] }
 0x359   : > { %1805 = vmatpush.msrb.mxu2 %v2690_v17  ;;  %1943 = vmatpush.msrb.mxu3 %v2734_v34  ;;  %v2745_v34 = vld [vmem:[%s4593_s9 + $0x148] sm:$0xff] }
 0x35b   : > { %1806 = vmatpush.msrb.mxu2 %v2689_v21  ;;  %1944 = vmatpush.msrb.mxu3 %v2733_v0  ;;  %v2713_v21 = vld [vmem:[%s4593_s9 + $0x60] sm:$0xff] }
 0x35c   : > { %1890 = vmatpush.msra.mxu0 %v2713_v21  ;;  %v2757_v0 = vld [vmem:[%s4593_s9 + $0x1a0] sm:$0xff] }
 0x35d   : > { %1807 = vmatpush.msrb.mxu2 %v2688_v27  ;;  %1945 = vmatpush.msrb.mxu3 %v2732_v55  ;;  %v2750_v27 = vld [vmem:[%s4593_s9 + $0x170] sm:$0xff]  ;;  %v2782_v55 = vld [vmem:[%s4593_s9 + $0x258] sm:$0xff] }
 0x35f   : > { %1808 = vmatpush.msrb.mxu2 %v2687_v35  ;;  %1946 = vmatpush.msrb.mxu3 %v2731_v4  ;;  %v2763_v35 = vld [vmem:[%s4593_s9 + $0x1d0] sm:$0xff]  ;;  %v2741_v4 = vld [vmem:[%s4593_s9 + $0x128] sm:$0xff] }
 0x361   : > { %2053 = vmatpush.msra.mxu2 %v2777_v63  ;;  %1947 = vmatpush.msrb.mxu3 %v2730_v7  ;;  %v2744_v63 = vld [vmem:[%s4593_s9 + $0x140] sm:$0xff] }
 0x362   : > { %v2740_v7 = vld [vmem:[%s4593_s9 + $0x120] sm:$0xff] }
 0x363   : > { %2054 = vmatpush.msra.mxu2 %v2776_v1  ;;  %1948 = vmatpush.msrb.mxu3 %v2729_v11  ;;  %v2783_v1 = vld [vmem:[%s4593_s9 + $0x260] sm:$0xff]  ;;  %v2823_v11 = vld [vmem:[%s4593_s9 + $0x388] sm:$0xff] }
 0x365   : > { %2055 = vmatpush.msra.mxu2 %v2775_v2  ;;  %1949 = vmatpush.msrb.mxu3 %v2728_v15  ;;  %v2742_v2 = vld [vmem:[%s4593_s9 + $0x130] sm:$0xff]  ;;  %v2819_v15 = vld [vmem:[%s4593_s9 + $0x368] sm:$0xff] }
 0x367   : > { %2056 = vmatpush.msra.mxu2 %v2774_v47  ;;  %1950 = vmatpush.msrb.mxu3 %v2727_v23  ;;  %v2754_v47 = vld [vmem:[%s4593_s9 + $0x188] sm:$0xff] }
 0x369   : > { %2057 = vmatpush.msra.mxu2 %v2773_v8  ;;  %v2753_v8 = vld [vmem:[%s4593_s9 + $0x180] sm:$0xff] }
 0x36b   : > { %2058 = vmatpush.msra.mxu2 %v2772_v12  ;;  %v2822_v12 = vld [vmem:[%s4593_s9 + $0x380] sm:$0xff] }
 0x36d   : > { %2059 = vmatpush.msra.mxu2 %v2771_v16  ;;  %v2818_v16 = vld [vmem:[%s4593_s9 + $0x360] sm:$0xff] }
 0x36f   : > { %2060 = vmatpush.msra.mxu2 %v2770_v28 }
 0x371   : > { %2061 = vmatpush.msra.mxu2 %v2769_v33  ;;  %v2842_v33 = vld [vmem:[%s4593_s9 + $0x418] sm:$0xff] }
 0x373   : > { %2062 = vmatpush.msra.mxu2 %v2768_v52  ;;  %v2841_v52 = vld [vmem:[%s4593_s9 + $0x410] sm:$0xff] }
 0x3bb   : > { %v4027_v58 = vpop.f32.mrf.mxu2  ;;  %v4029_v60 = vpop.f32.mrf.mxu3 }
 0x3c3   : > { %v4076_v3 = vpop.f32.mrf.mxu2  ;;  %v4078_v30 = vpop.f32.mrf.mxu3 }
 0x3cb   : > { %v1658_v17 = vpop.f32.mrf.mxu2  ;;  %v1681_v18 = vpop.f32.mrf.mxu3 }
 0x3cc   : > { %v1687_v19 = vmax.f32 %v4027_v58, %v1658_v17  ;;  %v1688_v20 = vmax.f32 %v4029_v60, %v1681_v18  ;;  %v2767_v58 = vld [vmem:[%s4593_s9 + $0x1e8] sm:$0xff]  ;;  %v2766_v60 = vld [vmem:[%s4593_s9 + $0x1e0] sm:$0xff] }
 0x3cd   : > { %2063 = vmatpush.msra.mxu2 %v2767_v58  ;;  %v2839_v58 = vld [vmem:[%s4593_s9 + $0x400] sm:$0xff] }
 0x3ce   : > { %1809 = vmatmul.f32.vlgmr.msrb.gmra.mxu2 %v1687_v19  ;;  %2711 = vmatmul.msk.f32.vlgmr.msra.gmra.mxu3 %vm1715_vm8, %v1688_v20 }
 0x3cf   : > { %1738 = vmatmul.f32.vlgmr.msrb.gmra.mxu0 %v1687_v19  ;;  %2685 = vmatmul.msk.f32.vlgmr.msrb.gmra.mxu1 %vm1715_vm8, %v1688_v20 }
 0x3d0   : > { %1977 = vmatpush.msrb.mxu0 %v2751_v24  ;;  %2015 = vmatpush.msrb.mxu1 %v2764_v25 }
 0x3d1   : > { %2091 = vmatpush.msra.mxu3 %v2790_v26  ;;  %2064 = vmatpush.msra.mxu2 %v2766_v60  ;;  %v2799_v60 = vld [vmem:[%s4593_s9 + $0x2d8] sm:$0xff] }
 0x3d2   : > { %1978 = vmatpush.msrb.mxu0 %v2750_v27  ;;  %2016 = vmatpush.msrb.mxu1 %v2763_v35 }
 0x3d3   : > { %v1661_v42 = vpop.f32.mrf.mxu2  ;;  %v1684_v31 = vpop.f32.mrf.mxu3  ;;  %2092 = vmatpush.msra.mxu3 %v2789_v37  ;;  %2205 = vmatpush.msrb.mxu2 %v2829_v61  ;;  %v2803_v37 = vld [vmem:[%s4593_s9 + $0x2f8] sm:$0xff] }
 0x3d4   : > { %v1689_v43 = vmax.f32 %v4076_v3, %v1661_v42  ;;  %v1690_v48 = vmax.f32 %v4078_v30, %v1684_v31  ;;  %1979 = vmatpush.msrb.mxu0 %v2749_v40  ;;  %2017 = vmatpush.msrb.mxu1 %v2762_v29  ;;  %v2755_v3 = vld [vmem:[%s4593_s9 + $0x190] sm:$0xff]  ;;  %v2827_v30 = vld [vmem:[%s4593_s9 + $0x3a8] sm:$0xff]  ;;  %v2816_v40 = vld [vmem:[%s4593_s9 + $0x358] sm:$0xff] }
 0x3d5   : > { %2093 = vmatpush.msra.mxu3 %v2788_v39  ;;  %2206 = vmatpush.msrb.mxu2 %v2828_v62  ;;  %v2802_v29 = vld [vmem:[%s4593_s9 + $0x2f0] sm:$0xff]  ;;  %v2812_v61 = vld [vmem:[%s4593_s9 + $0x338] sm:$0xff] }
 0x3d6   : > { %1812 = vmatmul.f32.gmra.mxu2 %v1689_v43  ;;  %2712 = vmatmul.msk.f32.gmra.mxu3 %vm1715_vm8, %v1690_v48 }
 0x3d7   : > { %1741 = vmatmul.f32.gmra.mxu0 %v1689_v43  ;;  %2686 = vmatmul.msk.f32.gmra.mxu1 %vm1715_vm8, %v1690_v48 }
 0x3d8   : > { %1980 = vmatpush.msrb.mxu0 %v2748_v50  ;;  %2018 = vmatpush.msrb.mxu1 %v2761_v46  ;;  %v2815_v50 = vld [vmem:[%s4593_s9 + $0x350] sm:$0xff]  ;;  %v2801_v46 = vld [vmem:[%s4593_s9 + $0x2e8] sm:$0xff] }
 0x3d9   : > { %2094 = vmatpush.msra.mxu3 %v2787_v44  ;;  %2207 = vmatpush.msrb.mxu2 %v2827_v30  ;;  %v2814_v44 = vld [vmem:[%s4593_s9 + $0x348] sm:$0xff]  ;;  %v2808_v30 = vld [vmem:[%s4593_s9 + $0x318] sm:$0xff] }
 0x3da   : > { %1981 = vmatpush.msrb.mxu0 %v2747_v54  ;;  %2019 = vmatpush.msrb.mxu1 %v2760_v56  ;;  %v2840_v54 = vld [vmem:[%s4593_s9 + $0x408] sm:$0xff]  ;;  %v2800_v56 = vld [vmem:[%s4593_s9 + $0x2e0] sm:$0xff] }
 0x3db   : > { %2095 = vmatpush.msra.mxu3 %v2786_v41  ;;  %2208 = vmatpush.msrb.mxu2 %v2826_v51  ;;  %v2813_v41 = vld [vmem:[%s4593_s9 + $0x340] sm:$0xff]  ;;  %v2794_v51 = vld [vmem:[%s4593_s9 + $0x2b0] sm:$0xff] }
 0x3dc   : > { %1982 = vmatpush.msrb.mxu0 %v2746_v38  ;;  %2020 = vmatpush.msrb.mxu1 %v2759_v36 }
 0x3dd   : > { %2096 = vmatpush.msra.mxu3 %v2785_v57  ;;  %2209 = vmatpush.msrb.mxu2 %v2825_v6  ;;  %v2838_v57 = vld [vmem:[%s4593_s9 + $0x3f8] sm:$0xff]  ;;  %v2806_v6 = vld [vmem:[%s4593_s9 + $0x308] sm:$0xff] }
 0x3de   : > { %1983 = vmatpush.msrb.mxu0 %v2745_v34  ;;  %2021 = vmatpush.msrb.mxu1 %v2758_v53  ;;  %v2798_v34 = vld [vmem:[%s4593_s9 + $0x2d0] sm:$0xff] }
 0x3df   : > { %2097 = vmatpush.msra.mxu3 %v2784_v59  ;;  %2210 = vmatpush.msrb.mxu2 %v2824_v10  ;;  %v2811_v59 = vld [vmem:[%s4593_s9 + $0x330] sm:$0xff]  ;;  %v2831_v10 = vld [vmem:[%s4593_s9 + $0x3c0] sm:$0xff] }
 0x3e0   : > { %1984 = vmatpush.msrb.mxu0 %v2744_v63  ;;  %2022 = vmatpush.msrb.mxu1 %v2757_v0  ;;  %v2837_v63 = vld [vmem:[%s4593_s9 + $0x3f0] sm:$0xff]  ;;  %v2797_v0 = vld [vmem:[%s4593_s9 + $0x2c8] sm:$0xff] }
 0x3e1   : > { %2098 = vmatpush.msra.mxu3 %v2783_v1  ;;  %2211 = vmatpush.msrb.mxu2 %v2823_v11  ;;  %v2810_v1 = vld [vmem:[%s4593_s9 + $0x328] sm:$0xff]  ;;  %v2855_v11 = vld [vmem:[%s4593_s9 + $0x478] sm:$0xff] }
 0x3e2   : > { %1985 = vmatpush.msrb.mxu0 %v2743_v32  ;;  %2023 = vmatpush.msrb.mxu1 %v2756_v49  ;;  %v2836_v32 = vld [vmem:[%s4593_s9 + $0x3e8] sm:$0xff]  ;;  %v2796_v49 = vld [vmem:[%s4593_s9 + $0x2c0] sm:$0xff] }
 0x3e3   : > { %2099 = vmatpush.msra.mxu3 %v2782_v55  ;;  %2212 = vmatpush.msrb.mxu2 %v2822_v12  ;;  %v2809_v55 = vld [vmem:[%s4593_s9 + $0x320] sm:$0xff] }
 0x3e4   : > { %1986 = vmatpush.msrb.mxu0 %v2742_v2  ;;  %2024 = vmatpush.msrb.mxu1 %v2755_v3  ;;  %v2835_v2 = vld [vmem:[%s4593_s9 + $0x3e0] sm:$0xff]  ;;  %v2795_v3 = vld [vmem:[%s4593_s9 + $0x2b8] sm:$0xff] }
 0x3e5   : > { %2100 = vmatpush.msra.mxu3 %v2781_v45  ;;  %2213 = vmatpush.msrb.mxu2 %v2821_v13  ;;  %v2834_v45 = vld [vmem:[%s4593_s9 + $0x3d8] sm:$0xff] }
 0x3e6   : > { %1987 = vmatpush.msrb.mxu0 %v2741_v4  ;;  %2025 = vmatpush.msrb.mxu1 %v2754_v47  ;;  %v2807_v4 = vld [vmem:[%s4593_s9 + $0x310] sm:$0xff] }
 0x3e7   : > { %2101 = vmatpush.msra.mxu3 %v2780_v5  ;;  %2214 = vmatpush.msrb.mxu2 %v2820_v14  ;;  %v2833_v47 = vld [vmem:[%s4593_s9 + $0x3d0] sm:$0xff]  ;;  %v2793_v5 = vld [vmem:[%s4593_s9 + $0x2a8] sm:$0xff]  ;;  %v2868_v14 = vld [vmem:[%s4593_s9 + $0x4d8] sm:$0xff] }
 0x3e8   : > { %1988 = vmatpush.msrb.mxu0 %v2740_v7  ;;  %2026 = vmatpush.msrb.mxu1 %v2753_v8  ;;  %v2832_v7 = vld [vmem:[%s4593_s9 + $0x3c8] sm:$0xff]  ;;  %v2792_v8 = vld [vmem:[%s4593_s9 + $0x2a0] sm:$0xff] }
 0x3e9   : > { %2102 = vmatpush.msra.mxu3 %v2779_v9  ;;  %2215 = vmatpush.msrb.mxu2 %v2819_v15  ;;  %v2805_v9 = vld [vmem:[%s4593_s9 + $0x300] sm:$0xff] }
 0x3eb   : > { %2216 = vmatpush.msrb.mxu2 %v2818_v16  ;;  %v2854_v16 = vld [vmem:[%s4593_s9 + $0x470] sm:$0xff] }
 0x44c   : > { %v1739_v17 = vpop.f32.mrf.mxu0  ;;  %v1762_v18 = vpop.f32.mrf.mxu1 }
 0x44d   : > { %v1763_v21 = vadd.f32 %v1762_v18, %v1739_v17  ;;  %v2867_v17 = vld [vmem:[%s4593_s9 + $0x4d0] sm:$0xff]  ;;  %v2853_v18 = vld [vmem:[%s4593_s9 + $0x468] sm:$0xff] }
 0x451   : > { %v1810_v19 = vpop.f32.mrf.mxu2  ;;  %v1833_v20 = vpop.f32.mrf.mxu3 }
 0x452   : > { %v1834_v22 = vadd.f32 %v1833_v20, %v1810_v19  ;;  %v2866_v19 = vld [vmem:[%s4593_s9 + $0x4c8] sm:$0xff]  ;;  %v2852_v20 = vld [vmem:[%s4593_s9 + $0x460] sm:$0xff] }
 0x454   : > { %v1839_v23 = vmax.f32 %v1763_v21, %v1834_v22  ;;  %v1742_v24 = vpop.f32.mrf.mxu0  ;;  %v1765_v25 = vpop.f32.mrf.mxu1  ;;  %v2865_v21 = vld [vmem:[%s4593_s9 + $0x4c0] sm:$0xff]  ;;  %v2851_v22 = vld [vmem:[%s4593_s9 + $0x458] sm:$0xff] }
 0x455   : > { %v1766_v28 = vadd.f32 %v1765_v25, %v1742_v24  ;;  %v2850_v24 = vld [vmem:[%s4593_s9 + $0x450] sm:$0xff] }
 0x456   : > { %1842 = vst.msk [vmem:[#allocation3] sm:$0xff] %vm1841_vm9, %v1839_v23  ;;  %v2864_v23 = vld [vmem:[%s4593_s9 + $0x4b8] sm:$0xff]  ;;  %v2863_v25 = vld [vmem:[%s4593_s9 + $0x4b0] sm:$0xff] }
 0x459   : > { %v1813_v26 = vpop.f32.mrf.mxu2  ;;  %v1836_v27 = vpop.f32.mrf.mxu3 }
 0x45a   : > { %v1837_v35 = vadd.f32 %v1836_v27, %v1813_v26  ;;  %v2849_v26 = vld [vmem:[%s4593_s9 + $0x448] sm:$0xff] }
 0x45b   : > { %v2862_v27 = vld [vmem:[%s4593_s9 + $0x4a8] sm:$0xff] }
 0x45c   : > { %v1840_v42 = vmax.f32 %v1766_v28, %v1837_v35  ;;  %v2848_v28 = vld [vmem:[%s4593_s9 + $0x440] sm:$0xff] }
 0x45d   : > { %v1858_v31 = vld [vmem:[#allocation3 + $0x1] sm:$0x1]  ;;  %v1845_v43 = vld [vmem:[#allocation3] sm:$0x1]  ;;  %v1918_v48 = vld [vmem:[#allocation3 + $0x2] sm:$0x1] }
 0x45e   : > { %2725 = vmatmul.msk.f32.vlgmr.msra.gmra.mxu0 %vm1841_vm9, %v1858_v31  ;;  %2726 = vmatmul.msk.f32.vlgmr.msra.gmra.mxu1 %vm1841_vm9, %v1845_v43  ;;  %1844 = vst.msk [vmem:[#allocation3 + $0x8] sm:$0x1f] %vm1843_vm10, %v1840_v42  ;;  %v2032_v39 = vld [vmem:[#allocation3 + $0x5] sm:$0x1]  ;;  %v1956_v38 = vld [vmem:[#allocation3 + $0x3] sm:$0x1] }
 0x45f   : > { %2739 = vmatmul.msk.f32.vlgmr.msrb.gmra.mxu3 %vm1841_vm9, %v1918_v48  ;;  %2129 = vmatpush.msra.mxu0 %v2803_v37  ;;  %v1994_v36 = vld [vmem:[#allocation3 + $0x4] sm:$0x1]  ;;  %v2070_v62 = vld [vmem:[#allocation3 + $0x6] sm:$0x1]  ;;  %v2108_v12 = vld [vmem:[#allocation3 + $0x7] sm:$0x1] }
 0x460   : > { %2167 = vmatpush.msra.mxu1 %v2816_v40  ;;  %2243 = vmatpush.msrb.mxu3 %v2842_v33  ;;  %v2861_v35 = vld [vmem:[%s4593_s9 + $0x4a0] sm:$0xff]  ;;  %v2847_v37 = vld [vmem:[%s4593_s9 + $0x438] sm:$0xff]  ;;  %v2846_v33 = vld [vmem:[%s4593_s9 + $0x430] sm:$0xff] }
 0x461   : > { %2130 = vmatpush.msra.mxu0 %v2802_v29  ;;  %2778 = vmatmul.msk.f32.vlgmr.msra.gmra.mxu2 %vm1841_vm9, %v2032_v39  ;;  %v2860_v40 = vld [vmem:[%s4593_s9 + $0x498] sm:$0xff]  ;;  %v2859_v42 = vld [vmem:[%s4593_s9 + $0x490] sm:$0xff]  ;;  %v2845_v31 = vld [vmem:[%s4593_s9 + $0x428] sm:$0xff] }
 0x462   : > { %2168 = vmatpush.msra.mxu1 %v2815_v50  ;;  %2244 = vmatpush.msrb.mxu3 %v2841_v52  ;;  %v2858_v43 = vld [vmem:[%s4593_s9 + $0x488] sm:$0xff]  ;;  %v2844_v48 = vld [vmem:[%s4593_s9 + $0x420] sm:$0xff]  ;;  %v2354_v52 = vld [vmem:[%s4595_s11 + $0x78] sm:$0xff] }
 0x463   : > { %2131 = vmatpush.msra.mxu0 %v2801_v46  ;;  %v2857_v29 = vld [vmem:[%s4593_s9 + $0x480] sm:$0xff]  ;;  %2356 = vmatpush.msra.mxu2 %v2354_v52  ;;  %v2353_v46 = vld [vmem:[%s4595_s11 + $0x70] sm:$0xff] }
 0x464   : > { %2169 = vmatpush.msra.mxu1 %v2814_v44  ;;  %2245 = vmatpush.msrb.mxu3 %v2840_v54  ;;  %v2352_v44 = vld [vmem:[%s4595_s11 + $0x68] sm:$0xff]  ;;  %v2351_v54 = vld [vmem:[%s4595_s11 + $0x60] sm:$0xff] }
 0x465   : > { %2132 = vmatpush.msra.mxu0 %v2800_v56  ;;  %v2184_v53 = vld [vmem:[#allocation3 + $0x9] sm:$0x1]  ;;  %v2146_v13 = vld [vmem:[#allocation3 + $0x8] sm:$0x1]  ;;  %v2222_v15 = vld [vmem:[#allocation3 + $0xa] sm:$0x1]  ;;  %2357 = vmatpush.msra.mxu2 %v2353_v46 }
 0x466   : > { %2170 = vmatpush.msra.mxu1 %v2813_v41  ;;  %2246 = vmatpush.msrb.mxu3 %v2839_v58  ;;  %v2260_v39 = vld [vmem:[#allocation3 + $0xb] sm:$0x1]  ;;  %v2298_v50 = vld [vmem:[#allocation3 + $0xc] sm:$0x1]  ;;  %v2350_v56 = vld [vmem:[%s4595_s11 + $0x58] sm:$0xff] }
 0x467   : > { %2752 = vmatmul.msk.f32.vlgmr.msrb.gmra.mxu0 %vm1841_vm9, %v1956_v38  ;;  %2765 = vmatmul.msk.f32.vlgmr.msrb.gmra.mxu1 %vm1841_vm9, %v1994_v36  ;;  %v2349_v41 = vld [vmem:[%s4595_s11 + $0x50] sm:$0xff]  ;;  %v2348_v58 = vld [vmem:[%s4595_s11 + $0x48] sm:$0xff]  ;;  %v2346_v38 = vld [vmem:[%s4595_s11 + $0x38] sm:$0xff] }
 0x468   : > { %2791 = vmatmul.msk.f32.vlgmr.msra.gmra.mxu3 %vm1841_vm9, %v2070_v62  ;;  %2133 = vmatpush.msra.mxu0 %v2799_v60  ;;  %v2347_v60 = vld [vmem:[%s4595_s11 + $0x40] sm:$0xff]  ;;  %v2345_v36 = vld [vmem:[%s4595_s11 + $0x30] sm:$0xff]  ;;  %v2344_v62 = vld [vmem:[%s4595_s11 + $0x28] sm:$0xff] }
 0x469   : > { %2171 = vmatpush.msra.mxu1 %v2812_v61  ;;  %2247 = vmatpush.msrb.mxu3 %v2838_v57 }
 0x46a   : > { %2134 = vmatpush.msra.mxu0 %v2798_v34  ;;  %2830 = vmatmul.msk.f32.vlgmr.msrb.gmra.mxu2 %vm1841_vm9, %v2184_v53 }
 0x46b   : > { %2172 = vmatpush.msra.mxu1 %v2811_v59  ;;  %2248 = vmatpush.msrb.mxu3 %v2837_v63  ;;  %v2343_v59 = vld [vmem:[%s4595_s11 + $0x20] sm:$0xff] }
 0x46c   : > { %2135 = vmatpush.msra.mxu0 %v2797_v0  ;;  %2358 = vmatpush.msra.mxu2 %v2352_v44 }
 0x46d   : > { %2173 = vmatpush.msra.mxu1 %v2810_v1  ;;  %2249 = vmatpush.msrb.mxu3 %v2836_v32  ;;  %v2342_v1 = vld [vmem:[%s4595_s11 + $0x18] sm:$0xff]  ;;  %v2341_v32 = vld [vmem:[%s4595_s11 + $0x10] sm:$0xff] }
 0x46e   : > { %2136 = vmatpush.msra.mxu0 %v2796_v49  ;;  %2359 = vmatpush.msra.mxu2 %v2351_v54 }
 0x46f   : > { %2174 = vmatpush.msra.mxu1 %v2809_v55  ;;  %2250 = vmatpush.msrb.mxu3 %v2835_v2  ;;  %v2340_v55 = vld [vmem:[%s4595_s11 + $0x8] sm:$0xff]  ;;  %v2339_v2 = vld [vmem:[%s4595_s11] sm:$0xff] }
 0x470   : > { %2137 = vmatpush.msra.mxu0 %v2795_v3  ;;  %2360 = vmatpush.msra.mxu2 %v2350_v56 }
 0x471   : > { %2175 = vmatpush.msra.mxu1 %v2808_v30  ;;  %2251 = vmatpush.msrb.mxu3 %v2834_v45 }
 0x472   : > { %2138 = vmatpush.msra.mxu0 %v2794_v51  ;;  %2361 = vmatpush.msra.mxu2 %v2349_v41 }
 0x473   : > { %2176 = vmatpush.msra.mxu1 %v2807_v4  ;;  %2252 = vmatpush.msrb.mxu3 %v2833_v47 }
 0x474   : > { %2139 = vmatpush.msra.mxu0 %v2793_v5  ;;  %2362 = vmatpush.msra.mxu2 %v2348_v58 }
 0x475   : > { %2177 = vmatpush.msra.mxu1 %v2806_v6  ;;  %2253 = vmatpush.msrb.mxu3 %v2832_v7 }
 0x476   : > { %2140 = vmatpush.msra.mxu0 %v2792_v8  ;;  %2363 = vmatpush.msra.mxu2 %v2347_v60 }
 0x477   : > { %2178 = vmatpush.msra.mxu1 %v2805_v9  ;;  %2254 = vmatpush.msrb.mxu3 %v2831_v10 }
 0x478   : > { %2804 = vmatmul.msk.f32.vlgmr.msra.gmra.mxu0 %vm1841_vm9, %v2108_v12  ;;  %2817 = vmatmul.msk.f32.vlgmr.msra.gmra.mxu1 %vm1841_vm9, %v2146_v13 }
 0x479   : > { %2843 = vmatmul.msk.f32.vlgmr.msrb.gmra.mxu3 %vm1841_vm9, %v2222_v15  ;;  %2281 = vmatpush.msrb.mxu0 %v2855_v11 }
 0x47a   : > { %2319 = vmatpush.msrb.mxu1 %v2868_v14  ;;  %2364 = vmatpush.msra.mxu2 %v2346_v38 }
 0x47b   : > { %2282 = vmatpush.msrb.mxu0 %v2854_v16  ;;  %v2336_v16 = vld [vmem:[%s4594_s10] sm:$0x1] }
 0x47c   : > { %2320 = vmatpush.msrb.mxu1 %v2867_v17  ;;  %2365 = vmatpush.msra.mxu2 %v2345_v36 }
 0x47d   : > { %2283 = vmatpush.msrb.mxu0 %v2853_v18 }
 0x47e   : > { %2321 = vmatpush.msrb.mxu1 %v2866_v19  ;;  %2366 = vmatpush.msra.mxu2 %v2344_v62 }
 0x47f   : > { %2284 = vmatpush.msrb.mxu0 %v2852_v20  ;;  %v2355_v20 = vld [vmem:[%s4596_s12] sm:$0x1] }
 0x480   : > { %2322 = vmatpush.msrb.mxu1 %v2865_v21  ;;  %2367 = vmatpush.msra.mxu2 %v2343_v59 }
 0x481   : > { %2285 = vmatpush.msrb.mxu0 %v2851_v22 }
 0x482   : > { %2323 = vmatpush.msrb.mxu1 %v2864_v23  ;;  %2368 = vmatpush.msra.mxu2 %v2342_v1 }
 0x483   : > { %2286 = vmatpush.msrb.mxu0 %v2850_v24 }
 0x484   : > { %2324 = vmatpush.msrb.mxu1 %v2863_v25  ;;  %2369 = vmatpush.msra.mxu2 %v2341_v32 }
 0x485   : > { %2287 = vmatpush.msrb.mxu0 %v2849_v26 }
 0x486   : > { %2325 = vmatpush.msrb.mxu1 %v2862_v27  ;;  %2370 = vmatpush.msra.mxu2 %v2340_v55 }
 0x487   : > { %2288 = vmatpush.msrb.mxu0 %v2848_v28 }
 0x488   : > { %2326 = vmatpush.msrb.mxu1 %v2861_v35  ;;  %2371 = vmatpush.msra.mxu2 %v2339_v2 }
 0x489   : > { %2289 = vmatpush.msrb.mxu0 %v2847_v37 }
 0x48a   : > { %2327 = vmatpush.msrb.mxu1 %v2860_v40 }
 0x48b   : > { %2290 = vmatpush.msrb.mxu0 %v2846_v33 }
 0x48c   : > { %2328 = vmatpush.msrb.mxu1 %v2859_v42 }
 0x48d   : > { %2291 = vmatpush.msrb.mxu0 %v2845_v31 }
 0x48e   : > { %2329 = vmatpush.msrb.mxu1 %v2858_v43 }
 0x48f   : > { %2292 = vmatpush.msrb.mxu0 %v2844_v48 }
 0x490   : > { %2330 = vmatpush.msrb.mxu1 %v2857_v29  ;;  %2856 = vmatmul.msk.f32.vlgmr.msrb.gmra.mxu0 %vm1841_vm9, %v2260_v39 }
 0x491   : > { %2869 = vmatmul.msk.f32.vlgmr.msrb.gmra.mxu1 %vm1841_vm9, %v2298_v50 }
 0x4db   : > { %v1892_v61 = vpop.f32.mrf.mxu0  ;;  %v1915_v57 = vpop.f32.mrf.mxu1 }
 0x4dc   : > { %v1916_v53 = vadd.f32 %v1915_v57, %v1892_v61 }
 0x4e2   : > { %v1952_v34 = vpop.f32.mrf.mxu3 }
 0x4e3   : > { %v1955_v63 = vadd.f32 %v1952_v34, %v1916_v53 }
 0x4e4   : > { %v1990_v0 = vpop.f32.mrf.mxu0  ;;  %v2028_v3 = vpop.f32.mrf.mxu1 }
 0x4e5   : > { %v1993_v49 = vadd.f32 %v1990_v0, %v1955_v63  ;;  %v2066_v45 = vpop.f32.mrf.mxu2 }
 0x4e7   : > { %v2031_v30 = vadd.f32 %v2028_v3, %v1993_v49 }
 0x4e9   : > { %v2069_v51 = vadd.f32 %v2066_v45, %v2031_v30 }
 0x4eb   : > { %v2104_v4 = vpop.f32.mrf.mxu3 }
 0x4ec   : > { %v2107_v5 = vadd.f32 %v2104_v4, %v2069_v51 }
 0x4ed   : > { %v2218_v9 = vpop.f32.mrf.mxu2 }
 0x4f5   : > { %v2142_v47 = vpop.f32.mrf.mxu0  ;;  %v2180_v7 = vpop.f32.mrf.mxu1 }
 0x4f6   : > { %v2145_v6 = vadd.f32 %v2142_v47, %v2107_v5 }
 0x4f8   : > { %v2183_v8 = vadd.f32 %v2180_v7, %v2145_v6 }
 0x4fa   : > { %v2221_v10 = vadd.f32 %v2218_v9, %v2183_v8 }
 0x4fc   : > { %v2256_v11 = vpop.f32.mrf.mxu3 }
 0x4fd   : > { %v2259_v12 = vadd.f32 %v2256_v11, %v2221_v10 }
 0x50d   : > { %v2294_v13 = vpop.f32.mrf.mxu0 }
 0x50e   : > { %v2297_v14 = vadd.f32 %v2294_v13, %v2259_v12  ;;  %v2332_v15 = vpop.f32.mrf.mxu1 }
 0x510   : > { %v2335_v17 = vadd.f32 %v2332_v15, %v2297_v14 }
 0x512   : > { %v2337_v18 = vadd.f32 %v2336_v16, %v2335_v17 }
 0x514   : > { %v2338_v19 = vmax.f32 %v2337_v18, 0.0 }
 0x516   : > { %2372 = vmatmul.f32.vlgmr.msra.gmra.mxu2 %v2338_v19 }
 0x599   : > { %v2373_v21 = vpop.f32.mrf.mxu2 }
 0x59a   : > { %v2374_v22 = vadd.f32 %v2373_v21, %v2355_v20 }
 0x59c   : > { %2377 = vst.msk [vmem:[%s432_s22] sm:$0x1] %vm2376_vm11, %v2374_v22 }
 0x59d   : > { %2946 = shalt.err (!%p2943_p3)
}
 0x59e   : > { %2880 = dma.vmem_to_hbm [thread:$0]  (%p3091_p5), %s2390_s27, 16, %s2392_s14, %s2379_s20  }
 0x59f PF: > { %p2886_p4 = scmp.ge.s32.totalorder %s2981_s28, 2  ;;  %s2403_s17 = sand.u32 1, %s2969_s25  }
 0x5a0   : > { %s2404_s22 = scalar_lea.sflag [#allocation5], %s2403_s17 }
 0x5a1   : > { %p2883_p7 = pnand %p2886_p4, %p3095_p6 }
 0x5a3   : > { %p2884_p8 = pneg %p2883_p7 }
 0x5a5   : > { %2964 = dma.done.wait (%p2884_p8), %s2404_s22, 16  }
 0x5a6   : > { %2966 = vsyncadd (%p2884_p8), %s2404_s22, 4294967280  ;;  %s4609_s28 = sld [smem:[#allocation8_spill]]  ;;  %s4612_s25 = smov %s2973_s26 }
 0x5a7   : > { %s4610_s19 = sld [smem:[#allocation7_spill]] }
 0x5a8   : > { %s4611_s27 = sld [smem:[#allocation9_spill]] }
 0x5ac   : > { %p23_p9 = scmp.ge.s32.totalorder %s4609_s28, 4  }
 0x5ad   : > { %s4613_s26 = smov %s4610_s19 }
 0x5ae   :  { %25 = sbr.rel (!%p23_p9) target bundleno = 3 (0x3), region = 127 }
 0x5b3   :  { %2409 = vsyncpa [#allocation5], 1 }
 0x5b4   :  { %2411 = vsyncpa [#allocation5 + $0x1], 1 }

</bundles_post_ra>
